<compile_context>
chip_gen: v7x
topology: tpu7x:2x2x1
jax: 0.10.0
libtpu: 0.0.40
codegen_flags: <defaults>
</compile_context>

<pallas_src>
import functools

import jax
import jax.numpy as jnp
from jax.experimental import pallas as pl
from jax.experimental.pallas import tpu as pltpu


def _round_up(x, m):
    return (x + m - 1) // m * m


# ----------------------------------------------------------------------------
# Fused multi-layer LSTM kernel.
# Grid: batch tiles only ("parallel"). Inside one grid step we run every layer
# and every timestep; the sequence output ref doubles as the inter-layer buffer.
# Gate order matches PyTorch nn.LSTM: i, f, g, o (padded per-gate to Hp lanes).
# ----------------------------------------------------------------------------
def _fused_lstm_kernel(emb_ref, h0_ref, c0_ref, wih0_ref, wihr_ref, whh_ref,
                       b_ref, seq_ref, hT_ref, cT_ref, gx_ref, h_sc, c_sc):
    S, Bb, Hp = seq_ref.shape
    L = h0_ref.shape[0]
    G = 4 * Hp

    def run_layer(layer, x_flat, wih_t):
        # (1) Hoisted input projection: one (S*Bb, D) x (D, 4Hp) MXU matmul
        #     for the whole sequence (bias folded in here).
        gx = (jnp.dot(x_flat, wih_t, preferred_element_type=jnp.float32)
              + b_ref[layer])                       # (S*Bb, 4Hp)
        gx_ref[...] = gx.reshape(S, Bb, G)

        whh_t = whh_ref[layer]                      # (Hp, 4Hp), static index
        h_sc[...] = h0_ref[layer]
        c_sc[...] = c0_ref[layer]

        # (2) Serial recurrence: only h_{t-1} @ W_hh per step.
        def step(t, carry):
            gates = gx_ref[t] + jnp.dot(h_sc[...], whh_t,
                                        preferred_element_type=jnp.float32)
            # Hp is a multiple of 128 -> each gate slice is vreg-aligned.
            i_g = jax.nn.sigmoid(gates[:, 0 * Hp:1 * Hp])
            f_g = jax.nn.sigmoid(gates[:, 1 * Hp:2 * Hp])
            g_g = jnp.tanh(gates[:, 2 * Hp:3 * Hp])
            o_g = jax.nn.sigmoid(gates[:, 3 * Hp:4 * Hp])
            c_new = f_g * c_sc[...] + i_g * g_g
            h_new = o_g * jnp.tanh(c_new)
            c_sc[...] = c_new
            h_sc[...] = h_new
            seq_ref[t] = h_new                      # lane-dense (Bb, Hp) store
            return carry

        jax.lax.fori_loop(0, S, step, 0, unroll=True)
        hT_ref[layer] = h_sc[...]
        cT_ref[layer] = c_sc[...]

    # Layer 0 consumes the (padded) embeddings.
    emb_flat = emb_ref[...].reshape(S * Bb, emb_ref.shape[-1])
    run_layer(0, emb_flat, wih0_ref[...])
    # Layers 1..L-1 consume the previous layer's sequence (VMEM-resident).
    for layer in range(1, L):
        x_flat = seq_ref[...].reshape(S * Bb, Hp)
        run_layer(layer, x_flat, wihr_ref[layer - 1])


def fused_lstm(emb, h0, c0, w_ih0_t, w_ih_rest_t, w_hh_t, bias, *,
               batch_tile=8):
    """emb: (S, Bp, Dp); h0/c0: (L, Bp, Hp); weights padded & pre-transposed.
    Returns seq (S, Bp, Hp), h_T (L, Bp, Hp), c_T (L, Bp, Hp)."""
    S, Bp, Dp = emb.shape
    L, Hp, G = w_hh_t.shape
    Lr = w_ih_rest_t.shape[0]
    Bb = min(batch_tile, Bp)
    assert Bp % Bb == 0 and Bb % 8 == 0

    grid_spec = pltpu.PrefetchScalarGridSpec(
        num_scalar_prefetch=0,
        grid=(Bp // Bb,),
        in_specs=[
            pl.BlockSpec((S, Bb, Dp), lambda b: (0, b, 0)),
            pl.BlockSpec((L, Bb, Hp), lambda b: (0, b, 0)),
            pl.BlockSpec((L, Bb, Hp), lambda b: (0, b, 0)),
            pl.BlockSpec((Dp, G), lambda b: (0, 0)),
            pl.BlockSpec((Lr, Hp, G), lambda b: (0, 0, 0)),
            pl.BlockSpec((L, Hp, G), lambda b: (0, 0, 0)),
            pl.BlockSpec((L, 1, G), lambda b: (0, 0, 0)),
        ],
        out_specs=[
            pl.BlockSpec((S, Bb, Hp), lambda b: (0, b, 0)),
            pl.BlockSpec((L, Bb, Hp), lambda b: (0, b, 0)),
            pl.BlockSpec((L, Bb, Hp), lambda b: (0, b, 0)),
        ],
        scratch_shapes=[
            pltpu.VMEM((S, Bb, G), jnp.float32),    # precomputed x-gates
            pltpu.VMEM((Bb, Hp), jnp.float32),      # h state
            pltpu.VMEM((Bb, Hp), jnp.float32),      # c state
        ],
    )

    return pl.pallas_call(
        _fused_lstm_kernel,
        out_shape=(
            jax.ShapeDtypeStruct((S, Bp, Hp), jnp.float32),
            jax.ShapeDtypeStruct((L, Bp, Hp), jnp.float32),
            jax.ShapeDtypeStruct((L, Bp, Hp), jnp.float32),
        ),
        grid_spec=grid_spec,
        compiler_params=pltpu.CompilerParams(
            # Batch tiles are independent -> megacore / 2nd TC can split them.
            dimension_semantics=("parallel",),
            # Raise scoped VMEM limit explicitly (matters on v5e default 16 MiB
            # once S / Bb / Hp grow); usage here is ~2 MiB.
            vmem_limit_bytes=32 * 1024 * 1024),
    )(emb, h0, c0, w_ih0_t, w_ih_rest_t, w_hh_t, bias)


# ----------------------------------------------------------------------------
# Output projection + log_softmax, tiled over (N, V).
# Pass 1: logits tiles + online row logsumexp. Pass 2: in-place normalize.
# ----------------------------------------------------------------------------
def _proj_lse_kernel(x_ref, w_ref, b_ref, logits_ref, lse_ref, m_sc, l_sc,
                     *, v_real, tv):
    vi = pl.program_id(1)

    @pl.when(vi == 0)
    def _():
        m_sc[...] = jnp.full_like(m_sc, -1e30)
        l_sc[...] = jnp.zeros_like(l_sc)

    logits = (jnp.dot(x_ref[...], w_ref[...], preferred_element_type=jnp.float32)
              + b_ref[...])
    logits_ref[...] = logits

    # Mask padded vocab columns out of the softmax statistics.
    col = vi * tv + jax.lax.broadcasted_iota(jnp.int32, logits.shape, 1)
    masked = jnp.where(col < v_real, logits, -1e30)

    m_prev = m_sc[...]
    m_new = jnp.maximum(m_prev, jnp.max(masked, axis=-1, keepdims=True))
    l_sc[...] = (jnp.exp(m_prev - m_new) * l_sc[...]
                 + jnp.sum(jnp.exp(masked - m_new), axis=-1, keepdims=True))
    m_sc[...] = m_new

    @pl.when(vi == pl.num_programs(1) - 1)
    def _():
        lse_ref[...] = m_sc[...] + jnp.log(l_sc[...])


def _sub_lse_kernel(logits_ref, lse_ref, out_ref):
    out_ref[...] = logits_ref[...] - lse_ref[...]


def pool_log_softmax(x, w_t, b_row, v_real):
    """x: (N, Hp); w_t: (Hp, Vp) zero-padded; b_row: (1, Vp). Returns (N, v_real)."""
    N, Hp = x.shape
    Vp = w_t.shape[-1]

    TN = min(256, _round_up(N, 8))
    Np = _round_up(N, TN)
    TV = min(512, Vp)
    assert Vp % TV == 0

    if Np != N:
        x = jnp.pad(x, ((0, Np - N), (0, 0)))

    grid = (Np // TN, Vp // TV)
    cparams = dict(vmem_limit_bytes=32 * 1024 * 1024)

    logits, lse = pl.pallas_call(
        functools.partial(_proj_lse_kernel, v_real=v_real, tv=TV),
        out_shape=(jax.ShapeDtypeStruct((Np, Vp), jnp.float32),
                   jax.ShapeDtypeStruct((Np, 1), jnp.float32)),
        grid_spec=pltpu.PrefetchScalarGridSpec(
            num_scalar_prefetch=0,
            grid=grid,
            in_specs=[
                pl.BlockSpec((TN, Hp), lambda n, v: (n, 0)),
                pl.BlockSpec((Hp, TV), lambda n, v: (0, v)),
                pl.BlockSpec((1, TV), lambda n, v: (0, v)),
            ],
            out_specs=[
                pl.BlockSpec((TN, TV), lambda n, v: (n, v)),
                pl.BlockSpec((TN, 1), lambda n, v: (n, 0)),
            ],
            scratch_shapes=[pltpu.VMEM((TN, 1), jnp.float32),
                            pltpu.VMEM((TN, 1), jnp.float32)]),
        compiler_params=pltpu.CompilerParams(
            dimension_semantics=("parallel", "arbitrary"), **cparams),
    )(x, w_t, b_row)

    log_probs = pl.pallas_call(
        _sub_lse_kernel,
        out_shape=jax.ShapeDtypeStruct((Np, Vp), jnp.float32),
        grid_spec=pltpu.PrefetchScalarGridSpec(
            num_scalar_prefetch=0,
            grid=grid,
            in_specs=[
                pl.BlockSpec((TN, TV), lambda n, v: (n, v)),
                pl.BlockSpec((TN, 1), lambda n, v: (n, 0)),
            ],
            out_specs=pl.BlockSpec((TN, TV), lambda n, v: (n, v))),
        compiler_params=pltpu.CompilerParams(
            dimension_semantics=("parallel", "parallel"), **cparams),
        input_output_aliases={0: 0},   # normalize logits in place
    )(logits, lse)

    return log_probs[:N, :v_real]


# ----------------------------------------------------------------------------
# Parameter setup (PyTorch-equivalent init) + padded / pre-transposed layout.
# ----------------------------------------------------------------------------
def _pad_gated_t(w, H, d_in, d_in_p, Hp):
    """w: (4H, d_in) PyTorch layout (gates i,f,g,o). -> (d_in_p, 4*Hp), per-gate
    zero-padded so gate k occupies columns [k*Hp, k*Hp+H)."""
    w4 = w.reshape(4, H, d_in)
    w4 = jnp.pad(w4, ((0, 0), (0, Hp - H), (0, d_in_p - d_in)))
    return jnp.transpose(w4, (2, 0, 1)).reshape(d_in_p, 4 * Hp)


def _pad_gated_bias(b, H, Hp):
    b4 = jnp.pad(b.reshape(4, H), ((0, 0), (0, Hp - H)))
    return b4.reshape(4 * Hp)


def init_params(key, vocab_size, emb_dim, n_hidden, n_layers):
    initrange = 0.1
    k_lstm = 1.0 / float(n_hidden) ** 0.5

    Hp = _round_up(n_hidden, 128)
    Dp = _round_up(emb_dim, 128)
    TV = 512 if vocab_size >= 512 else _round_up(vocab_size, 128)
    Vp = _round_up(vocab_size, TV)

    keys = jax.random.split(key, 2 + 4 * n_layers)

    # Embedding: init_weights() overrides emb_mtrix with U(-0.1, 0.1).
    emb_w = jax.random.uniform(keys[0], (vocab_size, emb_dim), jnp.float32,
                               -initrange, initrange)

    raw_layers, wih_list, whh_list, b_list = [], [], [], []
    for layer in range(n_layers):
        d_in = emb_dim if layer == 0 else n_hidden
        kw = keys[2 + 4 * layer: 2 + 4 * (layer + 1)]
        w_ih = jax.random.uniform(kw[0], (4 * n_hidden, d_in), jnp.float32,
                                  -k_lstm, k_lstm)
        w_hh = jax.random.uniform(kw[1], (4 * n_hidden, n_hidden), jnp.float32,
                                  -k_lstm, k_lstm)
        b_ih = jax.random.uniform(kw[2], (4 * n_hidden,), jnp.float32,
                                  -k_lstm, k_lstm)
        b_hh = jax.random.uniform(kw[3], (4 * n_hidden,), jnp.float32,
                                  -k_lstm, k_lstm)
        raw_layers.append(dict(w_ih=w_ih, w_hh=w_hh, b_ih=b_ih, b_hh=b_hh))

        din_p = Dp if layer == 0 else Hp
        wih_list.append(_pad_gated_t(w_ih, n_hidden, d_in, din_p, Hp))
        whh_list.append(_pad_gated_t(w_hh, n_hidden, n_hidden, Hp, Hp))
        b_list.append(_pad_gated_bias(b_ih + b_hh, n_hidden, Hp))

    # Pooling Linear: weight U(-0.1, 0.1), bias zeros.
    pool_w = jax.random.uniform(keys[1], (vocab_size, n_hidden), jnp.float32,
                                -initrange, initrange)
    pool_b = jnp.zeros((vocab_size,), jnp.float32)

    kernel_params = dict(
        emb_weight=jnp.pad(emb_w, ((0, 0), (0, Dp - emb_dim))),   # (V, Dp)
        w_ih0_t=wih_list[0],                                       # (Dp, 4Hp)
        w_ih_rest_t=(jnp.stack(wih_list[1:], 0) if n_layers > 1
                     else jnp.zeros((1, Hp, 4 * Hp), jnp.float32)),
        w_hh_t=jnp.stack(whh_list, 0),                             # (L, Hp, 4Hp)
        bias=jnp.stack(b_list, 0)[:, None, :],                     # (L, 1, 4Hp)
        pool_w_t=jnp.pad(pool_w.T,
                         ((0, Hp - n_hidden), (0, Vp - vocab_size))),  # (Hp, Vp)
        pool_b=jnp.pad(pool_b, (0, Vp - vocab_size))[None, :],     # (1, Vp)
    )
    raw = dict(emb=emb_w, layers=raw_layers, pool_w=pool_w, pool_b=pool_b)
    meta = dict(vocab=vocab_size, emb_dim=emb_dim, n_hidden=n_hidden,
                n_layers=n_layers, hp=Hp, dp=Dp, vp=Vp)
    return dict(kernel=kernel_params, raw=raw, meta=meta)


# ----------------------------------------------------------------------------
# Full RNNModel forward (rnn_type='lstm').
# ----------------------------------------------------------------------------
def rnnmodel_forward(params, tokens, hidden):
    """tokens: (S, B) int32; hidden: (h0, c0), each (n_layers, B, n_hidden)."""
    kp, meta = params["kernel"], params["meta"]
    S, B = tokens.shape
    H, Hp, V = meta["n_hidden"], meta["hp"], meta["vocab"]
    Bp = _round_up(B, 8)

    h0, c0 = hidden
    # Embedding lookup (XLA glue). Dropout = identity (eval mode).
    emb = kp["emb_weight"][tokens]                        # (S, B, Dp)
    emb = jnp.pad(emb, ((0, 0), (0, Bp - B), (0, 0)))
    h0p = jnp.pad(h0, ((0, 0), (0, Bp - B), (0, Hp - H)))
    c0p = jnp.pad(c0, ((0, 0), (0, Bp - B), (0, Hp - H)))

    seq, hT, cT = fused_lstm(emb, h0p, c0p, kp["w_ih0_t"], kp["w_ih_rest_t"],
                             kp["w_hh_t"], kp["bias"])

    h_n = hT[:, :B, :H]
    c_n = cT[:, :B, :H]

    # Matches pooled.view(-1, vocab_size) row ordering (seq-major, batch-minor).
    x = seq[:, :B, :].reshape(S * B, Hp)
    log_probs = pool_log_softmax(x, kp["pool_w_t"], kp["pool_b"], V)
    return log_probs, (h_n, c_n)


# ----------------------------------------------------------------------------
# Pure-JAX reference (unpadded weights) for correctness checking.
# ----------------------------------------------------------------------------
def _reference_forward(raw, tokens, hidden):
    h_all, c_all = hidden
    x = raw["emb"][tokens]
    H = raw["layers"][0]["w_hh"].shape[-1]
    h_fin, c_fin = [], []
    for layer_idx, lp in enumerate(raw["layers"]):
        h, c = h_all[layer_idx], c_all[layer_idx]
        outs = []
        for t in range(x.shape[0]):
            gates = (x[t] @ lp["w_ih"].T + lp["b_ih"]
                     + h @ lp["w_hh"].T + lp["b_hh"])
            i = jax.nn.sigmoid(gates[:, 0 * H:1 * H])
            f = jax.nn.sigmoid(gates[:, 1 * H:2 * H])
            g = jnp.tanh(gates[:, 2 * H:3 * H])
            o = jax.nn.sigmoid(gates[:, 3 * H:4 * H])
            c = f * c + i * g
            h = o * jnp.tanh(c)
            outs.append(h)
        x = jnp.stack(outs, axis=0)
        h_fin.append(h)
        c_fin.append(c)
    logits = x.reshape(-1, H) @ raw["pool_w"].T + raw["pool_b"]
    return (jax.nn.log_softmax(logits, axis=-1),
            (jnp.stack(h_fin, 0), jnp.stack(c_fin, 0)))


if __name__ == "__main__":
    VOCAB = 128
    EMB_DIM = 32
    N_HIDDEN = 32
    N_LAYERS = 2
    SEQ = 8
    BATCH = 4

    root = jax.random.PRNGKey(0)
    k_params, k_tokens = jax.random.split(root)

    params = init_params(k_params, VOCAB, EMB_DIM, N_HIDDEN, N_LAYERS)
    tokens = jax.random.randint(k_tokens, (SEQ, BATCH), 0, VOCAB, jnp.int32)

    # init_hidden(batch_size) for 'lstm': zeros (n_layers, batch, n_hidden) x2
    h0 = jnp.zeros((N_LAYERS, BATCH, N_HIDDEN), jnp.float32)
    c0 = jnp.zeros((N_LAYERS, BATCH, N_HIDDEN), jnp.float32)

    fwd = jax.jit(functools.partial(rnnmodel_forward, params))
    log_probs, (h_n, c_n) = fwd(tokens, (h0, c0))
    jax.block_until_ready((log_probs, h_n, c_n))

    assert log_probs.shape == (SEQ * BATCH, VOCAB)
    assert h_n.shape == (N_LAYERS, BATCH, N_HIDDEN)
    assert c_n.shape == (N_LAYERS, BATCH, N_HIDDEN)
    # log_softmax rows must sum to 1 in prob space
    assert jnp.allclose(jnp.sum(jnp.exp(log_probs), axis=-1), 1.0, atol=1e-4)

    # Check against a pure-JAX reference implementation.
    ref_lp, (ref_h, ref_c) = _reference_forward(params["raw"], tokens, (h0, c0))
    assert jnp.allclose(log_probs, ref_lp, atol=2e-3, rtol=2e-3), float(
        jnp.max(jnp.abs(log_probs - ref_lp)))
    assert jnp.allclose(h_n, ref_h, atol=2e-3, rtol=2e-3)
    assert jnp.allclose(c_n, ref_c, atol=2e-3, rtol=2e-3)

    print("KERNEL_OK")
</pallas_src>

<mosaic_0001>
module attributes {stable_mosaic.version = 11 : i64} {
  func.func @_sub_lse_kernel(%arg0: i32, %arg1: i32, %arg2: memref<32x128xf32, #tpu.memory_space<vmem>>, %arg3: memref<32x1xf32, #tpu.memory_space<vmem>>, %arg4: memref<32x128xf32, #tpu.memory_space<vmem>>) attributes {dimension_semantics = [#tpu.dimension_semantics<parallel>, #tpu.dimension_semantics<parallel>], iteration_bounds = array<i64: 1, 1>, scalar_prefetch = 0 : i64, scratch_operands = 0 : i64, tpu.core_type = #tpu.core_type<tc>, window_params = [{transform_indices = @transform_0, window_bounds = array<i64: 32, 128>}, {transform_indices = @transform_1, window_bounds = array<i64: 32, 1>}, {transform_indices = @transform_2, window_bounds = array<i64: 32, 128>}]} {
    %c0 = arith.constant 0 : index
    %c0_0 = arith.constant 0 : index
    %0 = vector.load %arg2[%c0, %c0_0] : memref<32x128xf32, #tpu.memory_space<vmem>>, vector<32x128xf32>
    %c0_1 = arith.constant 0 : index
    %c0_2 = arith.constant 0 : index
    %1 = vector.load %arg3[%c0_1, %c0_2] : memref<32x1xf32, #tpu.memory_space<vmem>>, vector<32x1xf32>
    %2 = vector.broadcast %1 : vector<32x1xf32> to vector<32x128xf32>
    %3 = arith.subf %0, %2 : vector<32x128xf32>
    %c0_3 = arith.constant 0 : index
    %c0_4 = arith.constant 0 : index
    %4 = vector.load %arg4[%c0_3, %c0_4] : memref<32x128xf32, #tpu.memory_space<vmem>>, vector<32x128xf32>
    tpu.vector_store %arg4[%c0_3, %c0_4], %3 {strides = array<i32>} : memref<32x128xf32, #tpu.memory_space<vmem>>, vector<32x128xf32>,
    return
  }
  func.func @transform_0(%arg0: i32, %arg1: i32) -> (i32, i32) {
    %c0_i32 = arith.constant 0 : i32
    return %arg0, %arg1 : i32, i32
  }
  func.func @transform_1(%arg0: i32, %arg1: i32) -> (i32, i32) {
    %c0_i32 = arith.constant 0 : i32
    %c0_i32_0 = arith.constant 0 : i32
    return %arg0, %c0_i32 : i32, i32
  }
  func.func @transform_2(%arg0: i32, %arg1: i32) -> (i32, i32) {
    %c0_i32 = arith.constant 0 : i32
    return %arg0, %arg1 : i32, i32
  }
}

module attributes {stable_mosaic.version = 11 : i64} {
  func.func @_fused_lstm_kernel(%arg0: i32, %arg1: memref<8x8x128xf32, #tpu.memory_space<vmem>>, %arg2: memref<2x8x128xf32, #tpu.memory_space<vmem>>, %arg3: memref<2x8x128xf32, #tpu.memory_space<vmem>>, %arg4: memref<128x512xf32, #tpu.memory_space<vmem>>, %arg5: memref<1x128x512xf32, #tpu.memory_space<vmem>>, %arg6: memref<2x128x512xf32, #tpu.memory_space<vmem>>, %arg7: memref<2x1x512xf32, #tpu.memory_space<vmem>>, %arg8: memref<8x8x128xf32, #tpu.memory_space<vmem>>, %arg9: memref<2x8x128xf32, #tpu.memory_space<vmem>>, %arg10: memref<2x8x128xf32, #tpu.memory_space<vmem>>, %arg11: memref<8x8x512xf32, #tpu.memory_space<vmem>>, %arg12: memref<8x128xf32, #tpu.memory_space<vmem>>, %arg13: memref<8x128xf32, #tpu.memory_space<vmem>>) attributes {dimension_semantics = [#tpu.dimension_semantics<parallel>], iteration_bounds = array<i64: 1>, scalar_prefetch = 0 : i64, scratch_operands = 3 : i64, tpu.core_type = #tpu.core_type<tc>, window_params = [{transform_indices = @transform_0, window_bounds = array<i64: 8, 8, 128>}, {transform_indices = @transform_1, window_bounds = array<i64: 2, 8, 128>}, {transform_indices = @transform_2, window_bounds = array<i64: 2, 8, 128>}, {pipeline_mode = #tpu.pipeline_mode<synchronous>, transform_indices = @transform_3, window_bounds = array<i64: 128, 512>}, {pipeline_mode = #tpu.pipeline_mode<synchronous>, transform_indices = @transform_4, window_bounds = array<i64: 1, 128, 512>}, {pipeline_mode = #tpu.pipeline_mode<synchronous>, transform_indices = @transform_5, window_bounds = array<i64: 2, 128, 512>}, {pipeline_mode = #tpu.pipeline_mode<synchronous>, transform_indices = @transform_6, window_bounds = array<i64: 2, 1, 512>}, {transform_indices = @transform_7, window_bounds = array<i64: 8, 8, 128>}, {transform_indices = @transform_8, window_bounds = array<i64: 2, 8, 128>}, {transform_indices = @transform_9, window_bounds = array<i64: 2, 8, 128>}]} {
    %c0 = arith.constant 0 : index
    %c0_0 = arith.constant 0 : index
    %c0_1 = arith.constant 0 : index
    %0 = vector.load %arg1[%c0, %c0_0, %c0_1] : memref<8x8x128xf32, #tpu.memory_space<vmem>>, vector<8x8x128xf32>
    %1 = vector.shape_cast %0 : vector<8x8x128xf32> to vector<64x128xf32>
    %c0_2 = arith.constant 0 : index
    %c0_3 = arith.constant 0 : index
    %2 = vector.load %arg4[%c0_2, %c0_3] : memref<128x512xf32, #tpu.memory_space<vmem>>, vector<128x512xf32>
    %cst = arith.constant dense<0.000000e+00> : vector<64x512xf32>
    %3 = tpu.matmul %1, %2, %cst {dimension_numbers = #tpu.dot_dimension_numbers<[1], [0], [0], [1], [0, 0, 1, 1], [], []>} : vector<64x128xf32>, vector<128x512xf32>, vector<64x512xf32> -> vector<64x512xf32>
    %c0_4 = arith.constant 0 : index
    %c0_5 = arith.constant 0 : index
    %c0_6 = arith.constant 0 : index
    %4 = vector.load %arg7[%c0_4, %c0_5, %c0_6] : memref<2x1x512xf32, #tpu.memory_space<vmem>>, vector<1x1x512xf32>
    %5 = vector.shape_cast %4 : vector<1x1x512xf32> to vector<1x512xf32>
    %6 = vector.broadcast %5 : vector<1x512xf32> to vector<64x512xf32>
    %7 = arith.addf %3, %6 : vector<64x512xf32>
    %8 = vector.shape_cast %7 : vector<64x512xf32> to vector<8x8x512xf32>
    %c0_7 = arith.constant 0 : index
    %c0_8 = arith.constant 0 : index
    %c0_9 = arith.constant 0 : index
    %9 = vector.load %arg11[%c0_7, %c0_8, %c0_9] : memref<8x8x512xf32, #tpu.memory_space<vmem>>, vector<8x8x512xf32>
    tpu.vector_store %arg11[%c0_7, %c0_8, %c0_9], %8 {strides = array<i32>} : memref<8x8x512xf32, #tpu.memory_space<vmem>>, vector<8x8x512xf32>,
    %c0_10 = arith.constant 0 : index
    %c0_11 = arith.constant 0 : index
    %c0_12 = arith.constant 0 : index
    %10 = vector.load %arg6[%c0_10, %c0_11, %c0_12] : memref<2x128x512xf32, #tpu.memory_space<vmem>>, vector<1x128x512xf32>
    %11 = vector.shape_cast %10 : vector<1x128x512xf32> to vector<128x512xf32>
    %c0_13 = arith.constant 0 : index
    %c0_14 = arith.constant 0 : index
    %c0_15 = arith.constant 0 : index
    %12 = vector.load %arg2[%c0_13, %c0_14, %c0_15] : memref<2x8x128xf32, #tpu.memory_space<vmem>>, vector<1x8x128xf32>
    %13 = vector.shape_cast %12 : vector<1x8x128xf32> to vector<8x128xf32>
    %c0_16 = arith.constant 0 : index
    %c0_17 = arith.constant 0 : index
    %14 = vector.load %arg12[%c0_16, %c0_17] : memref<8x128xf32, #tpu.memory_space<vmem>>, vector<8x128xf32>
    tpu.vector_store %arg12[%c0_16, %c0_17], %13 {strides = array<i32>} : memref<8x128xf32, #tpu.memory_space<vmem>>, vector<8x128xf32>,
    %c0_18 = arith.constant 0 : index
    %c0_19 = arith.constant 0 : index
    %c0_20 = arith.constant 0 : index
    %15 = vector.load %arg3[%c0_18, %c0_19, %c0_20] : memref<2x8x128xf32, #tpu.memory_space<vmem>>, vector<1x8x128xf32>
    %16 = vector.shape_cast %15 : vector<1x8x128xf32> to vector<8x128xf32>
    %c0_21 = arith.constant 0 : index
    %c0_22 = arith.constant 0 : index
    %17 = vector.load %arg13[%c0_21, %c0_22] : memref<8x128xf32, #tpu.memory_space<vmem>>, vector<8x128xf32>
    tpu.vector_store %arg13[%c0_21, %c0_22], %16 {strides = array<i32>} : memref<8x128xf32, #tpu.memory_space<vmem>>, vector<8x128xf32>,
    %c0_i32 = arith.constant 0 : i32
    %18 = arith.index_cast %c0_i32 : i32 to index
    %c0_23 = arith.constant 0 : index
    %c0_24 = arith.constant 0 : index
    %19 = vector.load %arg11[%18, %c0_23, %c0_24] : memref<8x8x512xf32, #tpu.memory_space<vmem>>, vector<1x8x512xf32>
    %20 = vector.shape_cast %19 : vector<1x8x512xf32> to vector<8x512xf32>
    %c0_25 = arith.constant 0 : index
    %c0_26 = arith.constant 0 : index
    %21 = vector.load %arg12[%c0_25, %c0_26] : memref<8x128xf32, #tpu.memory_space<vmem>>, vector<8x128xf32>
    %cst_27 = arith.constant dense<0.000000e+00> : vector<8x512xf32>
    %22 = tpu.matmul %21, %11, %cst_27 {dimension_numbers = #tpu.dot_dimension_numbers<[1], [0], [0], [1], [0, 0, 1, 1], [], []>} : vector<8x128xf32>, vector<128x512xf32>, vector<8x512xf32> -> vector<8x512xf32>
    %23 = arith.addf %20, %22 : vector<8x512xf32>
    %24 = vector.extract_strided_slice %23 {offsets = [0, 0], sizes = [8, 128], strides = [1, 1]} : vector<8x512xf32> to vector<8x128xf32>
    %25 = arith.negf %24 : vector<8x128xf32>
    %26 = math.exp %25 : vector<8x128xf32>
    %cst_28 = arith.constant 1.000000e+00 : f32
    %27 = vector.broadcast %cst_28 : f32 to vector<8x128xf32>
    %28 = arith.addf %27, %26 : vector<8x128xf32>
    %29 = arith.divf %27, %28 : vector<8x128xf32>
    %30 = vector.extract_strided_slice %23 {offsets = [0, 128], sizes = [8, 128], strides = [1, 1]} : vector<8x512xf32> to vector<8x128xf32>
    %31 = arith.negf %30 : vector<8x128xf32>
    %32 = math.exp %31 : vector<8x128xf32>
    %cst_29 = arith.constant 1.000000e+00 : f32
    %33 = vector.broadcast %cst_29 : f32 to vector<8x128xf32>
    %34 = arith.addf %33, %32 : vector<8x128xf32>
    %35 = arith.divf %33, %34 : vector<8x128xf32>
    %36 = vector.extract_strided_slice %23 {offsets = [0, 256], sizes = [8, 128], strides = [1, 1]} : vector<8x512xf32> to vector<8x128xf32>
    %37 = math.tanh %36 : vector<8x128xf32>
    %38 = vector.extract_strided_slice %23 {offsets = [0, 384], sizes = [8, 128], strides = [1, 1]} : vector<8x512xf32> to vector<8x128xf32>
    %39 = arith.negf %38 : vector<8x128xf32>
    %40 = math.exp %39 : vector<8x128xf32>
    %cst_30 = arith.constant 1.000000e+00 : f32
    %41 = vector.broadcast %cst_30 : f32 to vector<8x128xf32>
    %42 = arith.addf %41, %40 : vector<8x128xf32>
    %43 = arith.divf %41, %42 : vector<8x128xf32>
    %c0_31 = arith.constant 0 : index
    %c0_32 = arith.constant 0 : index
    %44 = vector.load %arg13[%c0_31, %c0_32] : memref<8x128xf32, #tpu.memory_space<vmem>>, vector<8x128xf32>
    %45 = arith.mulf %35, %44 : vector<8x128xf32>
    %46 = arith.mulf %29, %37 : vector<8x128xf32>
    %47 = arith.addf %45, %46 : vector<8x128xf32>
    %48 = math.tanh %47 : vector<8x128xf32>
    %49 = arith.mulf %43, %48 : vector<8x128xf32>
    %c0_33 = arith.constant 0 : index
    %c0_34 = arith.constant 0 : index
    %50 = vector.load %arg13[%c0_33, %c0_34] : memref<8x128xf32, #tpu.memory_space<vmem>>, vector<8x128xf32>
    tpu.vector_store %arg13[%c0_33, %c0_34], %47 {strides = array<i32>} : memref<8x128xf32, #tpu.memory_space<vmem>>, vector<8x128xf32>,
    %c0_35 = arith.constant 0 : index
    %c0_36 = arith.constant 0 : index
    %51 = vector.load %arg12[%c0_35, %c0_36] : memref<8x128xf32, #tpu.memory_space<vmem>>, vector<8x128xf32>
    tpu.vector_store %arg12[%c0_35, %c0_36], %49 {strides = array<i32>} : memref<8x128xf32, #tpu.memory_space<vmem>>, vector<8x128xf32>,
    %52 = arith.index_cast %c0_i32 : i32 to index
    %c0_37 = arith.constant 0 : index
    %c0_38 = arith.constant 0 : index
    %53 = vector.load %arg8[%52, %c0_37, %c0_38] : memref<8x8x128xf32, #tpu.memory_space<vmem>>, vector<1x8x128xf32>
    %54 = vector.shape_cast %53 : vector<1x8x128xf32> to vector<8x128xf32>
    %55 = vector.shape_cast %49 : vector<8x128xf32> to vector<1x8x128xf32>
    tpu.vector_store %arg8[%52, %c0_37, %c0_38], %55 {strides = array<i32>} : memref<8x8x128xf32, #tpu.memory_space<vmem>>, vector<1x8x128xf32>,
    %c1_i32 = arith.constant 1 : i32
    %56 = arith.index_cast %c1_i32 : i32 to index
    %c0_39 = arith.constant 0 : index
    %c0_40 = arith.constant 0 : index
    %57 = vector.load %arg11[%56, %c0_39, %c0_40] : memref<8x8x512xf32, #tpu.memory_space<vmem>>, vector<1x8x512xf32>
    %58 = vector.shape_cast %57 : vector<1x8x512xf32> to vector<8x512xf32>
    %c0_41 = arith.constant 0 : index
    %c0_42 = arith.constant 0 : index
    %59 = vector.load %arg12[%c0_41, %c0_42] : memref<8x128xf32, #tpu.memory_space<vmem>>, vector<8x128xf32>
    %cst_43 = arith.constant dense<0.000000e+00> : vector<8x512xf32>
    %60 = tpu.matmul %59, %11, %cst_43 {dimension_numbers = #tpu.dot_dimension_numbers<[1], [0], [0], [1], [0, 0, 1, 1], [], []>} : vector<8x128xf32>, vector<128x512xf32>, vector<8x512xf32> -> vector<8x512xf32>
    %61 = arith.addf %58, %60 : vector<8x512xf32>
    %62 = vector.extract_strided_slice %61 {offsets = [0, 0], sizes = [8, 128], strides = [1, 1]} : vector<8x512xf32> to vector<8x128xf32>
    %63 = arith.negf %62 : vector<8x128xf32>
    %64 = math.exp %63 : vector<8x128xf32>
    %cst_44 = arith.constant 1.000000e+00 : f32
    %65 = vector.broadcast %cst_44 : f32 to vector<8x128xf32>
    %66 = arith.addf %65, %64 : vector<8x128xf32>
    %67 = arith.divf %65, %66 : vector<8x128xf32>
    %68 = vector.extract_strided_slice %61 {offsets = [0, 128], sizes = [8, 128], strides = [1, 1]} : vector<8x512xf32> to vector<8x128xf32>
    %69 = arith.negf %68 : vector<8x128xf32>
    %70 = math.exp %69 : vector<8x128xf32>
    %cst_45 = arith.constant 1.000000e+00 : f32
    %71 = vector.broadcast %cst_45 : f32 to vector<8x128xf32>
    %72 = arith.addf %71, %70 : vector<8x128xf32>
    %73 = arith.divf %71, %72 : vector<8x128xf32>
    %74 = vector.extract_strided_slice %61 {offsets = [0, 256], sizes = [8, 128], strides = [1, 1]} : vector<8x512xf32> to vector<8x128xf32>
    %75 = math.tanh %74 : vector<8x128xf32>
    %76 = vector.extract_strided_slice %61 {offsets = [0, 384], sizes = [8, 128], strides = [1, 1]} : vector<8x512xf32> to vector<8x128xf32>
    %77 = arith.negf %76 : vector<8x128xf32>
    %78 = math.exp %77 : vector<8x128xf32>
    %cst_46 = arith.constant 1.000000e+00 : f32
    %79 = vector.broadcast %cst_46 : f32 to vector<8x128xf32>
    %80 = arith.addf %79, %78 : vector<8x128xf32>
    %81 = arith.divf %79, %80 : vector<8x128xf32>
    %c0_47 = arith.constant 0 : index
    %c0_48 = arith.constant 0 : index
    %82 = vector.load %arg13[%c0_47, %c0_48] : memref<8x128xf32, #tpu.memory_space<vmem>>, vector<8x128xf32>
    %83 = arith.mulf %73, %82 : vector<8x128xf32>
    %84 = arith.mulf %67, %75 : vector<8x128xf32>
    %85 = arith.addf %83, %84 : vector<8x128xf32>
    %86 = math.tanh %85 : vector<8x128xf32>
    %87 = arith.mulf %81, %86 : vector<8x128xf32>
    %c0_49 = arith.constant 0 : index
    %c0_50 = arith.constant 0 : index
    %88 = vector.load %arg13[%c0_49, %c0_50] : memref<8x128xf32, #tpu.memory_space<vmem>>, vector<8x128xf32>
    tpu.vector_store %arg13[%c0_49, %c0_50], %85 {strides = array<i32>} : memref<8x128xf32, #tpu.memory_space<vmem>>, vector<8x128xf32>,
    %c0_51 = arith.constant 0 : index
    %c0_52 = arith.constant 0 : index
    %89 = vector.load %arg12[%c0_51, %c0_52] : memref<8x128xf32, #tpu.memory_space<vmem>>, vector<8x128xf32>
    tpu.vector_store %arg12[%c0_51, %c0_52], %87 {strides = array<i32>} : memref<8x128xf32, #tpu.memory_space<vmem>>, vector<8x128xf32>,
    %90 = arith.index_cast %c1_i32 : i32 to index
    %c0_53 = arith.constant 0 : index
    %c0_54 = arith.constant 0 : index
    %91 = vector.load %arg8[%90, %c0_53, %c0_54] : memref<8x8x128xf32, #tpu.memory_space<vmem>>, vector<1x8x128xf32>
    %92 = vector.shape_cast %91 : vector<1x8x128xf32> to vector<8x128xf32>
    %93 = vector.shape_cast %87 : vector<8x128xf32> to vector<1x8x128xf32>
    tpu.vector_store %arg8[%90, %c0_53, %c0_54], %93 {strides = array<i32>} : memref<8x8x128xf32, #tpu.memory_space<vmem>>, vector<1x8x128xf32>,
    %c2_i32 = arith.constant 2 : i32
    %94 = arith.index_cast %c2_i32 : i32 to index
    %c0_55 = arith.constant 0 : index
    %c0_56 = arith.constant 0 : index
    %95 = vector.load %arg11[%94, %c0_55, %c0_56] : memref<8x8x512xf32, #tpu.memory_space<vmem>>, vector<1x8x512xf32>
    %96 = vector.shape_cast %95 : vector<1x8x512xf32> to vector<8x512xf32>
    %c0_57 = arith.constant 0 : index
    %c0_58 = arith.constant 0 : index
    %97 = vector.load %arg12[%c0_57, %c0_58] : memref<8x128xf32, #tpu.memory_space<vmem>>, vector<8x128xf32>
    %cst_59 = arith.constant dense<0.000000e+00> : vector<8x512xf32>
    %98 = tpu.matmul %97, %11, %cst_59 {dimension_numbers = #tpu.dot_dimension_numbers<[1], [0], [0], [1], [0, 0, 1, 1], [], []>} : vector<8x128xf32>, vector<128x512xf32>, vector<8x512xf32> -> vector<8x512xf32>
    %99 = arith.addf %96, %98 : vector<8x512xf32>
    %100 = vector.extract_strided_slice %99 {offsets = [0, 0], sizes = [8, 128], strides = [1, 1]} : vector<8x512xf32> to vector<8x128xf32>
    %101 = arith.negf %100 : vector<8x128xf32>
    %102 = math.exp %101 : vector<8x128xf32>
    %cst_60 = arith.constant 1.000000e+00 : f32
    %103 = vector.broadcast %cst_60 : f32 to vector<8x128xf32>
    %104 = arith.addf %103, %102 : vector<8x128xf32>
    %105 = arith.divf %103, %104 : vector<8x128xf32>
    %106 = vector.extract_strided_slice %99 {offsets = [0, 128], sizes = [8, 128], strides = [1, 1]} : vector<8x512xf32> to vector<8x128xf32>
    %107 = arith.negf %106 : vector<8x128xf32>
    %108 = math.exp %107 : vector<8x128xf32>
    %cst_61 = arith.constant 1.000000e+00 : f32
    %109 = vector.broadcast %cst_61 : f32 to vector<8x128xf32>
    %110 = arith.addf %109, %108 : vector<8x128xf32>
    %111 = arith.divf %109, %110 : vector<8x128xf32>
    %112 = vector.extract_strided_slice %99 {offsets = [0, 256], sizes = [8, 128], strides = [1, 1]} : vector<8x512xf32> to vector<8x128xf32>
    %113 = math.tanh %112 : vector<8x128xf32>
    %114 = vector.extract_strided_slice %99 {offsets = [0, 384], sizes = [8, 128], strides = [1, 1]} : vector<8x512xf32> to vector<8x128xf32>
    %115 = arith.negf %114 : vector<8x128xf32>
    %116 = math.exp %115 : vector<8x128xf32>
    %cst_62 = arith.constant 1.000000e+00 : f32
    %117 = vector.broadcast %cst_62 : f32 to vector<8x128xf32>
    %118 = arith.addf %117, %116 : vector<8x128xf32>
    %119 = arith.divf %117, %118 : vector<8x128xf32>
    %c0_63 = arith.constant 0 : index
    %c0_64 = arith.constant 0 : index
    %120 = vector.load %arg13[%c0_63, %c0_64] : memref<8x128xf32, #tpu.memory_space<vmem>>, vector<8x128xf32>
    %121 = arith.mulf %111, %120 : vector<8x128xf32>
    %122 = arith.mulf %105, %113 : vector<8x128xf32>
    %123 = arith.addf %121, %122 : vector<8x128xf32>
    %124 = math.tanh %123 : vector<8x128xf32>
    %125 = arith.mulf %119, %124 : vector<8x128xf32>
    %c0_65 = arith.constant 0 : index
    %c0_66 = arith.constant 0 : index
    %126 = vector.load %arg13[%c0_65, %c0_66] : memref<8x128xf32, #tpu.memory_space<vmem>>, vector<8x128xf32>
    tpu.vector_store %arg13[%c0_65, %c0_66], %123 {strides = array<i32>} : memref<8x128xf32, #tpu.memory_space<vmem>>, vector<8x128xf32>,
    %c0_67 = arith.constant 0 : index
    %c0_68 = arith.constant 0 : index
    %127 = vector.load %arg12[%c0_67, %c0_68] : memref<8x128xf32, #tpu.memory_space<vmem>>, vector<8x128xf32>
    tpu.vector_store %arg12[%c0_67, %c0_68], %125 {strides = array<i32>} : memref<8x128xf32, #tpu.memory_space<vmem>>, vector<8x128xf32>,
    %128 = arith.index_cast %c2_i32 : i32 to index
    %c0_69 = arith.constant 0 : index
    %c0_70 = arith.constant 0 : index
    %129 = vector.load %arg8[%128, %c0_69, %c0_70] : memref<8x8x128xf32, #tpu.memory_space<vmem>>, vector<1x8x128xf32>
    %130 = vector.shape_cast %129 : vector<1x8x128xf32> to vector<8x128xf32>
    %131 = vector.shape_cast %125 : vector<8x128xf32> to vector<1x8x128xf32>
    tpu.vector_store %arg8[%128, %c0_69, %c0_70], %131 {strides = array<i32>} : memref<8x8x128xf32, #tpu.memory_space<vmem>>, vector<1x8x128xf32>,
    %c3_i32 = arith.constant 3 : i32
    %132 = arith.index_cast %c3_i32 : i32 to index
    %c0_71 = arith.constant 0 : index
    %c0_72 = arith.constant 0 : index
    %133 = vector.load %arg11[%132, %c0_71, %c0_72] : memref<8x8x512xf32, #tpu.memory_space<vmem>>, vector<1x8x512xf32>
    %134 = vector.shape_cast %133 : vector<1x8x512xf32> to vector<8x512xf32>
    %c0_73 = arith.constant 0 : index
    %c0_74 = arith.constant 0 : index
    %135 = vector.load %arg12[%c0_73, %c0_74] : memref<8x128xf32, #tpu.memory_space<vmem>>, vector<8x128xf32>
    %cst_75 = arith.constant dense<0.000000e+00> : vector<8x512xf32>
    %136 = tpu.matmul %135, %11, %cst_75 {dimension_numbers = #tpu.dot_dimension_numbers<[1], [0], [0], [1], [0, 0, 1, 1], [], []>} : vector<8x128xf32>, vector<128x512xf32>, vector<8x512xf32> -> vector<8x512xf32>
    %137 = arith.addf %134, %136 : vector<8x512xf32>
    %138 = vector.extract_strided_slice %137 {offsets = [0, 0], sizes = [8, 128], strides = [1, 1]} : vector<8x512xf32> to vector<8x128xf32>
    %139 = arith.negf %138 : vector<8x128xf32>
    %140 = math.exp %139 : vector<8x128xf32>
    %cst_76 = arith.constant 1.000000e+00 : f32
    %141 = vector.broadcast %cst_76 : f32 to vector<8x128xf32>
    %142 = arith.addf %141, %140 : vector<8x128xf32>
    %143 = arith.divf %141, %142 : vector<8x128xf32>
    %144 = vector.extract_strided_slice %137 {offsets = [0, 128], sizes = [8, 128], strides = [1, 1]} : vector<8x512xf32> to vector<8x128xf32>
    %145 = arith.negf %144 : vector<8x128xf32>
    %146 = math.exp %145 : vector<8x128xf32>
    %cst_77 = arith.constant 1.000000e+00 : f32
    %147 = vector.broadcast %cst_77 : f32 to vector<8x128xf32>
    %148 = arith.addf %147, %146 : vector<8x128xf32>
    %149 = arith.divf %147, %148 : vector<8x128xf32>
    %150 = vector.extract_strided_slice %137 {offsets = [0, 256], sizes = [8, 128], strides = [1, 1]} : vector<8x512xf32> to vector<8x128xf32>
    %151 = math.tanh %150 : vector<8x128xf32>
    %152 = vector.extract_strided_slice %137 {offsets = [0, 384], sizes = [8, 128], strides = [1, 1]} : vector<8x512xf32> to vector<8x128xf32>
    %153 = arith.negf %152 : vector<8x128xf32>
    %154 = math.exp %153 : vector<8x128xf32>
    %cst_78 = arith.constant 1.000000e+00 : f32
    %155 = vector.broadcast %cst_78 : f32 to vector<8x128xf32>
    %156 = arith.addf %155, %154 : vector<8x128xf32>
    %157 = arith.divf %155, %156 : vector<8x128xf32>
    %c0_79 = arith.constant 0 : index
    %c0_80 = arith.constant 0 : index
    %158 = vector.load %arg13[%c0_79, %c0_80] : memref<8x128xf32, #tpu.memory_space<vmem>>, vector<8x128xf32>
    %159 = arith.mulf %149, %158 : vector<8x128xf32>
    %160 = arith.mulf %143, %151 : vector<8x128xf32>
    %161 = arith.addf %159, %160 : vector<8x128xf32>
    %162 = math.tanh %161 : vector<8x128xf32>
    %163 = arith.mulf %157, %162 : vector<8x128xf32>
    %c0_81 = arith.constant 0 : index
    %c0_82 = arith.constant 0 : index
    %164 = vector.load %arg13[%c0_81, %c0_82] : memref<8x128xf32, #tpu.memory_space<vmem>>, vector<8x128xf32>
    tpu.vector_store %arg13[%c0_81, %c0_82], %161 {strides = array<i32>} : memref<8x128xf32, #tpu.memory_space<vmem>>, vector<8x128xf32>,
    %c0_83 = arith.constant 0 : index
    %c0_84 = arith.constant 0 : index
    %165 = vector.load %arg12[%c0_83, %c0_84] : memref<8x128xf32, #tpu.memory_space<vmem>>, vector<8x128xf32>
    tpu.vector_store %arg12[%c0_83, %c0_84], %163 {strides = array<i32>} : memref<8x128xf32, #tpu.memory_space<vmem>>, vector<8x128xf32>,
    %166 = arith.index_cast %c3_i32 : i32 to index
    %c0_85 = arith.constant 0 : index
    %c0_86 = arith.constant 0 : index
    %167 = vector.load %arg8[%166, %c0_85, %c0_86] : memref<8x8x128xf32, #tpu.memory_space<vmem>>, vector<1x8x128xf32>
    %168 = vector.shape_cast %167 : vector<1x8x128xf32> to vector<8x128xf32>
    %169 = vector.shape_cast %163 : vector<8x128xf32> to vector<1x8x128xf32>
    tpu.vector_store %arg8[%166, %c0_85, %c0_86], %169 {strides = array<i32>} : memref<8x8x128xf32, #tpu.memory_space<vmem>>, vector<1x8x128xf32>,
    %c4_i32 = arith.constant 4 : i32
    %170 = arith.index_cast %c4_i32 : i32 to index
    %c0_87 = arith.constant 0 : index
    %c0_88 = arith.constant 0 : index
    %171 = vector.load %arg11[%170, %c0_87, %c0_88] : memref<8x8x512xf32, #tpu.memory_space<vmem>>, vector<1x8x512xf32>
    %172 = vector.shape_cast %171 : vector<1x8x512xf32> to vector<8x512xf32>
    %c0_89 = arith.constant 0 : index
    %c0_90 = arith.constant 0 : index
    %173 = vector.load %arg12[%c0_89, %c0_90] : memref<8x128xf32, #tpu.memory_space<vmem>>, vector<8x128xf32>
    %cst_91 = arith.constant dense<0.000000e+00> : vector<8x512xf32>
    %174 = tpu.matmul %173, %11, %cst_91 {dimension_numbers = #tpu.dot_dimension_numbers<[1], [0], [0], [1], [0, 0, 1, 1], [], []>} : vector<8x128xf32>, vector<128x512xf32>, vector<8x512xf32> -> vector<8x512xf32>
    %175 = arith.addf %172, %174 : vector<8x512xf32>
    %176 = vector.extract_strided_slice %175 {offsets = [0, 0], sizes = [8, 128], strides = [1, 1]} : vector<8x512xf32> to vector<8x128xf32>
    %177 = arith.negf %176 : vector<8x128xf32>
    %178 = math.exp %177 : vector<8x128xf32>
    %cst_92 = arith.constant 1.000000e+00 : f32
    %179 = vector.broadcast %cst_92 : f32 to vector<8x128xf32>
    %180 = arith.addf %179, %178 : vector<8x128xf32>
    %181 = arith.divf %179, %180 : vector<8x128xf32>
    %182 = vector.extract_strided_slice %175 {offsets = [0, 128], sizes = [8, 128], strides = [1, 1]} : vector<8x512xf32> to vector<8x128xf32>
    %183 = arith.negf %182 : vector<8x128xf32>
    %184 = math.exp %183 : vector<8x128xf32>
    %cst_93 = arith.constant 1.000000e+00 : f32
    %185 = vector.broadcast %cst_93 : f32 to vector<8x128xf32>
    %186 = arith.addf %185, %184 : vector<8x128xf32>
    %187 = arith.divf %185, %186 : vector<8x128xf32>
    %188 = vector.extract_strided_slice %175 {offsets = [0, 256], sizes = [8, 128], strides = [1, 1]} : vector<8x512xf32> to vector<8x128xf32>
    %189 = math.tanh %188 : vector<8x128xf32>
    %190 = vector.extract_strided_slice %175 {offsets = [0, 384], sizes = [8, 128], strides = [1, 1]} : vector<8x512xf32> to vector<8x128xf32>
    %191 = arith.negf %190 : vector<8x128xf32>
    %192 = math.exp %191 : vector<8x128xf32>
    %cst_94 = arith.constant 1.000000e+00 : f32
    %193 = vector.broadcast %cst_94 : f32 to vector<8x128xf32>
    %194 = arith.addf %193, %192 : vector<8x128xf32>
    %195 = arith.divf %193, %194 : vector<8x128xf32>
    %c0_95 = arith.constant 0 : index
    %c0_96 = arith.constant 0 : index
    %196 = vector.load %arg13[%c0_95, %c0_96] : memref<8x128xf32, #tpu.memory_space<vmem>>, vector<8x128xf32>
    %197 = arith.mulf %187, %196 : vector<8x128xf32>
    %198 = arith.mulf %181, %189 : vector<8x128xf32>
    %199 = arith.addf %197, %198 : vector<8x128xf32>
    %200 = math.tanh %199 : vector<8x128xf32>
    %201 = arith.mulf %195, %200 : vector<8x128xf32>
    %c0_97 = arith.constant 0 : index
    %c0_98 = arith.constant 0 : index
    %202 = vector.load %arg13[%c0_97, %c0_98] : memref<8x128xf32, #tpu.memory_space<vmem>>, vector<8x128xf32>
    tpu.vector_store %arg13[%c0_97, %c0_98], %199 {strides = array<i32>} : memref<8x128xf32, #tpu.memory_space<vmem>>, vector<8x128xf32>,
    %c0_99 = arith.constant 0 : index
    %c0_100 = arith.constant 0 : index
    %203 = vector.load %arg12[%c0_99, %c0_100] : memref<8x128xf32, #tpu.memory_space<vmem>>, vector<8x128xf32>
    tpu.vector_store %arg12[%c0_99, %c0_100], %201 {strides = array<i32>} : memref<8x128xf32, #tpu.memory_space<vmem>>, vector<8x128xf32>,
    %204 = arith.index_cast %c4_i32 : i32 to index
    %c0_101 = arith.constant 0 : index
    %c0_102 = arith.constant 0 : index
    %205 = vector.load %arg8[%204, %c0_101, %c0_102] : memref<8x8x128xf32, #tpu.memory_space<vmem>>, vector<1x8x128xf32>
    %206 = vector.shape_cast %205 : vector<1x8x128xf32> to vector<8x128xf32>
    %207 = vector.shape_cast %201 : vector<8x128xf32> to vector<1x8x128xf32>
    tpu.vector_store %arg8[%204, %c0_101, %c0_102], %207 {strides = array<i32>} : memref<8x8x128xf32, #tpu.memory_space<vmem>>, vector<1x8x128xf32>,
    %c5_i32 = arith.constant 5 : i32
    %208 = arith.index_cast %c5_i32 : i32 to index
    %c0_103 = arith.constant 0 : index
    %c0_104 = arith.constant 0 : index
    %209 = vector.load %arg11[%208, %c0_103, %c0_104] : memref<8x8x512xf32, #tpu.memory_space<vmem>>, vector<1x8x512xf32>
    %210 = vector.shape_cast %209 : vector<1x8x512xf32> to vector<8x512xf32>
    %c0_105 = arith.constant 0 : index
    %c0_106 = arith.constant 0 : index
    %211 = vector.load %arg12[%c0_105, %c0_106] : memref<8x128xf32, #tpu.memory_space<vmem>>, vector<8x128xf32>
    %cst_107 = arith.constant dense<0.000000e+00> : vector<8x512xf32>
    %212 = tpu.matmul %211, %11, %cst_107 {dimension_numbers = #tpu.dot_dimension_numbers<[1], [0], [0], [1], [0, 0, 1, 1], [], []>} : vector<8x128xf32>, vector<128x512xf32>, vector<8x512xf32> -> vector<8x512xf32>
    %213 = arith.addf %210, %212 : vector<8x512xf32>
    %214 = vector.extract_strided_slice %213 {offsets = [0, 0], sizes = [8, 128], strides = [1, 1]} : vector<8x512xf32> to vector<8x128xf32>
    %215 = arith.negf %214 : vector<8x128xf32>
    %216 = math.exp %215 : vector<8x128xf32>
    %cst_108 = arith.constant 1.000000e+00 : f32
    %217 = vector.broadcast %cst_108 : f32 to vector<8x128xf32>
    %218 = arith.addf %217, %216 : vector<8x128xf32>
    %219 = arith.divf %217, %218 : vector<8x128xf32>
    %220 = vector.extract_strided_slice %213 {offsets = [0, 128], sizes = [8, 128], strides = [1, 1]} : vector<8x512xf32> to vector<8x128xf32>
    %221 = arith.negf %220 : vector<8x128xf32>
    %222 = math.exp %221 : vector<8x128xf32>
    %cst_109 = arith.constant 1.000000e+00 : f32
    %223 = vector.broadcast %cst_109 : f32 to vector<8x128xf32>
    %224 = arith.addf %223, %222 : vector<8x128xf32>
    %225 = arith.divf %223, %224 : vector<8x128xf32>
    %226 = vector.extract_strided_slice %213 {offsets = [0, 256], sizes = [8, 128], strides = [1, 1]} : vector<8x512xf32> to vector<8x128xf32>
    %227 = math.tanh %226 : vector<8x128xf32>
    %228 = vector.extract_strided_slice %213 {offsets = [0, 384], sizes = [8, 128], strides = [1, 1]} : vector<8x512xf32> to vector<8x128xf32>
    %229 = arith.negf %228 : vector<8x128xf32>
    %230 = math.exp %229 : vector<8x128xf32>
    %cst_110 = arith.constant 1.000000e+00 : f32
    %231 = vector.broadcast %cst_110 : f32 to vector<8x128xf32>
    %232 = arith.addf %231, %230 : vector<8x128xf32>
    %233 = arith.divf %231, %232 : vector<8x128xf32>
    %c0_111 = arith.constant 0 : index
    %c0_112 = arith.constant 0 : index
    %234 = vector.load %arg13[%c0_111, %c0_112] : memref<8x128xf32, #tpu.memory_space<vmem>>, vector<8x128xf32>
    %235 = arith.mulf %225, %234 : vector<8x128xf32>
    %236 = arith.mulf %219, %227 : vector<8x128xf32>
    %237 = arith.addf %235, %236 : vector<8x128xf32>
    %238 = math.tanh %237 : vector<8x128xf32>
    %239 = arith.mulf %233, %238 : vector<8x128xf32>
    %c0_113 = arith.constant 0 : index
    %c0_114 = arith.constant 0 : index
    %240 = vector.load %arg13[%c0_113, %c0_114] : memref<8x128xf32, #tpu.memory_space<vmem>>, vector<8x128xf32>
    tpu.vector_store %arg13[%c0_113, %c0_114], %237 {strides = array<i32>} : memref<8x128xf32, #tpu.memory_space<vmem>>, vector<8x128xf32>,
    %c0_115 = arith.constant 0 : index
    %c0_116 = arith.constant 0 : index
    %241 = vector.load %arg12[%c0_115, %c0_116] : memref<8x128xf32, #tpu.memory_space<vmem>>, vector<8x128xf32>
    tpu.vector_store %arg12[%c0_115, %c0_116], %239 {strides = array<i32>} : memref<8x128xf32, #tpu.memory_space<vmem>>, vector<8x128xf32>,
    %242 = arith.index_cast %c5_i32 : i32 to index
    %c0_117 = arith.constant 0 : index
    %c0_118 = arith.constant 0 : index
    %243 = vector.load %arg8[%242, %c0_117, %c0_118] : memref<8x8x128xf32, #tpu.memory_space<vmem>>, vector<1x8x128xf32>
    %244 = vector.shape_cast %243 : vector<1x8x128xf32> to vector<8x128xf32>
    %245 = vector.shape_cast %239 : vector<8x128xf32> to vector<1x8x128xf32>
    tpu.vector_store %arg8[%242, %c0_117, %c0_118], %245 {strides = array<i32>} : memref<8x8x128xf32, #tpu.memory_space<vmem>>, vector<1x8x128xf32>,
    %c6_i32 = arith.constant 6 : i32
    %246 = arith.index_cast %c6_i32 : i32 to index
    %c0_119 = arith.constant 0 : index
    %c0_120 = arith.constant 0 : index
    %247 = vector.load %arg11[%246, %c0_119, %c0_120] : memref<8x8x512xf32, #tpu.memory_space<vmem>>, vector<1x8x512xf32>
    %248 = vector.shape_cast %247 : vector<1x8x512xf32> to vector<8x512xf32>
    %c0_121 = arith.constant 0 : index
    %c0_122 = arith.constant 0 : index
    %249 = vector.load %arg12[%c0_121, %c0_122] : memref<8x128xf32, #tpu.memory_space<vmem>>, vector<8x128xf32>
    %cst_123 = arith.constant dense<0.000000e+00> : vector<8x512xf32>
    %250 = tpu.matmul %249, %11, %cst_123 {dimension_numbers = #tpu.dot_dimension_numbers<[1], [0], [0], [1], [0, 0, 1, 1], [], []>} : vector<8x128xf32>, vector<128x512xf32>, vector<8x512xf32> -> vector<8x512xf32>
    %251 = arith.addf %248, %250 : vector<8x512xf32>
    %252 = vector.extract_strided_slice %251 {offsets = [0, 0], sizes = [8, 128], strides = [1, 1]} : vector<8x512xf32> to vector<8x128xf32>
    %253 = arith.negf %252 : vector<8x128xf32>
    %254 = math.exp %253 : vector<8x128xf32>
    %cst_124 = arith.constant 1.000000e+00 : f32
    %255 = vector.broadcast %cst_124 : f32 to vector<8x128xf32>
    %256 = arith.addf %255, %254 : vector<8x128xf32>
    %257 = arith.divf %255, %256 : vector<8x128xf32>
    %258 = vector.extract_strided_slice %251 {offsets = [0, 128], sizes = [8, 128], strides = [1, 1]} : vector<8x512xf32> to vector<8x128xf32>
    %259 = arith.negf %258 : vector<8x128xf32>
    %260 = math.exp %259 : vector<8x128xf32>
    %cst_125 = arith.constant 1.000000e+00 : f32
    %261 = vector.broadcast %cst_125 : f32 to vector<8x128xf32>
    %262 = arith.addf %261, %260 : vector<8x128xf32>
    %263 = arith.divf %261, %262 : vector<8x128xf32>
    %264 = vector.extract_strided_slice %251 {offsets = [0, 256], sizes = [8, 128], strides = [1, 1]} : vector<8x512xf32> to vector<8x128xf32>
    %265 = math.tanh %264 : vector<8x128xf32>
    %266 = vector.extract_strided_slice %251 {offsets = [0, 384], sizes = [8, 128], strides = [1, 1]} : vector<8x512xf32> to vector<8x128xf32>
    %267 = arith.negf %266 : vector<8x128xf32>
    %268 = math.exp %267 : vector<8x128xf32>
    %cst_126 = arith.constant 1.000000e+00 : f32
    %269 = vector.broadcast %cst_126 : f32 to vector<8x128xf32>
    %270 = arith.addf %269, %268 : vector<8x128xf32>
    %271 = arith.divf %269, %270 : vector<8x128xf32>
    %c0_127 = arith.constant 0 : index
    %c0_128 = arith.constant 0 : index
    %272 = vector.load %arg13[%c0_127, %c0_128] : memref<8x128xf32, #tpu.memory_space<vmem>>, vector<8x128xf32>
    %273 = arith.mulf %263, %272 : vector<8x128xf32>
    %274 = arith.mulf %257, %265 : vector<8x128xf32>
    %275 = arith.addf %273, %274 : vector<8x128xf32>
    %276 = math.tanh %275 : vector<8x128xf32>
    %277 = arith.mulf %271, %276 : vector<8x128xf32>
    %c0_129 = arith.constant 0 : index
    %c0_130 = arith.constant 0 : index
    %278 = vector.load %arg13[%c0_129, %c0_130] : memref<8x128xf32, #tpu.memory_space<vmem>>, vector<8x128xf32>
    tpu.vector_store %arg13[%c0_129, %c0_130], %275 {strides = array<i32>} : memref<8x128xf32, #tpu.memory_space<vmem>>, vector<8x128xf32>,
    %c0_131 = arith.constant 0 : index
    %c0_132 = arith.constant 0 : index
    %279 = vector.load %arg12[%c0_131, %c0_132] : memref<8x128xf32, #tpu.memory_space<vmem>>, vector<8x128xf32>
    tpu.vector_store %arg12[%c0_131, %c0_132], %277 {strides = array<i32>} : memref<8x128xf32, #tpu.memory_space<vmem>>, vector<8x128xf32>,
    %280 = arith.index_cast %c6_i32 : i32 to index
    %c0_133 = arith.constant 0 : index
    %c0_134 = arith.constant 0 : index
    %281 = vector.load %arg8[%280, %c0_133, %c0_134] : memref<8x8x128xf32, #tpu.memory_space<vmem>>, vector<1x8x128xf32>
    %282 = vector.shape_cast %281 : vector<1x8x128xf32> to vector<8x128xf32>
    %283 = vector.shape_cast %277 : vector<8x128xf32> to vector<1x8x128xf32>
    tpu.vector_store %arg8[%280, %c0_133, %c0_134], %283 {strides = array<i32>} : memref<8x8x128xf32, #tpu.memory_space<vmem>>, vector<1x8x128xf32>,
    %c7_i32 = arith.constant 7 : i32
    %284 = arith.index_cast %c7_i32 : i32 to index
    %c0_135 = arith.constant 0 : index
    %c0_136 = arith.constant 0 : index
    %285 = vector.load %arg11[%284, %c0_135, %c0_136] : memref<8x8x512xf32, #tpu.memory_space<vmem>>, vector<1x8x512xf32>
    %286 = vector.shape_cast %285 : vector<1x8x512xf32> to vector<8x512xf32>
    %c0_137 = arith.constant 0 : index
    %c0_138 = arith.constant 0 : index
    %287 = vector.load %arg12[%c0_137, %c0_138] : memref<8x128xf32, #tpu.memory_space<vmem>>, vector<8x128xf32>
    %cst_139 = arith.constant dense<0.000000e+00> : vector<8x512xf32>
    %288 = tpu.matmul %287, %11, %cst_139 {dimension_numbers = #tpu.dot_dimension_numbers<[1], [0], [0], [1], [0, 0, 1, 1], [], []>} : vector<8x128xf32>, vector<128x512xf32>, vector<8x512xf32> -> vector<8x512xf32>
    %289 = arith.addf %286, %288 : vector<8x512xf32>
    %290 = vector.extract_strided_slice %289 {offsets = [0, 0], sizes = [8, 128], strides = [1, 1]} : vector<8x512xf32> to vector<8x128xf32>
    %291 = arith.negf %290 : vector<8x128xf32>
    %292 = math.exp %291 : vector<8x128xf32>
    %cst_140 = arith.constant 1.000000e+00 : f32
    %293 = vector.broadcast %cst_140 : f32 to vector<8x128xf32>
    %294 = arith.addf %293, %292 : vector<8x128xf32>
    %295 = arith.divf %293, %294 : vector<8x128xf32>
    %296 = vector.extract_strided_slice %289 {offsets = [0, 128], sizes = [8, 128], strides = [1, 1]} : vector<8x512xf32> to vector<8x128xf32>
    %297 = arith.negf %296 : vector<8x128xf32>
    %298 = math.exp %297 : vector<8x128xf32>
    %cst_141 = arith.constant 1.000000e+00 : f32
    %299 = vector.broadcast %cst_141 : f32 to vector<8x128xf32>
    %300 = arith.addf %299, %298 : vector<8x128xf32>
    %301 = arith.divf %299, %300 : vector<8x128xf32>
    %302 = vector.extract_strided_slice %289 {offsets = [0, 256], sizes = [8, 128], strides = [1, 1]} : vector<8x512xf32> to vector<8x128xf32>
    %303 = math.tanh %302 : vector<8x128xf32>
    %304 = vector.extract_strided_slice %289 {offsets = [0, 384], sizes = [8, 128], strides = [1, 1]} : vector<8x512xf32> to vector<8x128xf32>
    %305 = arith.negf %304 : vector<8x128xf32>
    %306 = math.exp %305 : vector<8x128xf32>
    %cst_142 = arith.constant 1.000000e+00 : f32
    %307 = vector.broadcast %cst_142 : f32 to vector<8x128xf32>
    %308 = arith.addf %307, %306 : vector<8x128xf32>
    %309 = arith.divf %307, %308 : vector<8x128xf32>
    %c0_143 = arith.constant 0 : index
    %c0_144 = arith.constant 0 : index
    %310 = vector.load %arg13[%c0_143, %c0_144] : memref<8x128xf32, #tpu.memory_space<vmem>>, vector<8x128xf32>
    %311 = arith.mulf %301, %310 : vector<8x128xf32>
    %312 = arith.mulf %295, %303 : vector<8x128xf32>
    %313 = arith.addf %311, %312 : vector<8x128xf32>
    %314 = math.tanh %313 : vector<8x128xf32>
    %315 = arith.mulf %309, %314 : vector<8x128xf32>
    %c0_145 = arith.constant 0 : index
    %c0_146 = arith.constant 0 : index
    %316 = vector.load %arg13[%c0_145, %c0_146] : memref<8x128xf32, #tpu.memory_space<vmem>>, vector<8x128xf32>
    tpu.vector_store %arg13[%c0_145, %c0_146], %313 {strides = array<i32>} : memref<8x128xf32, #tpu.memory_space<vmem>>, vector<8x128xf32>,
    %c0_147 = arith.constant 0 : index
    %c0_148 = arith.constant 0 : index
    %317 = vector.load %arg12[%c0_147, %c0_148] : memref<8x128xf32, #tpu.memory_space<vmem>>, vector<8x128xf32>
    tpu.vector_store %arg12[%c0_147, %c0_148], %315 {strides = array<i32>} : memref<8x128xf32, #tpu.memory_space<vmem>>, vector<8x128xf32>,
    %318 = arith.index_cast %c7_i32 : i32 to index
    %c0_149 = arith.constant 0 : index
    %c0_150 = arith.constant 0 : index
    %319 = vector.load %arg8[%318, %c0_149, %c0_150] : memref<8x8x128xf32, #tpu.memory_space<vmem>>, vector<1x8x128xf32>
    %320 = vector.shape_cast %319 : vector<1x8x128xf32> to vector<8x128xf32>
    %321 = vector.shape_cast %315 : vector<8x128xf32> to vector<1x8x128xf32>
    tpu.vector_store %arg8[%318, %c0_149, %c0_150], %321 {strides = array<i32>} : memref<8x8x128xf32, #tpu.memory_space<vmem>>, vector<1x8x128xf32>,
    %c8_i32 = arith.constant 8 : i32
    %c0_151 = arith.constant 0 : index
    %c0_152 = arith.constant 0 : index
    %322 = vector.load %arg12[%c0_151, %c0_152] : memref<8x128xf32, #tpu.memory_space<vmem>>, vector<8x128xf32>
    %c0_153 = arith.constant 0 : index
    %c0_154 = arith.constant 0 : index
    %c0_155 = arith.constant 0 : index
    %323 = vector.load %arg9[%c0_153, %c0_154, %c0_155] : memref<2x8x128xf32, #tpu.memory_space<vmem>>, vector<1x8x128xf32>
    %324 = vector.shape_cast %323 : vector<1x8x128xf32> to vector<8x128xf32>
    %325 = vector.shape_cast %322 : vector<8x128xf32> to vector<1x8x128xf32>
    tpu.vector_store %arg9[%c0_153, %c0_154, %c0_155], %325 {strides = array<i32>} : memref<2x8x128xf32, #tpu.memory_space<vmem>>, vector<1x8x128xf32>,
    %c0_156 = arith.constant 0 : index
    %c0_157 = arith.constant 0 : index
    %326 = vector.load %arg13[%c0_156, %c0_157] : memref<8x128xf32, #tpu.memory_space<vmem>>, vector<8x128xf32>
    %c0_158 = arith.constant 0 : index
    %c0_159 = arith.constant 0 : index
    %c0_160 = arith.constant 0 : index
    %327 = vector.load %arg10[%c0_158, %c0_159, %c0_160] : memref<2x8x128xf32, #tpu.memory_space<vmem>>, vector<1x8x128xf32>
    %328 = vector.shape_cast %327 : vector<1x8x128xf32> to vector<8x128xf32>
    %329 = vector.shape_cast %326 : vector<8x128xf32> to vector<1x8x128xf32>
    tpu.vector_store %arg10[%c0_158, %c0_159, %c0_160], %329 {strides = array<i32>} : memref<2x8x128xf32, #tpu.memory_space<vmem>>, vector<1x8x128xf32>,
    %c0_161 = arith.constant 0 : index
    %c0_162 = arith.constant 0 : index
    %c0_163 = arith.constant 0 : index
    %330 = vector.load %arg8[%c0_161, %c0_162, %c0_163] : memref<8x8x128xf32, #tpu.memory_space<vmem>>, vector<8x8x128xf32>
    %331 = vector.shape_cast %330 : vector<8x8x128xf32> to vector<64x128xf32>
    %c0_164 = arith.constant 0 : index
    %c0_165 = arith.constant 0 : index
    %c0_166 = arith.constant 0 : index
    %332 = vector.load %arg5[%c0_164, %c0_165, %c0_166] : memref<1x128x512xf32, #tpu.memory_space<vmem>>, vector<1x128x512xf32>
    %333 = vector.shape_cast %332 : vector<1x128x512xf32> to vector<128x512xf32>
    %cst_167 = arith.constant dense<0.000000e+00> : vector<64x512xf32>
    %334 = tpu.matmul %331, %333, %cst_167 {dimension_numbers = #tpu.dot_dimension_numbers<[1], [0], [0], [1], [0, 0, 1, 1], [], []>} : vector<64x128xf32>, vector<128x512xf32>, vector<64x512xf32> -> vector<64x512xf32>
    %c1 = arith.constant 1 : index
    %c0_168 = arith.constant 0 : index
    %c0_169 = arith.constant 0 : index
    %335 = vector.load %arg7[%c1, %c0_168, %c0_169] : memref<2x1x512xf32, #tpu.memory_space<vmem>>, vector<1x1x512xf32>
    %336 = vector.shape_cast %335 : vector<1x1x512xf32> to vector<1x512xf32>
    %337 = vector.broadcast %336 : vector<1x512xf32> to vector<64x512xf32>
    %338 = arith.addf %334, %337 : vector<64x512xf32>
    %339 = vector.shape_cast %338 : vector<64x512xf32> to vector<8x8x512xf32>
    %c0_170 = arith.constant 0 : index
    %c0_171 = arith.constant 0 : index
    %c0_172 = arith.constant 0 : index
    %340 = vector.load %arg11[%c0_170, %c0_171, %c0_172] : memref<8x8x512xf32, #tpu.memory_space<vmem>>, vector<8x8x512xf32>
    tpu.vector_store %arg11[%c0_170, %c0_171, %c0_172], %339 {strides = array<i32>} : memref<8x8x512xf32, #tpu.memory_space<vmem>>, vector<8x8x512xf32>,
    %c1_173 = arith.constant 1 : index
    %c0_174 = arith.constant 0 : index
    %c0_175 = arith.constant 0 : index
    %341 = vector.load %arg6[%c1_173, %c0_174, %c0_175] : memref<2x128x512xf32, #tpu.memory_space<vmem>>, vector<1x128x512xf32>
    %342 = vector.shape_cast %341 : vector<1x128x512xf32> to vector<128x512xf32>
    %c1_176 = arith.constant 1 : index
    %c0_177 = arith.constant 0 : index
    %c0_178 = arith.constant 0 : index
    %343 = vector.load %arg2[%c1_176, %c0_177, %c0_178] : memref<2x8x128xf32, #tpu.memory_space<vmem>>, vector<1x8x128xf32>
    %344 = vector.shape_cast %343 : vector<1x8x128xf32> to vector<8x128xf32>
    %c0_179 = arith.constant 0 : index
    %c0_180 = arith.constant 0 : index
    %345 = vector.load %arg12[%c0_179, %c0_180] : memref<8x128xf32, #tpu.memory_space<vmem>>, vector<8x128xf32>
    tpu.vector_store %arg12[%c0_179, %c0_180], %344 {strides = array<i32>} : memref<8x128xf32, #tpu.memory_space<vmem>>, vector<8x128xf32>,
    %c1_181 = arith.constant 1 : index
    %c0_182 = arith.constant 0 : index
    %c0_183 = arith.constant 0 : index
    %346 = vector.load %arg3[%c1_181, %c0_182, %c0_183] : memref<2x8x128xf32, #tpu.memory_space<vmem>>, vector<1x8x128xf32>
    %347 = vector.shape_cast %346 : vector<1x8x128xf32> to vector<8x128xf32>
    %c0_184 = arith.constant 0 : index
    %c0_185 = arith.constant 0 : index
    %348 = vector.load %arg13[%c0_184, %c0_185] : memref<8x128xf32, #tpu.memory_space<vmem>>, vector<8x128xf32>
    tpu.vector_store %arg13[%c0_184, %c0_185], %347 {strides = array<i32>} : memref<8x128xf32, #tpu.memory_space<vmem>>, vector<8x128xf32>,
    %c0_i32_186 = arith.constant 0 : i32
    %349 = arith.index_cast %c0_i32_186 : i32 to index
    %c0_187 = arith.constant 0 : index
    %c0_188 = arith.constant 0 : index
    %350 = vector.load %arg11[%349, %c0_187, %c0_188] : memref<8x8x512xf32, #tpu.memory_space<vmem>>, vector<1x8x512xf32>
    %351 = vector.shape_cast %350 : vector<1x8x512xf32> to vector<8x512xf32>
    %c0_189 = arith.constant 0 : index
    %c0_190 = arith.constant 0 : index
    %352 = vector.load %arg12[%c0_189, %c0_190] : memref<8x128xf32, #tpu.memory_space<vmem>>, vector<8x128xf32>
    %cst_191 = arith.constant dense<0.000000e+00> : vector<8x512xf32>
    %353 = tpu.matmul %352, %342, %cst_191 {dimension_numbers = #tpu.dot_dimension_numbers<[1], [0], [0], [1], [0, 0, 1, 1], [], []>} : vector<8x128xf32>, vector<128x512xf32>, vector<8x512xf32> -> vector<8x512xf32>
    %354 = arith.addf %351, %353 : vector<8x512xf32>
    %355 = vector.extract_strided_slice %354 {offsets = [0, 0], sizes = [8, 128], strides = [1, 1]} : vector<8x512xf32> to vector<8x128xf32>
    %356 = arith.negf %355 : vector<8x128xf32>
    %357 = math.exp %356 : vector<8x128xf32>
    %cst_192 = arith.constant 1.000000e+00 : f32
    %358 = vector.broadcast %cst_192 : f32 to vector<8x128xf32>
    %359 = arith.addf %358, %357 : vector<8x128xf32>
    %360 = arith.divf %358, %359 : vector<8x128xf32>
    %361 = vector.extract_strided_slice %354 {offsets = [0, 128], sizes = [8, 128], strides = [1, 1]} : vector<8x512xf32> to vector<8x128xf32>
    %362 = arith.negf %361 : vector<8x128xf32>
    %363 = math.exp %362 : vector<8x128xf32>
    %cst_193 = arith.constant 1.000000e+00 : f32
    %364 = vector.broadcast %cst_193 : f32 to vector<8x128xf32>
    %365 = arith.addf %364, %363 : vector<8x128xf32>
    %366 = arith.divf %364, %365 : vector<8x128xf32>
    %367 = vector.extract_strided_slice %354 {offsets = [0, 256], sizes = [8, 128], strides = [1, 1]} : vector<8x512xf32> to vector<8x128xf32>
    %368 = math.tanh %367 : vector<8x128xf32>
    %369 = vector.extract_strided_slice %354 {offsets = [0, 384], sizes = [8, 128], strides = [1, 1]} : vector<8x512xf32> to vector<8x128xf32>
    %370 = arith.negf %369 : vector<8x128xf32>
    %371 = math.exp %370 : vector<8x128xf32>
    %cst_194 = arith.constant 1.000000e+00 : f32
    %372 = vector.broadcast %cst_194 : f32 to vector<8x128xf32>
    %373 = arith.addf %372, %371 : vector<8x128xf32>
    %374 = arith.divf %372, %373 : vector<8x128xf32>
    %c0_195 = arith.constant 0 : index
    %c0_196 = arith.constant 0 : index
    %375 = vector.load %arg13[%c0_195, %c0_196] : memref<8x128xf32, #tpu.memory_space<vmem>>, vector<8x128xf32>
    %376 = arith.mulf %366, %375 : vector<8x128xf32>
    %377 = arith.mulf %360, %368 : vector<8x128xf32>
    %378 = arith.addf %376, %377 : vector<8x128xf32>
    %379 = math.tanh %378 : vector<8x128xf32>
    %380 = arith.mulf %374, %379 : vector<8x128xf32>
    %c0_197 = arith.constant 0 : index
    %c0_198 = arith.constant 0 : index
    %381 = vector.load %arg13[%c0_197, %c0_198] : memref<8x128xf32, #tpu.memory_space<vmem>>, vector<8x128xf32>
    tpu.vector_store %arg13[%c0_197, %c0_198], %378 {strides = array<i32>} : memref<8x128xf32, #tpu.memory_space<vmem>>, vector<8x128xf32>,
    %c0_199 = arith.constant 0 : index
    %c0_200 = arith.constant 0 : index
    %382 = vector.load %arg12[%c0_199, %c0_200] : memref<8x128xf32, #tpu.memory_space<vmem>>, vector<8x128xf32>
    tpu.vector_store %arg12[%c0_199, %c0_200], %380 {strides = array<i32>} : memref<8x128xf32, #tpu.memory_space<vmem>>, vector<8x128xf32>,
    %383 = arith.index_cast %c0_i32_186 : i32 to index
    %c0_201 = arith.constant 0 : index
    %c0_202 = arith.constant 0 : index
    %384 = vector.load %arg8[%383, %c0_201, %c0_202] : memref<8x8x128xf32, #tpu.memory_space<vmem>>, vector<1x8x128xf32>
    %385 = vector.shape_cast %384 : vector<1x8x128xf32> to vector<8x128xf32>
    %386 = vector.shape_cast %380 : vector<8x128xf32> to vector<1x8x128xf32>
    tpu.vector_store %arg8[%383, %c0_201, %c0_202], %386 {strides = array<i32>} : memref<8x8x128xf32, #tpu.memory_space<vmem>>, vector<1x8x128xf32>,
    %c1_i32_203 = arith.constant 1 : i32
    %387 = arith.index_cast %c1_i32_203 : i32 to index
    %c0_204 = arith.constant 0 : index
    %c0_205 = arith.constant 0 : index
    %388 = vector.load %arg11[%387, %c0_204, %c0_205] : memref<8x8x512xf32, #tpu.memory_space<vmem>>, vector<1x8x512xf32>
    %389 = vector.shape_cast %388 : vector<1x8x512xf32> to vector<8x512xf32>
    %c0_206 = arith.constant 0 : index
    %c0_207 = arith.constant 0 : index
    %390 = vector.load %arg12[%c0_206, %c0_207] : memref<8x128xf32, #tpu.memory_space<vmem>>, vector<8x128xf32>
    %cst_208 = arith.constant dense<0.000000e+00> : vector<8x512xf32>
    %391 = tpu.matmul %390, %342, %cst_208 {dimension_numbers = #tpu.dot_dimension_numbers<[1], [0], [0], [1], [0, 0, 1, 1], [], []>} : vector<8x128xf32>, vector<128x512xf32>, vector<8x512xf32> -> vector<8x512xf32>
    %392 = arith.addf %389, %391 : vector<8x512xf32>
    %393 = vector.extract_strided_slice %392 {offsets = [0, 0], sizes = [8, 128], strides = [1, 1]} : vector<8x512xf32> to vector<8x128xf32>
    %394 = arith.negf %393 : vector<8x128xf32>
    %395 = math.exp %394 : vector<8x128xf32>
    %cst_209 = arith.constant 1.000000e+00 : f32
    %396 = vector.broadcast %cst_209 : f32 to vector<8x128xf32>
    %397 = arith.addf %396, %395 : vector<8x128xf32>
    %398 = arith.divf %396, %397 : vector<8x128xf32>
    %399 = vector.extract_strided_slice %392 {offsets = [0, 128], sizes = [8, 128], strides = [1, 1]} : vector<8x512xf32> to vector<8x128xf32>
    %400 = arith.negf %399 : vector<8x128xf32>
    %401 = math.exp %400 : vector<8x128xf32>
    %cst_210 = arith.constant 1.000000e+00 : f32
    %402 = vector.broadcast %cst_210 : f32 to vector<8x128xf32>
    %403 = arith.addf %402, %401 : vector<8x128xf32>
    %404 = arith.divf %402, %403 : vector<8x128xf32>
    %405 = vector.extract_strided_slice %392 {offsets = [0, 256], sizes = [8, 128], strides = [1, 1]} : vector<8x512xf32> to vector<8x128xf32>
    %406 = math.tanh %405 : vector<8x128xf32>
    %407 = vector.extract_strided_slice %392 {offsets = [0, 384], sizes = [8, 128], strides = [1, 1]} : vector<8x512xf32> to vector<8x128xf32>
    %408 = arith.negf %407 : vector<8x128xf32>
    %409 = math.exp %408 : vector<8x128xf32>
    %cst_211 = arith.constant 1.000000e+00 : f32
    %410 = vector.broadcast %cst_211 : f32 to vector<8x128xf32>
    %411 = arith.addf %410, %409 : vector<8x128xf32>
    %412 = arith.divf %410, %411 : vector<8x128xf32>
    %c0_212 = arith.constant 0 : index
    %c0_213 = arith.constant 0 : index
    %413 = vector.load %arg13[%c0_212, %c0_213] : memref<8x128xf32, #tpu.memory_space<vmem>>, vector<8x128xf32>
    %414 = arith.mulf %404, %413 : vector<8x128xf32>
    %415 = arith.mulf %398, %406 : vector<8x128xf32>
    %416 = arith.addf %414, %415 : vector<8x128xf32>
    %417 = math.tanh %416 : vector<8x128xf32>
    %418 = arith.mulf %412, %417 : vector<8x128xf32>
    %c0_214 = arith.constant 0 : index
    %c0_215 = arith.constant 0 : index
    %419 = vector.load %arg13[%c0_214, %c0_215] : memref<8x128xf32, #tpu.memory_space<vmem>>, vector<8x128xf32>
    tpu.vector_store %arg13[%c0_214, %c0_215], %416 {strides = array<i32>} : memref<8x128xf32, #tpu.memory_space<vmem>>, vector<8x128xf32>,
    %c0_216 = arith.constant 0 : index
    %c0_217 = arith.constant 0 : index
    %420 = vector.load %arg12[%c0_216, %c0_217] : memref<8x128xf32, #tpu.memory_space<vmem>>, vector<8x128xf32>
    tpu.vector_store %arg12[%c0_216, %c0_217], %418 {strides = array<i32>} : memref<8x128xf32, #tpu.memory_space<vmem>>, vector<8x128xf32>,
    %421 = arith.index_cast %c1_i32_203 : i32 to index
    %c0_218 = arith.constant 0 : index
    %c0_219 = arith.constant 0 : index
    %422 = vector.load %arg8[%421, %c0_218, %c0_219] : memref<8x8x128xf32, #tpu.memory_space<vmem>>, vector<1x8x128xf32>
    %423 = vector.shape_cast %422 : vector<1x8x128xf32> to vector<8x128xf32>
    %424 = vector.shape_cast %418 : vector<8x128xf32> to vector<1x8x128xf32>
    tpu.vector_store %arg8[%421, %c0_218, %c0_219], %424 {strides = array<i32>} : memref<8x8x128xf32, #tpu.memory_space<vmem>>, vector<1x8x128xf32>,
    %c2_i32_220 = arith.constant 2 : i32
    %425 = arith.index_cast %c2_i32_220 : i32 to index
    %c0_221 = arith.constant 0 : index
    %c0_222 = arith.constant 0 : index
    %426 = vector.load %arg11[%425, %c0_221, %c0_222] : memref<8x8x512xf32, #tpu.memory_space<vmem>>, vector<1x8x512xf32>
    %427 = vector.shape_cast %426 : vector<1x8x512xf32> to vector<8x512xf32>
    %c0_223 = arith.constant 0 : index
    %c0_224 = arith.constant 0 : index
    %428 = vector.load %arg12[%c0_223, %c0_224] : memref<8x128xf32, #tpu.memory_space<vmem>>, vector<8x128xf32>
    %cst_225 = arith.constant dense<0.000000e+00> : vector<8x512xf32>
    %429 = tpu.matmul %428, %342, %cst_225 {dimension_numbers = #tpu.dot_dimension_numbers<[1], [0], [0], [1], [0, 0, 1, 1], [], []>} : vector<8x128xf32>, vector<128x512xf32>, vector<8x512xf32> -> vector<8x512xf32>
    %430 = arith.addf %427, %429 : vector<8x512xf32>
    %431 = vector.extract_strided_slice %430 {offsets = [0, 0], sizes = [8, 128], strides = [1, 1]} : vector<8x512xf32> to vector<8x128xf32>
    %432 = arith.negf %431 : vector<8x128xf32>
    %433 = math.exp %432 : vector<8x128xf32>
    %cst_226 = arith.constant 1.000000e+00 : f32
    %434 = vector.broadcast %cst_226 : f32 to vector<8x128xf32>
    %435 = arith.addf %434, %433 : vector<8x128xf32>
    %436 = arith.divf %434, %435 : vector<8x128xf32>
    %437 = vector.extract_strided_slice %430 {offsets = [0, 128], sizes = [8, 128], strides = [1, 1]} : vector<8x512xf32> to vector<8x128xf32>
    %438 = arith.negf %437 : vector<8x128xf32>
    %439 = math.exp %438 : vector<8x128xf32>
    %cst_227 = arith.constant 1.000000e+00 : f32
    %440 = vector.broadcast %cst_227 : f32 to vector<8x128xf32>
    %441 = arith.addf %440, %439 : vector<8x128xf32>
    %442 = arith.divf %440, %441 : vector<8x128xf32>
    %443 = vector.extract_strided_slice %430 {offsets = [0, 256], sizes = [8, 128], strides = [1, 1]} : vector<8x512xf32> to vector<8x128xf32>
    %444 = math.tanh %443 : vector<8x128xf32>
    %445 = vector.extract_strided_slice %430 {offsets = [0, 384], sizes = [8, 128], strides = [1, 1]} : vector<8x512xf32> to vector<8x128xf32>
    %446 = arith.negf %445 : vector<8x128xf32>
    %447 = math.exp %446 : vector<8x128xf32>
    %cst_228 = arith.constant 1.000000e+00 : f32
    %448 = vector.broadcast %cst_228 : f32 to vector<8x128xf32>
    %449 = arith.addf %448, %447 : vector<8x128xf32>
    %450 = arith.divf %448, %449 : vector<8x128xf32>
    %c0_229 = arith.constant 0 : index
    %c0_230 = arith.constant 0 : index
    %451 = vector.load %arg13[%c0_229, %c0_230] : memref<8x128xf32, #tpu.memory_space<vmem>>, vector<8x128xf32>
    %452 = arith.mulf %442, %451 : vector<8x128xf32>
    %453 = arith.mulf %436, %444 : vector<8x128xf32>
    %454 = arith.addf %452, %453 : vector<8x128xf32>
    %455 = math.tanh %454 : vector<8x128xf32>
    %456 = arith.mulf %450, %455 : vector<8x128xf32>
    %c0_231 = arith.constant 0 : index
    %c0_232 = arith.constant 0 : index
    %457 = vector.load %arg13[%c0_231, %c0_232] : memref<8x128xf32, #tpu.memory_space<vmem>>, vector<8x128xf32>
    tpu.vector_store %arg13[%c0_231, %c0_232], %454 {strides = array<i32>} : memref<8x128xf32, #tpu.memory_space<vmem>>, vector<8x128xf32>,
    %c0_233 = arith.constant 0 : index
    %c0_234 = arith.constant 0 : index
    %458 = vector.load %arg12[%c0_233, %c0_234] : memref<8x128xf32, #tpu.memory_space<vmem>>, vector<8x128xf32>
    tpu.vector_store %arg12[%c0_233, %c0_234], %456 {strides = array<i32>} : memref<8x128xf32, #tpu.memory_space<vmem>>, vector<8x128xf32>,
    %459 = arith.index_cast %c2_i32_220 : i32 to index
    %c0_235 = arith.constant 0 : index
    %c0_236 = arith.constant 0 : index
    %460 = vector.load %arg8[%459, %c0_235, %c0_236] : memref<8x8x128xf32, #tpu.memory_space<vmem>>, vector<1x8x128xf32>
    %461 = vector.shape_cast %460 : vector<1x8x128xf32> to vector<8x128xf32>
    %462 = vector.shape_cast %456 : vector<8x128xf32> to vector<1x8x128xf32>
    tpu.vector_store %arg8[%459, %c0_235, %c0_236], %462 {strides = array<i32>} : memref<8x8x128xf32, #tpu.memory_space<vmem>>, vector<1x8x128xf32>,
    %c3_i32_237 = arith.constant 3 : i32
    %463 = arith.index_cast %c3_i32_237 : i32 to index
    %c0_238 = arith.constant 0 : index
    %c0_239 = arith.constant 0 : index
    %464 = vector.load %arg11[%463, %c0_238, %c0_239] : memref<8x8x512xf32, #tpu.memory_space<vmem>>, vector<1x8x512xf32>
    %465 = vector.shape_cast %464 : vector<1x8x512xf32> to vector<8x512xf32>
    %c0_240 = arith.constant 0 : index
    %c0_241 = arith.constant 0 : index
    %466 = vector.load %arg12[%c0_240, %c0_241] : memref<8x128xf32, #tpu.memory_space<vmem>>, vector<8x128xf32>
    %cst_242 = arith.constant dense<0.000000e+00> : vector<8x512xf32>
    %467 = tpu.matmul %466, %342, %cst_242 {dimension_numbers = #tpu.dot_dimension_numbers<[1], [0], [0], [1], [0, 0, 1, 1], [], []>} : vector<8x128xf32>, vector<128x512xf32>, vector<8x512xf32> -> vector<8x512xf32>
    %468 = arith.addf %465, %467 : vector<8x512xf32>
    %469 = vector.extract_strided_slice %468 {offsets = [0, 0], sizes = [8, 128], strides = [1, 1]} : vector<8x512xf32> to vector<8x128xf32>
    %470 = arith.negf %469 : vector<8x128xf32>
    %471 = math.exp %470 : vector<8x128xf32>
    %cst_243 = arith.constant 1.000000e+00 : f32
    %472 = vector.broadcast %cst_243 : f32 to vector<8x128xf32>
    %473 = arith.addf %472, %471 : vector<8x128xf32>
    %474 = arith.divf %472, %473 : vector<8x128xf32>
    %475 = vector.extract_strided_slice %468 {offsets = [0, 128], sizes = [8, 128], strides = [1, 1]} : vector<8x512xf32> to vector<8x128xf32>
    %476 = arith.negf %475 : vector<8x128xf32>
    %477 = math.exp %476 : vector<8x128xf32>
    %cst_244 = arith.constant 1.000000e+00 : f32
    %478 = vector.broadcast %cst_244 : f32 to vector<8x128xf32>
    %479 = arith.addf %478, %477 : vector<8x128xf32>
    %480 = arith.divf %478, %479 : vector<8x128xf32>
    %481 = vector.extract_strided_slice %468 {offsets = [0, 256], sizes = [8, 128], strides = [1, 1]} : vector<8x512xf32> to vector<8x128xf32>
    %482 = math.tanh %481 : vector<8x128xf32>
    %483 = vector.extract_strided_slice %468 {offsets = [0, 384], sizes = [8, 128], strides = [1, 1]} : vector<8x512xf32> to vector<8x128xf32>
    %484 = arith.negf %483 : vector<8x128xf32>
    %485 = math.exp %484 : vector<8x128xf32>
    %cst_245 = arith.constant 1.000000e+00 : f32
    %486 = vector.broadcast %cst_245 : f32 to vector<8x128xf32>
    %487 = arith.addf %486, %485 : vector<8x128xf32>
    %488 = arith.divf %486, %487 : vector<8x128xf32>
    %c0_246 = arith.constant 0 : index
    %c0_247 = arith.constant 0 : index
    %489 = vector.load %arg13[%c0_246, %c0_247] : memref<8x128xf32, #tpu.memory_space<vmem>>, vector<8x128xf32>
    %490 = arith.mulf %480, %489 : vector<8x128xf32>
    %491 = arith.mulf %474, %482 : vector<8x128xf32>
    %492 = arith.addf %490, %491 : vector<8x128xf32>
    %493 = math.tanh %492 : vector<8x128xf32>
    %494 = arith.mulf %488, %493 : vector<8x128xf32>
    %c0_248 = arith.constant 0 : index
    %c0_249 = arith.constant 0 : index
    %495 = vector.load %arg13[%c0_248, %c0_249] : memref<8x128xf32, #tpu.memory_space<vmem>>, vector<8x128xf32>
    tpu.vector_store %arg13[%c0_248, %c0_249], %492 {strides = array<i32>} : memref<8x128xf32, #tpu.memory_space<vmem>>, vector<8x128xf32>,
    %c0_250 = arith.constant 0 : index
    %c0_251 = arith.constant 0 : index
    %496 = vector.load %arg12[%c0_250, %c0_251] : memref<8x128xf32, #tpu.memory_space<vmem>>, vector<8x128xf32>
    tpu.vector_store %arg12[%c0_250, %c0_251], %494 {strides = array<i32>} : memref<8x128xf32, #tpu.memory_space<vmem>>, vector<8x128xf32>,
    %497 = arith.index_cast %c3_i32_237 : i32 to index
    %c0_252 = arith.constant 0 : index
    %c0_253 = arith.constant 0 : index
    %498 = vector.load %arg8[%497, %c0_252, %c0_253] : memref<8x8x128xf32, #tpu.memory_space<vmem>>, vector<1x8x128xf32>
    %499 = vector.shape_cast %498 : vector<1x8x128xf32> to vector<8x128xf32>
    %500 = vector.shape_cast %494 : vector<8x128xf32> to vector<1x8x128xf32>
    tpu.vector_store %arg8[%497, %c0_252, %c0_253], %500 {strides = array<i32>} : memref<8x8x128xf32, #tpu.memory_space<vmem>>, vector<1x8x128xf32>,
    %c4_i32_254 = arith.constant 4 : i32
    %501 = arith.index_cast %c4_i32_254 : i32 to index
    %c0_255 = arith.constant 0 : index
    %c0_256 = arith.constant 0 : index
    %502 = vector.load %arg11[%501, %c0_255, %c0_256] : memref<8x8x512xf32, #tpu.memory_space<vmem>>, vector<1x8x512xf32>
    %503 = vector.shape_cast %502 : vector<1x8x512xf32> to vector<8x512xf32>
    %c0_257 = arith.constant 0 : index
    %c0_258 = arith.constant 0 : index
    %504 = vector.load %arg12[%c0_257, %c0_258] : memref<8x128xf32, #tpu.memory_space<vmem>>, vector<8x128xf32>
    %cst_259 = arith.constant dense<0.000000e+00> : vector<8x512xf32>
    %505 = tpu.matmul %504, %342, %cst_259 {dimension_numbers = #tpu.dot_dimension_numbers<[1], [0], [0], [1], [0, 0, 1, 1], [], []>} : vector<8x128xf32>, vector<128x512xf32>, vector<8x512xf32> -> vector<8x512xf32>
    %506 = arith.addf %503, %505 : vector<8x512xf32>
    %507 = vector.extract_strided_slice %506 {offsets = [0, 0], sizes = [8, 128], strides = [1, 1]} : vector<8x512xf32> to vector<8x128xf32>
    %508 = arith.negf %507 : vector<8x128xf32>
    %509 = math.exp %508 : vector<8x128xf32>
    %cst_260 = arith.constant 1.000000e+00 : f32
    %510 = vector.broadcast %cst_260 : f32 to vector<8x128xf32>
    %511 = arith.addf %510, %509 : vector<8x128xf32>
    %512 = arith.divf %510, %511 : vector<8x128xf32>
    %513 = vector.extract_strided_slice %506 {offsets = [0, 128], sizes = [8, 128], strides = [1, 1]} : vector<8x512xf32> to vector<8x128xf32>
    %514 = arith.negf %513 : vector<8x128xf32>
    %515 = math.exp %514 : vector<8x128xf32>
    %cst_261 = arith.constant 1.000000e+00 : f32
    %516 = vector.broadcast %cst_261 : f32 to vector<8x128xf32>
    %517 = arith.addf %516, %515 : vector<8x128xf32>
    %518 = arith.divf %516, %517 : vector<8x128xf32>
    %519 = vector.extract_strided_slice %506 {offsets = [0, 256], sizes = [8, 128], strides = [1, 1]} : vector<8x512xf32> to vector<8x128xf32>
    %520 = math.tanh %519 : vector<8x128xf32>
    %521 = vector.extract_strided_slice %506 {offsets = [0, 384], sizes = [8, 128], strides = [1, 1]} : vector<8x512xf32> to vector<8x128xf32>
    %522 = arith.negf %521 : vector<8x128xf32>
    %523 = math.exp %522 : vector<8x128xf32>
    %cst_262 = arith.constant 1.000000e+00 : f32
    %524 = vector.broadcast %cst_262 : f32 to vector<8x128xf32>
    %525 = arith.addf %524, %523 : vector<8x128xf32>
    %526 = arith.divf %524, %525 : vector<8x128xf32>
    %c0_263 = arith.constant 0 : index
    %c0_264 = arith.constant 0 : index
    %527 = vector.load %arg13[%c0_263, %c0_264] : memref<8x128xf32, #tpu.memory_space<vmem>>, vector<8x128xf32>
    %528 = arith.mulf %518, %527 : vector<8x128xf32>
    %529 = arith.mulf %512, %520 : vector<8x128xf32>
    %530 = arith.addf %528, %529 : vector<8x128xf32>
    %531 = math.tanh %530 : vector<8x128xf32>
    %532 = arith.mulf %526, %531 : vector<8x128xf32>
    %c0_265 = arith.constant 0 : index
    %c0_266 = arith.constant 0 : index
    %533 = vector.load %arg13[%c0_265, %c0_266] : memref<8x128xf32, #tpu.memory_space<vmem>>, vector<8x128xf32>
    tpu.vector_store %arg13[%c0_265, %c0_266], %530 {strides = array<i32>} : memref<8x128xf32, #tpu.memory_space<vmem>>, vector<8x128xf32>,
    %c0_267 = arith.constant 0 : index
    %c0_268 = arith.constant 0 : index
    %534 = vector.load %arg12[%c0_267, %c0_268] : memref<8x128xf32, #tpu.memory_space<vmem>>, vector<8x128xf32>
    tpu.vector_store %arg12[%c0_267, %c0_268], %532 {strides = array<i32>} : memref<8x128xf32, #tpu.memory_space<vmem>>, vector<8x128xf32>,
    %535 = arith.index_cast %c4_i32_254 : i32 to index
    %c0_269 = arith.constant 0 : index
    %c0_270 = arith.constant 0 : index
    %536 = vector.load %arg8[%535, %c0_269, %c0_270] : memref<8x8x128xf32, #tpu.memory_space<vmem>>, vector<1x8x128xf32>
    %537 = vector.shape_cast %536 : vector<1x8x128xf32> to vector<8x128xf32>
    %538 = vector.shape_cast %532 : vector<8x128xf32> to vector<1x8x128xf32>
    tpu.vector_store %arg8[%535, %c0_269, %c0_270], %538 {strides = array<i32>} : memref<8x8x128xf32, #tpu.memory_space<vmem>>, vector<1x8x128xf32>,
    %c5_i32_271 = arith.constant 5 : i32
    %539 = arith.index_cast %c5_i32_271 : i32 to index
    %c0_272 = arith.constant 0 : index
    %c0_273 = arith.constant 0 : index
    %540 = vector.load %arg11[%539, %c0_272, %c0_273] : memref<8x8x512xf32, #tpu.memory_space<vmem>>, vector<1x8x512xf32>
    %541 = vector.shape_cast %540 : vector<1x8x512xf32> to vector<8x512xf32>
    %c0_274 = arith.constant 0 : index
    %c0_275 = arith.constant 0 : index
    %542 = vector.load %arg12[%c0_274, %c0_275] : memref<8x128xf32, #tpu.memory_space<vmem>>, vector<8x128xf32>
    %cst_276 = arith.constant dense<0.000000e+00> : vector<8x512xf32>
    %543 = tpu.matmul %542, %342, %cst_276 {dimension_numbers = #tpu.dot_dimension_numbers<[1], [0], [0], [1], [0, 0, 1, 1], [], []>} : vector<8x128xf32>, vector<128x512xf32>, vector<8x512xf32> -> vector<8x512xf32>
    %544 = arith.addf %541, %543 : vector<8x512xf32>
    %545 = vector.extract_strided_slice %544 {offsets = [0, 0], sizes = [8, 128], strides = [1, 1]} : vector<8x512xf32> to vector<8x128xf32>
    %546 = arith.negf %545 : vector<8x128xf32>
    %547 = math.exp %546 : vector<8x128xf32>
    %cst_277 = arith.constant 1.000000e+00 : f32
    %548 = vector.broadcast %cst_277 : f32 to vector<8x128xf32>
    %549 = arith.addf %548, %547 : vector<8x128xf32>
    %550 = arith.divf %548, %549 : vector<8x128xf32>
    %551 = vector.extract_strided_slice %544 {offsets = [0, 128], sizes = [8, 128], strides = [1, 1]} : vector<8x512xf32> to vector<8x128xf32>
    %552 = arith.negf %551 : vector<8x128xf32>
    %553 = math.exp %552 : vector<8x128xf32>
    %cst_278 = arith.constant 1.000000e+00 : f32
    %554 = vector.broadcast %cst_278 : f32 to vector<8x128xf32>
    %555 = arith.addf %554, %553 : vector<8x128xf32>
    %556 = arith.divf %554, %555 : vector<8x128xf32>
    %557 = vector.extract_strided_slice %544 {offsets = [0, 256], sizes = [8, 128], strides = [1, 1]} : vector<8x512xf32> to vector<8x128xf32>
    %558 = math.tanh %557 : vector<8x128xf32>
    %559 = vector.extract_strided_slice %544 {offsets = [0, 384], sizes = [8, 128], strides = [1, 1]} : vector<8x512xf32> to vector<8x128xf32>
    %560 = arith.negf %559 : vector<8x128xf32>
    %561 = math.exp %560 : vector<8x128xf32>
    %cst_279 = arith.constant 1.000000e+00 : f32
    %562 = vector.broadcast %cst_279 : f32 to vector<8x128xf32>
    %563 = arith.addf %562, %561 : vector<8x128xf32>
    %564 = arith.divf %562, %563 : vector<8x128xf32>
    %c0_280 = arith.constant 0 : index
    %c0_281 = arith.constant 0 : index
    %565 = vector.load %arg13[%c0_280, %c0_281] : memref<8x128xf32, #tpu.memory_space<vmem>>, vector<8x128xf32>
    %566 = arith.mulf %556, %565 : vector<8x128xf32>
    %567 = arith.mulf %550, %558 : vector<8x128xf32>
    %568 = arith.addf %566, %567 : vector<8x128xf32>
    %569 = math.tanh %568 : vector<8x128xf32>
    %570 = arith.mulf %564, %569 : vector<8x128xf32>
    %c0_282 = arith.constant 0 : index
    %c0_283 = arith.constant 0 : index
    %571 = vector.load %arg13[%c0_282, %c0_283] : memref<8x128xf32, #tpu.memory_space<vmem>>, vector<8x128xf32>
    tpu.vector_store %arg13[%c0_282, %c0_283], %568 {strides = array<i32>} : memref<8x128xf32, #tpu.memory_space<vmem>>, vector<8x128xf32>,
    %c0_284 = arith.constant 0 : index
    %c0_285 = arith.constant 0 : index
    %572 = vector.load %arg12[%c0_284, %c0_285] : memref<8x128xf32, #tpu.memory_space<vmem>>, vector<8x128xf32>
    tpu.vector_store %arg12[%c0_284, %c0_285], %570 {strides = array<i32>} : memref<8x128xf32, #tpu.memory_space<vmem>>, vector<8x128xf32>,
    %573 = arith.index_cast %c5_i32_271 : i32 to index
    %c0_286 = arith.constant 0 : index
    %c0_287 = arith.constant 0 : index
    %574 = vector.load %arg8[%573, %c0_286, %c0_287] : memref<8x8x128xf32, #tpu.memory_space<vmem>>, vector<1x8x128xf32>
    %575 = vector.shape_cast %574 : vector<1x8x128xf32> to vector<8x128xf32>
    %576 = vector.shape_cast %570 : vector<8x128xf32> to vector<1x8x128xf32>
    tpu.vector_store %arg8[%573, %c0_286, %c0_287], %576 {strides = array<i32>} : memref<8x8x128xf32, #tpu.memory_space<vmem>>, vector<1x8x128xf32>,
    %c6_i32_288 = arith.constant 6 : i32
    %577 = arith.index_cast %c6_i32_288 : i32 to index
    %c0_289 = arith.constant 0 : index
    %c0_290 = arith.constant 0 : index
    %578 = vector.load %arg11[%577, %c0_289, %c0_290] : memref<8x8x512xf32, #tpu.memory_space<vmem>>, vector<1x8x512xf32>
    %579 = vector.shape_cast %578 : vector<1x8x512xf32> to vector<8x512xf32>
    %c0_291 = arith.constant 0 : index
    %c0_292 = arith.constant 0 : index
    %580 = vector.load %arg12[%c0_291, %c0_292] : memref<8x128xf32, #tpu.memory_space<vmem>>, vector<8x128xf32>
    %cst_293 = arith.constant dense<0.000000e+00> : vector<8x512xf32>
    %581 = tpu.matmul %580, %342, %cst_293 {dimension_numbers = #tpu.dot_dimension_numbers<[1], [0], [0], [1], [0, 0, 1, 1], [], []>} : vector<8x128xf32>, vector<128x512xf32>, vector<8x512xf32> -> vector<8x512xf32>
    %582 = arith.addf %579, %581 : vector<8x512xf32>
    %583 = vector.extract_strided_slice %582 {offsets = [0, 0], sizes = [8, 128], strides = [1, 1]} : vector<8x512xf32> to vector<8x128xf32>
    %584 = arith.negf %583 : vector<8x128xf32>
    %585 = math.exp %584 : vector<8x128xf32>
    %cst_294 = arith.constant 1.000000e+00 : f32
    %586 = vector.broadcast %cst_294 : f32 to vector<8x128xf32>
    %587 = arith.addf %586, %585 : vector<8x128xf32>
    %588 = arith.divf %586, %587 : vector<8x128xf32>
    %589 = vector.extract_strided_slice %582 {offsets = [0, 128], sizes = [8, 128], strides = [1, 1]} : vector<8x512xf32> to vector<8x128xf32>
    %590 = arith.negf %589 : vector<8x128xf32>
    %591 = math.exp %590 : vector<8x128xf32>
    %cst_295 = arith.constant 1.000000e+00 : f32
    %592 = vector.broadcast %cst_295 : f32 to vector<8x128xf32>
    %593 = arith.addf %592, %591 : vector<8x128xf32>
    %594 = arith.divf %592, %593 : vector<8x128xf32>
    %595 = vector.extract_strided_slice %582 {offsets = [0, 256], sizes = [8, 128], strides = [1, 1]} : vector<8x512xf32> to vector<8x128xf32>
    %596 = math.tanh %595 : vector<8x128xf32>
    %597 = vector.extract_strided_slice %582 {offsets = [0, 384], sizes = [8, 128], strides = [1, 1]} : vector<8x512xf32> to vector<8x128xf32>
    %598 = arith.negf %597 : vector<8x128xf32>
    %599 = math.exp %598 : vector<8x128xf32>
    %cst_296 = arith.constant 1.000000e+00 : f32
    %600 = vector.broadcast %cst_296 : f32 to vector<8x128xf32>
    %601 = arith.addf %600, %599 : vector<8x128xf32>
    %602 = arith.divf %600, %601 : vector<8x128xf32>
    %c0_297 = arith.constant 0 : index
    %c0_298 = arith.constant 0 : index
    %603 = vector.load %arg13[%c0_297, %c0_298] : memref<8x128xf32, #tpu.memory_space<vmem>>, vector<8x128xf32>
    %604 = arith.mulf %594, %603 : vector<8x128xf32>
    %605 = arith.mulf %588, %596 : vector<8x128xf32>
    %606 = arith.addf %604, %605 : vector<8x128xf32>
    %607 = math.tanh %606 : vector<8x128xf32>
    %608 = arith.mulf %602, %607 : vector<8x128xf32>
    %c0_299 = arith.constant 0 : index
    %c0_300 = arith.constant 0 : index
    %609 = vector.load %arg13[%c0_299, %c0_300] : memref<8x128xf32, #tpu.memory_space<vmem>>, vector<8x128xf32>
    tpu.vector_store %arg13[%c0_299, %c0_300], %606 {strides = array<i32>} : memref<8x128xf32, #tpu.memory_space<vmem>>, vector<8x128xf32>,
    %c0_301 = arith.constant 0 : index
    %c0_302 = arith.constant 0 : index
    %610 = vector.load %arg12[%c0_301, %c0_302] : memref<8x128xf32, #tpu.memory_space<vmem>>, vector<8x128xf32>
    tpu.vector_store %arg12[%c0_301, %c0_302], %608 {strides = array<i32>} : memref<8x128xf32, #tpu.memory_space<vmem>>, vector<8x128xf32>,
    %611 = arith.index_cast %c6_i32_288 : i32 to index
    %c0_303 = arith.constant 0 : index
    %c0_304 = arith.constant 0 : index
    %612 = vector.load %arg8[%611, %c0_303, %c0_304] : memref<8x8x128xf32, #tpu.memory_space<vmem>>, vector<1x8x128xf32>
    %613 = vector.shape_cast %612 : vector<1x8x128xf32> to vector<8x128xf32>
    %614 = vector.shape_cast %608 : vector<8x128xf32> to vector<1x8x128xf32>
    tpu.vector_store %arg8[%611, %c0_303, %c0_304], %614 {strides = array<i32>} : memref<8x8x128xf32, #tpu.memory_space<vmem>>, vector<1x8x128xf32>,
    %c7_i32_305 = arith.constant 7 : i32
    %615 = arith.index_cast %c7_i32_305 : i32 to index
    %c0_306 = arith.constant 0 : index
    %c0_307 = arith.constant 0 : index
    %616 = vector.load %arg11[%615, %c0_306, %c0_307] : memref<8x8x512xf32, #tpu.memory_space<vmem>>, vector<1x8x512xf32>
    %617 = vector.shape_cast %616 : vector<1x8x512xf32> to vector<8x512xf32>
    %c0_308 = arith.constant 0 : index
    %c0_309 = arith.constant 0 : index
    %618 = vector.load %arg12[%c0_308, %c0_309] : memref<8x128xf32, #tpu.memory_space<vmem>>, vector<8x128xf32>
    %cst_310 = arith.constant dense<0.000000e+00> : vector<8x512xf32>
    %619 = tpu.matmul %618, %342, %cst_310 {dimension_numbers = #tpu.dot_dimension_numbers<[1], [0], [0], [1], [0, 0, 1, 1], [], []>} : vector<8x128xf32>, vector<128x512xf32>, vector<8x512xf32> -> vector<8x512xf32>
    %620 = arith.addf %617, %619 : vector<8x512xf32>
    %621 = vector.extract_strided_slice %620 {offsets = [0, 0], sizes = [8, 128], strides = [1, 1]} : vector<8x512xf32> to vector<8x128xf32>
    %622 = arith.negf %621 : vector<8x128xf32>
    %623 = math.exp %622 : vector<8x128xf32>
    %cst_311 = arith.constant 1.000000e+00 : f32
    %624 = vector.broadcast %cst_311 : f32 to vector<8x128xf32>
    %625 = arith.addf %624, %623 : vector<8x128xf32>
    %626 = arith.divf %624, %625 : vector<8x128xf32>
    %627 = vector.extract_strided_slice %620 {offsets = [0, 128], sizes = [8, 128], strides = [1, 1]} : vector<8x512xf32> to vector<8x128xf32>
    %628 = arith.negf %627 : vector<8x128xf32>
    %629 = math.exp %628 : vector<8x128xf32>
    %cst_312 = arith.constant 1.000000e+00 : f32
    %630 = vector.broadcast %cst_312 : f32 to vector<8x128xf32>
    %631 = arith.addf %630, %629 : vector<8x128xf32>
    %632 = arith.divf %630, %631 : vector<8x128xf32>
    %633 = vector.extract_strided_slice %620 {offsets = [0, 256], sizes = [8, 128], strides = [1, 1]} : vector<8x512xf32> to vector<8x128xf32>
    %634 = math.tanh %633 : vector<8x128xf32>
    %635 = vector.extract_strided_slice %620 {offsets = [0, 384], sizes = [8, 128], strides = [1, 1]} : vector<8x512xf32> to vector<8x128xf32>
    %636 = arith.negf %635 : vector<8x128xf32>
    %637 = math.exp %636 : vector<8x128xf32>
    %cst_313 = arith.constant 1.000000e+00 : f32
    %638 = vector.broadcast %cst_313 : f32 to vector<8x128xf32>
    %639 = arith.addf %638, %637 : vector<8x128xf32>
    %640 = arith.divf %638, %639 : vector<8x128xf32>
    %c0_314 = arith.constant 0 : index
    %c0_315 = arith.constant 0 : index
    %641 = vector.load %arg13[%c0_314, %c0_315] : memref<8x128xf32, #tpu.memory_space<vmem>>, vector<8x128xf32>
    %642 = arith.mulf %632, %641 : vector<8x128xf32>
    %643 = arith.mulf %626, %634 : vector<8x128xf32>
    %644 = arith.addf %642, %643 : vector<8x128xf32>
    %645 = math.tanh %644 : vector<8x128xf32>
    %646 = arith.mulf %640, %645 : vector<8x128xf32>
    %c0_316 = arith.constant 0 : index
    %c0_317 = arith.constant 0 : index
    %647 = vector.load %arg13[%c0_316, %c0_317] : memref<8x128xf32, #tpu.memory_space<vmem>>, vector<8x128xf32>
    tpu.vector_store %arg13[%c0_316, %c0_317], %644 {strides = array<i32>} : memref<8x128xf32, #tpu.memory_space<vmem>>, vector<8x128xf32>,
    %c0_318 = arith.constant 0 : index
    %c0_319 = arith.constant 0 : index
    %648 = vector.load %arg12[%c0_318, %c0_319] : memref<8x128xf32, #tpu.memory_space<vmem>>, vector<8x128xf32>
    tpu.vector_store %arg12[%c0_318, %c0_319], %646 {strides = array<i32>} : memref<8x128xf32, #tpu.memory_space<vmem>>, vector<8x128xf32>,
    %649 = arith.index_cast %c7_i32_305 : i32 to index
    %c0_320 = arith.constant 0 : index
    %c0_321 = arith.constant 0 : index
    %650 = vector.load %arg8[%649, %c0_320, %c0_321] : memref<8x8x128xf32, #tpu.memory_space<vmem>>, vector<1x8x128xf32>
    %651 = vector.shape_cast %650 : vector<1x8x128xf32> to vector<8x128xf32>
    %652 = vector.shape_cast %646 : vector<8x128xf32> to vector<1x8x128xf32>
    tpu.vector_store %arg8[%649, %c0_320, %c0_321], %652 {strides = array<i32>} : memref<8x8x128xf32, #tpu.memory_space<vmem>>, vector<1x8x128xf32>,
    %c8_i32_322 = arith.constant 8 : i32
    %c0_323 = arith.constant 0 : index
    %c0_324 = arith.constant 0 : index
    %653 = vector.load %arg12[%c0_323, %c0_324] : memref<8x128xf32, #tpu.memory_space<vmem>>, vector<8x128xf32>
    %c1_325 = arith.constant 1 : index
    %c0_326 = arith.constant 0 : index
    %c0_327 = arith.constant 0 : index
    %654 = vector.load %arg9[%c1_325, %c0_326, %c0_327] : memref<2x8x128xf32, #tpu.memory_space<vmem>>, vector<1x8x128xf32>
    %655 = vector.shape_cast %654 : vector<1x8x128xf32> to vector<8x128xf32>
    %656 = vector.shape_cast %653 : vector<8x128xf32> to vector<1x8x128xf32>
    tpu.vector_store %arg9[%c1_325, %c0_326, %c0_327], %656 {strides = array<i32>} : memref<2x8x128xf32, #tpu.memory_space<vmem>>, vector<1x8x128xf32>,
    %c0_328 = arith.constant 0 : index
    %c0_329 = arith.constant 0 : index
    %657 = vector.load %arg13[%c0_328, %c0_329] : memref<8x128xf32, #tpu.memory_space<vmem>>, vector<8x128xf32>
    %c1_330 = arith.constant 1 : index
    %c0_331 = arith.constant 0 : index
    %c0_332 = arith.constant 0 : index
    %658 = vector.load %arg10[%c1_330, %c0_331, %c0_332] : memref<2x8x128xf32, #tpu.memory_space<vmem>>, vector<1x8x128xf32>
    %659 = vector.shape_cast %658 : vector<1x8x128xf32> to vector<8x128xf32>
    %660 = vector.shape_cast %657 : vector<8x128xf32> to vector<1x8x128xf32>
    tpu.vector_store %arg10[%c1_330, %c0_331, %c0_332], %660 {strides = array<i32>} : memref<2x8x128xf32, #tpu.memory_space<vmem>>, vector<1x8x128xf32>,
    return
  }
  func.func @transform_0(%arg0: i32) -> (i32, i32, i32) {
    %c0_i32 = arith.constant 0 : i32
    %c0_i32_0 = arith.constant 0 : i32
    %c0_i32_1 = arith.constant 0 : i32
    return %c0_i32, %arg0, %c0_i32_0 : i32, i32, i32
  }
  func.func @transform_1(%arg0: i32) -> (i32, i32, i32) {
    %c0_i32 = arith.constant 0 : i32
    %c0_i32_0 = arith.constant 0 : i32
    %c0_i32_1 = arith.constant 0 : i32
    return %c0_i32, %arg0, %c0_i32_0 : i32, i32, i32
  }
  func.func @transform_2(%arg0: i32) -> (i32, i32, i32) {
    %c0_i32 = arith.constant 0 : i32
    %c0_i32_0 = arith.constant 0 : i32
    %c0_i32_1 = arith.constant 0 : i32
    return %c0_i32, %arg0, %c0_i32_0 : i32, i32, i32
  }
  func.func @transform_3(%arg0: i32) -> (i32, i32) {
    %c0_i32 = arith.constant 0 : i32
    %c0_i32_0 = arith.constant 0 : i32
    %c0_i32_1 = arith.constant 0 : i32
    return %c0_i32, %c0_i32_0 : i32, i32
  }
  func.func @transform_4(%arg0: i32) -> (i32, i32, i32) {
    %c0_i32 = arith.constant 0 : i32
    %c0_i32_0 = arith.constant 0 : i32
    %c0_i32_1 = arith.constant 0 : i32
    %c0_i32_2 = arith.constant 0 : i32
    return %c0_i32, %c0_i32_0, %c0_i32_1 : i32, i32, i32
  }
  func.func @transform_5(%arg0: i32) -> (i32, i32, i32) {
    %c0_i32 = arith.constant 0 : i32
    %c0_i32_0 = arith.constant 0 : i32
    %c0_i32_1 = arith.constant 0 : i32
    %c0_i32_2 = arith.constant 0 : i32
    return %c0_i32, %c0_i32_0, %c0_i32_1 : i32, i32, i32
  }
  func.func @transform_6(%arg0: i32) -> (i32, i32, i32) {
    %c0_i32 = arith.constant 0 : i32
    %c0_i32_0 = arith.constant 0 : i32
    %c0_i32_1 = arith.constant 0 : i32
    %c0_i32_2 = arith.constant 0 : i32
    return %c0_i32, %c0_i32_0, %c0_i32_1 : i32, i32, i32
  }
  func.func @transform_7(%arg0: i32) -> (i32, i32, i32) {
    %c0_i32 = arith.constant 0 : i32
    %c0_i32_0 = arith.constant 0 : i32
    %c0_i32_1 = arith.constant 0 : i32
    return %c0_i32, %arg0, %c0_i32_0 : i32, i32, i32
  }
  func.func @transform_8(%arg0: i32) -> (i32, i32, i32) {
    %c0_i32 = arith.constant 0 : i32
    %c0_i32_0 = arith.constant 0 : i32
    %c0_i32_1 = arith.constant 0 : i32
    return %c0_i32, %arg0, %c0_i32_0 : i32, i32, i32
  }
  func.func @transform_9(%arg0: i32) -> (i32, i32, i32) {
    %c0_i32 = arith.constant 0 : i32
    %c0_i32_0 = arith.constant 0 : i32
    %c0_i32_1 = arith.constant 0 : i32
    return %c0_i32, %arg0, %c0_i32_0 : i32, i32, i32
  }
}

module attributes {stable_mosaic.version = 11 : i64} {
  func.func @_proj_lse_kernel(%arg0: i32, %arg1: i32, %arg2: memref<32x128xf32, #tpu.memory_space<vmem>>, %arg3: memref<128x128xf32, #tpu.memory_space<vmem>>, %arg4: memref<1x128xf32, #tpu.memory_space<vmem>>, %arg5: memref<32x128xf32, #tpu.memory_space<vmem>>, %arg6: memref<32x1xf32, #tpu.memory_space<vmem>>, %arg7: memref<32x1xf32, #tpu.memory_space<vmem>>, %arg8: memref<32x1xf32, #tpu.memory_space<vmem>>) attributes {dimension_semantics = [#tpu.dimension_semantics<parallel>, #tpu.dimension_semantics<arbitrary>], iteration_bounds = array<i64: 1, 1>, scalar_prefetch = 0 : i64, scratch_operands = 2 : i64, tpu.core_type = #tpu.core_type<tc>, window_params = [{transform_indices = @transform_0, window_bounds = array<i64: 32, 128>}, {transform_indices = @transform_1, window_bounds = array<i64: 128, 128>}, {transform_indices = @transform_2, window_bounds = array<i64: 1, 128>}, {transform_indices = @transform_3, window_bounds = array<i64: 32, 128>}, {transform_indices = @transform_4, window_bounds = array<i64: 32, 1>}]} {
    %c0_i32 = arith.constant 0 : i32
    %0 = arith.cmpi eq, %arg1, %c0_i32 : i32
    %1 = arith.extui %0 : i1 to i32
    %c0_i32_0 = arith.constant 0 : i32
    %2 = arith.cmpi ne, %1, %c0_i32_0 : i32
    scf.if %2 {
      %cst_22 = arith.constant -1.000000e+30 : f32
      %37 = vector.broadcast %cst_22 : f32 to vector<32x1xf32>
      %c0_23 = arith.constant 0 : index
      %c0_24 = arith.constant 0 : index
      %38 = vector.load %arg7[%c0_23, %c0_24] : memref<32x1xf32, #tpu.memory_space<vmem>>, vector<32x1xf32>
      tpu.vector_store %arg7[%c0_23, %c0_24], %37 {strides = array<i32>} : memref<32x1xf32, #tpu.memory_space<vmem>>, vector<32x1xf32>,
      %cst_25 = arith.constant 0.000000e+00 : f32
      %39 = vector.broadcast %cst_25 : f32 to vector<32x1xf32>
      %c0_26 = arith.constant 0 : index
      %c0_27 = arith.constant 0 : index
      %40 = vector.load %arg8[%c0_26, %c0_27] : memref<32x1xf32, #tpu.memory_space<vmem>>, vector<32x1xf32>
      tpu.vector_store %arg8[%c0_26, %c0_27], %39 {strides = array<i32>} : memref<32x1xf32, #tpu.memory_space<vmem>>, vector<32x1xf32>,
    } else {
    }
    %c0 = arith.constant 0 : index
    %c0_1 = arith.constant 0 : index
    %3 = vector.load %arg2[%c0, %c0_1] : memref<32x128xf32, #tpu.memory_space<vmem>>, vector<32x128xf32>
    %c0_2 = arith.constant 0 : index
    %c0_3 = arith.constant 0 : index
    %4 = vector.load %arg3[%c0_2, %c0_3] : memref<128x128xf32, #tpu.memory_space<vmem>>, vector<128x128xf32>
    %cst = arith.constant dense<0.000000e+00> : vector<32x128xf32>
    %5 = tpu.matmul %3, %4, %cst {dimension_numbers = #tpu.dot_dimension_numbers<[1], [0], [0], [1], [0, 0, 1, 1], [], []>} : vector<32x128xf32>, vector<128x128xf32>, vector<32x128xf32> -> vector<32x128xf32>
    %c0_4 = arith.constant 0 : index
    %c0_5 = arith.constant 0 : index
    %6 = vector.load %arg4[%c0_4, %c0_5] : memref<1x128xf32, #tpu.memory_space<vmem>>, vector<1x128xf32>
    %7 = vector.broadcast %6 : vector<1x128xf32> to vector<32x128xf32>
    %8 = arith.addf %5, %7 : vector<32x128xf32>
    %c0_6 = arith.constant 0 : index
    %c0_7 = arith.constant 0 : index
    %9 = vector.load %arg5[%c0_6, %c0_7] : memref<32x128xf32, #tpu.memory_space<vmem>>, vector<32x128xf32>
    tpu.vector_store %arg5[%c0_6, %c0_7], %8 {strides = array<i32>} : memref<32x128xf32, #tpu.memory_space<vmem>>, vector<32x128xf32>,
    %c128_i32 = arith.constant 128 : i32
    %10 = arith.muli %arg1, %c128_i32 : i32
    %11 = tpu.iota {dimensions = array<i32: 1>} : vector<32x128xi32>
    %12 = vector.broadcast %10 : i32 to vector<32x128xi32>
    %13 = arith.addi %12, %11 : vector<32x128xi32>
    %c128_i32_8 = arith.constant 128 : i32
    %14 = vector.broadcast %c128_i32_8 : i32 to vector<32x128xi32>
    %15 = arith.cmpi slt, %13, %14 : vector<32x128xi32>
    %cst_9 = arith.constant -1.000000e+30 : f32
    %16 = vector.broadcast %cst_9 : f32 to vector<32x128xf32>
    %17 = arith.select %15, %8, %16 : vector<32x128xi1>, vector<32x128xf32>
    %c0_10 = arith.constant 0 : index
    %c0_11 = arith.constant 0 : index
    %18 = vector.load %arg7[%c0_10, %c0_11] : memref<32x1xf32, #tpu.memory_space<vmem>>, vector<32x1xf32>
    %cst_12 = arith.constant dense<0xFF800000> : vector<32xf32>
    %19 = vector.multi_reduction <maximumf>, %17, %cst_12 [1] : vector<32x128xf32> to vector<32xf32>
    %20 = vector.shape_cast %19 : vector<32xf32> to vector<32x1xf32>
    %21 = arith.maximumf %18, %20 : vector<32x1xf32>
    %22 = arith.subf %18, %21 : vector<32x1xf32>
    %23 = math.exp %22 : vector<32x1xf32>
    %c0_13 = arith.constant 0 : index
    %c0_14 = arith.constant 0 : index
    %24 = vector.load %arg8[%c0_13, %c0_14] : memref<32x1xf32, #tpu.memory_space<vmem>>, vector<32x1xf32>
    %25 = arith.mulf %23, %24 : vector<32x1xf32>
    %26 = vector.broadcast %21 : vector<32x1xf32> to vector<32x128xf32>
    %27 = arith.subf %17, %26 : vector<32x128xf32>
    %28 = math.exp %27 : vector<32x128xf32>
    %cst_15 = arith.constant dense<0.000000e+00> : vector<32xf32>
    %29 = vector.multi_reduction <add>, %28, %cst_15 [1] : vector<32x128xf32> to vector<32xf32>
    %30 = vector.shape_cast %29 : vector<32xf32> to vector<32x1xf32>
    %31 = arith.addf %25, %30 : vector<32x1xf32>
    %c0_16 = arith.constant 0 : index
    %c0_17 = arith.constant 0 : index
    %32 = vector.load %arg8[%c0_16, %c0_17] : memref<32x1xf32, #tpu.memory_space<vmem>>, vector<32x1xf32>
    tpu.vector_store %arg8[%c0_16, %c0_17], %31 {strides = array<i32>} : memref<32x1xf32, #tpu.memory_space<vmem>>, vector<32x1xf32>,
    %c0_18 = arith.constant 0 : index
    %c0_19 = arith.constant 0 : index
    %33 = vector.load %arg7[%c0_18, %c0_19] : memref<32x1xf32, #tpu.memory_space<vmem>>, vector<32x1xf32>
    tpu.vector_store %arg7[%c0_18, %c0_19], %21 {strides = array<i32>} : memref<32x1xf32, #tpu.memory_space<vmem>>, vector<32x1xf32>,
    %c0_i32_20 = arith.constant 0 : i32
    %34 = arith.cmpi eq, %arg1, %c0_i32_20 : i32
    %35 = arith.extui %34 : i1 to i32
    %c0_i32_21 = arith.constant 0 : i32
    %36 = arith.cmpi ne, %35, %c0_i32_21 : i32
    scf.if %36 {
      %c0_22 = arith.constant 0 : index
      %c0_23 = arith.constant 0 : index
      %37 = vector.load %arg7[%c0_22, %c0_23] : memref<32x1xf32, #tpu.memory_space<vmem>>, vector<32x1xf32>
      %c0_24 = arith.constant 0 : index
      %c0_25 = arith.constant 0 : index
      %38 = vector.load %arg8[%c0_24, %c0_25] : memref<32x1xf32, #tpu.memory_space<vmem>>, vector<32x1xf32>
      %39 = math.log %38 : vector<32x1xf32>
      %40 = arith.addf %37, %39 : vector<32x1xf32>
      %c0_26 = arith.constant 0 : index
      %c0_27 = arith.constant 0 : index
      %41 = vector.load %arg6[%c0_26, %c0_27] : memref<32x1xf32, #tpu.memory_space<vmem>>, vector<32x1xf32>
      tpu.vector_store %arg6[%c0_26, %c0_27], %40 {strides = array<i32>} : memref<32x1xf32, #tpu.memory_space<vmem>>, vector<32x1xf32>,
    } else {
    }
    return
  }
  func.func @transform_0(%arg0: i32, %arg1: i32) -> (i32, i32) {
    %c0_i32 = arith.constant 0 : i32
    %c0_i32_0 = arith.constant 0 : i32
    return %arg0, %c0_i32 : i32, i32
  }
  func.func @transform_1(%arg0: i32, %arg1: i32) -> (i32, i32) {
    %c0_i32 = arith.constant 0 : i32
    %c0_i32_0 = arith.constant 0 : i32
    return %c0_i32, %arg1 : i32, i32
  }
  func.func @transform_2(%arg0: i32, %arg1: i32) -> (i32, i32) {
    %c0_i32 = arith.constant 0 : i32
    %c0_i32_0 = arith.constant 0 : i32
    return %c0_i32, %arg1 : i32, i32
  }
  func.func @transform_3(%arg0: i32, %arg1: i32) -> (i32, i32) {
    %c0_i32 = arith.constant 0 : i32
    return %arg0, %arg1 : i32, i32
  }
  func.func @transform_4(%arg0: i32, %arg1: i32) -> (i32, i32) {
    %c0_i32 = arith.constant 0 : i32
    %c0_i32_0 = arith.constant 0 : i32
    return %arg0, %c0_i32 : i32, i32
  }
}

</mosaic_0001>

<bundles_post_ra>
// kernel: rnnmodel_forward.5
= control target key start
LH: loop header
LB: loop body
LE: loop exit
PB: predicated region body
PF: predicated region fallthrough
CT: control target
= control target key end

     0   :  { %v54_v0 = vmov 0   ;;  %s106_s1 = inlined_call_operand.vmem [shape: f32[32,1], index: 1, kind: input, shape index: {}]   ;;  %s107_s0 = inlined_call_operand.vmem [shape: f32[32,128], index: 0, kind: input, shape index: {}, may-alias: {0,2}]   ;;  %s108_s2 = inlined_call_operand.vmem [shape: f32[32,128], index: 2, kind: output, shape index: {}, may-alias: {0,2}]  }
   0x1   :  { %53 = vset.pattern.permute.xlu1 %v54_v0  ;;  %52 = vset.pattern.permute.xlu0 %v54_v0  ;;  %v17_v1 = vld [vmem:[%s106_s1 + $0x10] sm:$0xff]  ;;  %v15_v2 = vld [vmem:[%s106_s1] sm:$0xff]  ;;  %v18_v3 = vld [vmem:[%s106_s1 + $0x18] sm:$0xff] }
   0x2   :  { %31 = vperm.xlu1 %53, %v17_v1   ;;  %21 = vperm.xlu0 %52, %v15_v2   ;;  %v16_v4 = vld [vmem:[%s106_s1 + $0x8] sm:$0xff]  ;;  %v13_v5 = vld [vmem:[%s107_s0 + $0x10] sm:$0xff]  ;;  %v11_v6 = vld [vmem:[%s107_s0] sm:$0xff] }
   0x3   :  { %v14_v11 = vld [vmem:[%s107_s0 + $0x18] sm:$0xff]  ;;  %v12_v12 = vld [vmem:[%s107_s0 + $0x8] sm:$0xff] }
   0x6   :  { %36 = vperm.xlu1 %53, %v18_v3   ;;  %26 = vperm.xlu0 %52, %v16_v4  }
  0x81   :  { %v32_v7 = vpop.permute.xlu1 %31  ;;  %v22_v8 = vpop.permute.xlu0 %21 }
  0x82   :  { %v41_v9 = vsub.f32 %v13_v5, %v32_v7  ;;  %v39_v10 = vsub.f32 %v11_v6, %v22_v8 }
  0x84   :  { %45 = vst [vmem:[%s108_s2 + $0x10] sm:$0xff] %v41_v9  ;;  %43 = vst [vmem:[%s108_s2] sm:$0xff] %v39_v10 }
  0x85   :  { %v37_v13 = vpop.permute.xlu1 %36  ;;  %v27_v14 = vpop.permute.xlu0 %26 }
  0x86   :  { %v42_v15 = vsub.f32 %v14_v11, %v37_v13  ;;  %v40_v16 = vsub.f32 %v12_v12, %v27_v14 }
  0x88   :  { %46 = vst [vmem:[%s108_s2 + $0x18] sm:$0xff] %v42_v15  ;;  %44 = vst [vmem:[%s108_s2 + $0x8] sm:$0xff] %v40_v16 }

// kernel: rnnmodel_forward.4
= control target key start
LH: loop header
LB: loop body
LE: loop exit
PB: predicated region body
PF: predicated region fallthrough
CT: control target
= control target key end

     0   :  { %vm20_vm0 = vcmask 7168   ;;  %v415_v28 = vmov -1e+30   ;;  %v416_v38 = vmov 0   ;;  %v417_v39 = vmov 0.0   ;;  %s550_s1 = inlined_call_operand.vmem [shape: f32[128,128], index: 1, kind: input, shape index: {}]   ;;  %s551_s0 = inlined_call_operand.vmem [shape: f32[32,128], index: 0, kind: input, shape index: {}]   ;;  %s552_s2 = inlined_call_operand.vmem [shape: f32[1,128], index: 2, kind: input, shape index: {}]   ;;  %s553_s3 = inlined_call_operand.vmem [shape: f32[32,128], index: 3, kind: output, shape index: {0}]   ;;  %s554_s4 = inlined_call_operand.vmem [shape: f32[32,1], index: 4, kind: output, shape index: {1}]  }
   0x1   :  { %v33_v0 = vld [vmem:[%s550_s1] sm:$0xff]  ;;  %v34_v1 = vld [vmem:[%s550_s1 + $0x8] sm:$0xff]  ;;  %v35_v2 = vld [vmem:[%s550_s1 + $0x10] sm:$0xff]  ;;  %21 = vst.msk [vmem:[#allocation2] sm:$0xff] %vm20_vm0, %v415_v28  ;;  %389 = vset.pattern.permute.xlu0 %v416_v38  ;;  %390 = vset.pattern.permute.xlu1 %v416_v38 }
   0x2   :  { %v338_v3 = vpack.c.bf16 %v34_v1, %v33_v0  ;;  %v36_v4 = vld [vmem:[%s550_s1 + $0x18] sm:$0xff]  ;;  %v37_v6 = vld [vmem:[%s550_s1 + $0x20] sm:$0xff]  ;;  %v38_v7 = vld [vmem:[%s550_s1 + $0x28] sm:$0xff]  ;;  %22 = vst.msk [vmem:[#allocation2 + $0x8] sm:$0xff] %vm20_vm0, %v415_v28 }
   0x3   :  { %v342_v5 = vpack.c.bf16 %v36_v4, %v35_v2  ;;  %v346_v8 = vpack.c.bf16 %v38_v7, %v37_v6  ;;  %v29_v9 = vld [vmem:[%s551_s0] sm:$0xff]  ;;  %v39_v10 = vld [vmem:[%s550_s1 + $0x30] sm:$0xff]  ;;  %v40_v11 = vld [vmem:[%s550_s1 + $0x38] sm:$0xff]  ;;  %23 = vst.msk [vmem:[#allocation2 + $0x10] sm:$0xff] %vm20_vm0, %v415_v28 }
   0x4   :  { %339 = vmatprep.subr.bf16.mxu0 %v338_v3  ;;  %370 = vmatprep.subr.bf16.mxu1 %v338_v3  ;;  %v31_v12 = vld [vmem:[%s551_s0 + $0x10] sm:$0xff]  ;;  %v350_v13 = vpack.c.bf16 %v40_v11, %v39_v10  ;;  %v41_v14 = vld [vmem:[%s550_s1 + $0x40] sm:$0xff]  ;;  %v42_v15 = vld [vmem:[%s550_s1 + $0x48] sm:$0xff]  ;;  %24 = vst.msk [vmem:[#allocation2 + $0x18] sm:$0xff] %vm20_vm0, %v415_v28 }
   0x5   :  { %341 = vmatpush3.bf16.msra.mxu0 %v338_v3  ;;  %378 = vmatpush3.bf16.msra.mxu1 %v338_v3  ;;  %v354_v16 = vpack.c.bf16 %v42_v15, %v41_v14  ;;  %v43_v17 = vld [vmem:[%s550_s1 + $0x50] sm:$0xff]  ;;  %v44_v18 = vld [vmem:[%s550_s1 + $0x58] sm:$0xff]  ;;  %v45_v20 = vld [vmem:[%s550_s1 + $0x60] sm:$0xff]  ;;  %25 = vst.msk [vmem:[#allocation3] sm:$0xff] %vm20_vm0, %v417_v39 }
   0x6   :  { %343 = vmatprep.subr.bf16.mxu0 %v342_v5  ;;  %371 = vmatprep.subr.bf16.mxu1 %v342_v5  ;;  %v358_v19 = vpack.c.bf16 %v44_v18, %v43_v17  ;;  %v46_v21 = vld [vmem:[%s550_s1 + $0x68] sm:$0xff]  ;;  %v47_v23 = vld [vmem:[%s550_s1 + $0x70] sm:$0xff]  ;;  %v48_v24 = vld [vmem:[%s550_s1 + $0x78] sm:$0xff]  ;;  %26 = vst.msk [vmem:[#allocation3 + $0x8] sm:$0xff] %vm20_vm0, %v417_v39 }
   0x7   :  { %332 = vmatprep.mubr.f32.mxu0 %v29_v9  ;;  %335 = vmatprep.mubr.f32.mxu1 %v31_v12  ;;  %v362_v22 = vpack.c.bf16 %v46_v21, %v45_v20  ;;  %v366_v25 = vpack.c.bf16 %v48_v24, %v47_v23  ;;  %v30_v26 = vld [vmem:[%s551_s0 + $0x8] sm:$0xff]  ;;  %v32_v27 = vld [vmem:[%s551_s0 + $0x18] sm:$0xff]  ;;  %v279_v29 = vld [vmem:[%s552_s2] ss:$0 sm:$0xff]  ;;  %27 = vst.msk [vmem:[#allocation3 + $0x10] sm:$0xff] %vm20_vm0, %v417_v39 }
   0x8   :  { %28 = vst.msk [vmem:[#allocation3 + $0x18] sm:$0xff] %vm20_vm0, %v417_v39  ;;  %v155_v40 = vld [vmem:[#allocation2] sm:$0xff] }
   0x9   :  { %345 = vmatpush3.bf16.msra.mxu0 %v342_v5  ;;  %379 = vmatpush3.bf16.msra.mxu1 %v342_v5  ;;  %v156_v46 = vld [vmem:[#allocation2 + $0x8] sm:$0xff] }
   0xa   :  { %347 = vmatprep.subr.bf16.mxu0 %v346_v8  ;;  %372 = vmatprep.subr.bf16.mxu1 %v346_v8  ;;  %v157_v41 = vld [vmem:[#allocation2 + $0x10] sm:$0xff] }
   0xb   :  { %v158_v47 = vld [vmem:[#allocation2 + $0x18] sm:$0xff] }
   0xd   :  { %349 = vmatpush3.bf16.msra.mxu0 %v346_v8  ;;  %380 = vmatpush3.bf16.msra.mxu1 %v346_v8  ;;  %v184_v17 = vld [vmem:[#allocation3 + $0x8] sm:$0xff] }
   0xe   :  { %351 = vmatprep.subr.bf16.mxu0 %v350_v13  ;;  %373 = vmatprep.subr.bf16.mxu1 %v350_v13 }
  0x11   :  { %353 = vmatpush3.bf16.msra.mxu0 %v350_v13  ;;  %381 = vmatpush3.bf16.msra.mxu1 %v350_v13  ;;  %v183_v13 = vld [vmem:[#allocation3] sm:$0xff] }
  0x12   :  { %355 = vmatprep.subr.bf16.mxu0 %v354_v16  ;;  %374 = vmatprep.subr.bf16.mxu1 %v354_v16 }
  0x15   :  { %357 = vmatpush3.bf16.msra.mxu0 %v354_v16  ;;  %382 = vmatpush3.bf16.msra.mxu1 %v354_v16 }
  0x16   :  { %359 = vmatprep.subr.bf16.mxu0 %v358_v19  ;;  %375 = vmatprep.subr.bf16.mxu1 %v358_v19 }
  0x19   :  { %361 = vmatpush3.bf16.msra.mxu0 %v358_v19  ;;  %383 = vmatpush3.bf16.msra.mxu1 %v358_v19 }
  0x1a   :  { %363 = vmatprep.subr.bf16.mxu0 %v362_v22  ;;  %376 = vmatprep.subr.bf16.mxu1 %v362_v22 }
  0x1d   :  { %365 = vmatpush3.bf16.msra.mxu0 %v362_v22  ;;  %384 = vmatpush3.bf16.msra.mxu1 %v362_v22  ;;  %v185_v22 = vld [vmem:[#allocation3 + $0x10] sm:$0xff] }
  0x1e   :  { %367 = vmatprep.subr.bf16.mxu0 %v366_v25  ;;  %377 = vmatprep.subr.bf16.mxu1 %v366_v25 }
  0x21   :  { %369 = vmatpush3.bf16.msra.mxu0 %v366_v25  ;;  %385 = vmatpush3.bf16.msra.mxu1 %v366_v25 }
  0x24   :  { %333 = vmatmul.mubr.f32.vlgmr.msra.gmra.mrb[0].mxu0 %v30_v26  ;;  %336 = vmatmul.mubr.f32.vlgmr.msra.gmra.mrb[0].mxu1 %v32_v27  ;;  %v186_v27 = vld [vmem:[#allocation3 + $0x18] sm:$0xff] }
  0xf7   :  { %v334_v30 = vpop.f32.mrb[0].mxu0  ;;  %v337_v31 = vpop.f32.mrb[0].mxu1 }
  0xf8   :  { %v128_v32 = vadd.f32 %v334_v30, %v279_v29  ;;  %v122_v33 = vpop.f32.mrb[1].mxu0  ;;  %v138_v34 = vadd.f32 %v337_v31, %v279_v29  ;;  %v132_v35 = vpop.f32.mrb[1].mxu1 }
  0xf9   :  { %v123_v36 = vadd.f32 %v279_v29, %v122_v33  ;;  %v133_v37 = vadd.f32 %v279_v29, %v132_v35 }
  0xfa   :  { %142 = vst [vmem:[%s553_s3 + $0x8] sm:$0xff] %v128_v32  ;;  %144 = vst [vmem:[%s553_s3 + $0x18] sm:$0xff] %v138_v34 }
  0xfb   :  { %141 = vst [vmem:[%s553_s3] sm:$0xff] %v123_v36  ;;  %143 = vst [vmem:[%s553_s3 + $0x10] sm:$0xff] %v133_v37  ;;  %159 = vmax.xlane.f32.xlu0 %v123_v36  ;;  %163 = vmax.xlane.f32.xlu1 %v133_v37 }
  0xff   :  { %161 = vmax.xlane.f32.xlu0 %v128_v32  ;;  %165 = vmax.xlane.f32.xlu1 %v138_v34 }
 0x188   :  { %v160_v42 = vpop.xlane.xlu0 %159  ;;  %v164_v43 = vpop.xlane.xlu1 %163 }
 0x189   :  { %v167_v44 = vmax.f32 %v155_v40, %v160_v42  ;;  %v169_v45 = vmax.f32 %v157_v41, %v164_v43 }
 0x18b   :  { %v171_v48 = vsub.f32 %v155_v40, %v167_v44  ;;  %240 = vst.msk [vmem:[#allocation2] sm:$0xff] %vm20_vm0, %v167_v44  ;;  %v173_v49 = vsub.f32 %v157_v41, %v169_v45  ;;  %242 = vst.msk [vmem:[#allocation2 + $0x10] sm:$0xff] %vm20_vm0, %v169_v45  ;;  %193 = vperm.xlu0 %389, %v167_v44  }
 0x18c   :  { %v162_v50 = vpop.xlane.xlu0 %161  ;;  %v166_v51 = vpop.xlane.xlu1 %165 }
 0x18d   :  { %v168_v52 = vmax.f32 %v156_v46, %v162_v50  ;;  %v170_v53 = vmax.f32 %v158_v47, %v166_v51  ;;  %v175_v8 = vmul.f32 1.442695, %v171_v48  ;;  %v179_v10 = vmul.f32 1.442695, %v173_v49 }
 0x18f   :  { %v172_v54 = vsub.f32 %v156_v46, %v168_v52  ;;  %241 = vst.msk [vmem:[#allocation2 + $0x8] sm:$0xff] %vm20_vm0, %v168_v52  ;;  %v174_v55 = vsub.f32 %v158_v47, %v170_v53  ;;  %243 = vst.msk [vmem:[#allocation2 + $0x18] sm:$0xff] %vm20_vm0, %v170_v53  ;;  %198 = vperm.xlu1 %390, %v168_v52  }
 0x191   :  { %v177_v9 = vmul.f32 1.442695, %v172_v54  ;;  %v181_v11 = vmul.f32 1.442695, %v174_v55 }
 0x192   :  { %v247_v38 = vld [vmem:[#allocation2] sm:$0xff]  ;;  %v249_v46 = vld [vmem:[#allocation2 + $0x10] sm:$0xff] }
 0x193   :  { %203 = vperm.xlu1 %390, %v169_v45  }
 0x196   :  { %v248_v42 = vld [vmem:[#allocation2 + $0x8] sm:$0xff]  ;;  %v250_v50 = vld [vmem:[#allocation2 + $0x18] sm:$0xff] }
 0x197   :  { %208 = vperm.xlu1 %390, %v170_v53  }
 0x20a   :  { %v194_v56 = vpop.permute.xlu0 %193 }
 0x20b   :  { %v211_v57 = vsub.f32 %v123_v36, %v194_v56 }
 0x20d   :  { %v215_v58 = vmul.f32 1.442695, %v211_v57 }
 0x20e   :  { %v199_v59 = vpop.permute.xlu1 %198 }
 0x20f   :  { %391 = vpow2.f32 %v215_v58  ;;  %v212_v60 = vsub.f32 %v128_v32, %v199_v59 }
 0x211   :  { %v217_v61 = vmul.f32 1.442695, %v212_v60 }
 0x212   :  { %v204_v62 = vpop.permute.xlu1 %203 }
 0x213   :  { %393 = vpow2.f32 %v217_v61  ;;  %v213_v63 = vsub.f32 %v133_v37, %v204_v62 }
 0x215   :  { %v219_v0 = vmul.f32 1.442695, %v213_v63 }
 0x216   :  { %v209_v1 = vpop.permute.xlu1 %208 }
 0x217   :  { %395 = vpow2.f32 %v219_v0  ;;  %v214_v2 = vsub.f32 %v138_v34, %v209_v1 }
 0x219   :  { %v392_v3 = vpop.eup %391  ;;  %v221_v4 = vmul.f32 1.442695, %v214_v2 }
 0x21a   :  { %223 = vadd.xlane.f32.xlu1 %v392_v3 }
 0x21b   :  { %397 = vpow2.f32 %v221_v4 }
 0x21c   :  { %399 = vpow2.f32 %v175_v8 }
 0x21d   :  { %v394_v5 = vpop.eup %393  ;;  %401 = vpow2.f32 %v177_v9 }
 0x21e   :  { %225 = vadd.xlane.f32.xlu0 %v394_v5  ;;  %403 = vpow2.f32 %v179_v10 }
 0x21f   :  { %405 = vpow2.f32 %v181_v11 }
 0x221   :  { %v396_v6 = vpop.eup %395 }
 0x222   :  { %227 = vadd.xlane.f32.xlu1 %v396_v6 }
 0x225   :  { %v398_v7 = vpop.eup %397 }
 0x226   :  { %229 = vadd.xlane.f32.xlu1 %v398_v7  ;;  %v400_v12 = vpop.eup %399 }
 0x227   :  { %v187_v14 = vmul.f32 %v400_v12, %v183_v13  ;;  %v402_v15 = vpop.eup %401 }
 0x228   :  { %v188_v19 = vmul.f32 %v402_v15, %v184_v17  ;;  %v404_v20 = vpop.eup %403 }
 0x229   :  { %v189_v24 = vmul.f32 %v404_v20, %v185_v22  ;;  %v406_v25 = vpop.eup %405 }
 0x22a   :  { %v190_v30 = vmul.f32 %v406_v25, %v186_v27 }
 0x2a7   :  { %v224_v16 = vpop.xlane.xlu1 %223 }
 0x2a8   :  { %v231_v18 = vadd.f32 %v224_v16, %v187_v14 }
 0x2aa   :  { %236 = vst.msk [vmem:[#allocation3] sm:$0xff] %vm20_vm0, %v231_v18 }
 0x2ab   :  { %v226_v21 = vpop.xlane.xlu0 %225 }
 0x2ac   :  { %v232_v23 = vadd.f32 %v226_v21, %v188_v19 }
 0x2ae   :  { %237 = vst.msk [vmem:[#allocation3 + $0x8] sm:$0xff] %vm20_vm0, %v232_v23 }
 0x2af   :  { %v228_v26 = vpop.xlane.xlu1 %227 }
 0x2b0   :  { %v233_v28 = vadd.f32 %v228_v26, %v189_v24 }
 0x2b1   :  { %v251_v29 = vld [vmem:[#allocation3] sm:$0xff] }
 0x2b2   :  { %407 = vlog2.f32 %v251_v29  ;;  %238 = vst.msk [vmem:[#allocation3 + $0x10] sm:$0xff] %vm20_vm0, %v233_v28 }
 0x2b3   :  { %v230_v31 = vpop.xlane.xlu1 %229 }
 0x2b4   :  { %v234_v32 = vadd.f32 %v230_v31, %v190_v30 }
 0x2b5   :  { %v252_v33 = vld [vmem:[#allocation3 + $0x8] sm:$0xff] }
 0x2b6   :  { %409 = vlog2.f32 %v252_v33  ;;  %239 = vst.msk [vmem:[#allocation3 + $0x18] sm:$0xff] %vm20_vm0, %v234_v32 }
 0x2b9   :  { %v253_v34 = vld [vmem:[#allocation3 + $0x10] sm:$0xff] }
 0x2ba   :  { %411 = vlog2.f32 %v253_v34 }
 0x2bc   :  { %v408_v35 = vpop.eup %407 }
 0x2bd   :  { %v256_v36 = vmul.f32 0.6931472, %v408_v35  ;;  %v254_v37 = vld [vmem:[#allocation3 + $0x18] sm:$0xff] }
 0x2be   :  { %413 = vlog2.f32 %v254_v37 }
 0x2bf   :  { %v263_v39 = vadd.f32 %v256_v36, %v247_v38 }
 0x2c0   :  { %v410_v40 = vpop.eup %409 }
 0x2c1   :  { %267 = vst.msk [vmem:[%s554_s4] sm:$0xff] %vm20_vm0, %v263_v39  ;;  %v258_v41 = vmul.f32 0.6931472, %v410_v40 }
 0x2c3   :  { %v264_v43 = vadd.f32 %v258_v41, %v248_v42 }
 0x2c4   :  { %v412_v44 = vpop.eup %411 }
 0x2c5   :  { %268 = vst.msk [vmem:[%s554_s4 + $0x8] sm:$0xff] %vm20_vm0, %v264_v43  ;;  %v260_v45 = vmul.f32 0.6931472, %v412_v44 }
 0x2c7   :  { %v265_v47 = vadd.f32 %v260_v45, %v249_v46 }
 0x2c8   :  { %v414_v48 = vpop.eup %413 }
 0x2c9   :  { %269 = vst.msk [vmem:[%s554_s4 + $0x10] sm:$0xff] %vm20_vm0, %v265_v47  ;;  %v262_v49 = vmul.f32 0.6931472, %v414_v48 }
 0x2cb   :  { %v266_v51 = vadd.f32 %v262_v49, %v250_v50 }
 0x2cd   :  { %270 = vst.msk [vmem:[%s554_s4 + $0x18] sm:$0xff] %vm20_vm0, %v266_v51 }

// kernel: rnnmodel_forward.3
= control target key start
LH: loop header
LB: loop body
LE: loop exit
PB: predicated region body
PF: predicated region fallthrough
CT: control target
= control target key end

     0   :  { %15 = vsyncpa [#allocation6], 0  ;;  %s6581_s0 = inlined_call_operand.vmem [shape: f32[8,8,128], index: 0, kind: input, shape index: {}]   ;;  %s6582_s1 = inlined_call_operand.vmem [shape: f32[2,8,128], index: 1, kind: input, shape index: {}]   ;;  %s6583_s2 = inlined_call_operand.vmem [shape: f32[2,8,128], index: 2, kind: input, shape index: {}]   ;;  %s6584_s3 = inlined_call_operand.hbm [shape: f32[128,512], index: 3, kind: input, shape index: {}]   ;;  %s6585_s4 = inlined_call_operand.hbm [shape: f32[1,128,512], index: 4, kind: input, shape index: {}]   ;;  %s6586_s5 = inlined_call_operand.hbm [shape: f32[2,128,512], index: 5, kind: input, shape index: {}]   ;;  %s6587_s6 = inlined_call_operand.vmem [shape: f32[2,1,512], index: 6, kind: input, shape index: {}]   ;;  %s6588_s7 = inlined_call_operand.vmem [shape: f32[8,8,128], index: 7, kind: output, shape index: {0}]   ;;  %s6589_s8 = inlined_call_operand.vmem [shape: f32[2,8,128], index: 8, kind: output, shape index: {1}]   ;;  %s6590_s9 = inlined_call_operand.vmem [shape: f32[2,8,128], index: 9, kind: output, shape index: {2}]  }
   0x1   :  { %16 = vsyncpa [#allocation8], 0  ;;  %s5495_s30 = smov [#allocation7]   ;;  %s5496_s11 = smov [#allocation5]  }
   0x2   :  { %s40_s10 = sshll.u32 %s5495_s30, 4  ;;  %s28_s12 = sshll.u32 %s5496_s11, 4  ;;  %s41_s10 = int_to_ptr.vmem [resolvable:$true] %s40_s10  ;;  %s5551_s12 = int_to_ptr.vmem [resolvable:$true] %s28_s12 }
   0x3   :  { %s5425_s15 = scalar_lea.hbm %s6585_s4, 8192 }
   0x4   :  { %p5426_p0 = scmp.ne.s32.totalorder %s6585_s4, %s5425_s15  ;;  %p5429_p1 = scmp.lt.u32.totalorder %s5425_s15, %s6585_s4 }
   0x6   :  { %p5431_p2 = pnand %p5429_p1, %p5426_p0 }
   0x8   :  { %5434 = shalt.err (!%p5431_p2)
}
   0x9   :  { %s5435_s20 = scalar_lea.vmem %s41_s10, 8192  ;;  %p5440_p4 = scmp.lt.s32.totalorder %s41_s10, %s41_s10 }
   0xa   :  { %p5436_p3 = scmp.ne.s32.totalorder %s41_s10, %s5435_s20  ;;  %p5441_p5 = scmp.lt.s32.totalorder %s5435_s20, %s5435_s20 }
   0xc   :  { %p5442_p6 = por %p5441_p5, %p5440_p4 }
   0xe   :  { %p5443_p7 = pnand %p5442_p6, %p5436_p3 }
  0x10   :  { %5446 = shalt.err (!%p5443_p7)
}
  0x11   :  { %s5497_s21 = smov 512   ;;  %s5498_s22 = smov 32  }
  0x12   :  { %46 = dma.hbm_to_vmem [thread:$0]  %s6585_s4, 8192, %s41_s10, [#allocation8], %s5497_s21, %s5497_s21, %s5498_s22  }
  0x13   :  { %s5447_s27 = scalar_lea.hbm %s6584_s3, 8192 }
  0x14   :  { %p5448_p8 = scmp.ne.s32.totalorder %s6584_s3, %s5447_s27  ;;  %p5451_p9 = scmp.lt.u32.totalorder %s5447_s27, %s6584_s3 }
  0x16   :  { %p5453_p10 = pnand %p5451_p9, %p5448_p8 }
  0x18   :  { %5456 = shalt.err (!%p5453_p10)
}
  0x19   :  { %s5457_s13 = scalar_lea.vmem %s5551_s12, 8192  ;;  %p5462_p12 = scmp.lt.s32.totalorder %s5551_s12, %s5551_s12 }
  0x1a   :  { %p5458_p11 = scmp.ne.s32.totalorder %s5551_s12, %s5457_s13  ;;  %p5463_p13 = scmp.lt.s32.totalorder %s5457_s13, %s5457_s13 }
  0x1c   :  { %p5464_p0 = por %p5463_p13, %p5462_p12 }
  0x1e   :  { %p5465_p1 = pnand %p5464_p0, %p5458_p11 }
  0x20   :  { %5468 = shalt.err (!%p5465_p1)
}
  0x21   :  { %34 = dma.hbm_to_vmem [thread:$0]  %s6584_s3, 8192, %s5551_s12, [#allocation6], %s5497_s21, %s5497_s21, %s5498_s22  }
  0x22   :  { %s5499_s14 = smov [#allocation9]   ;;  %s5469_s18 = scalar_lea.hbm %s6586_s5, 16384 }
  0x23   :  { %s52_s15 = sshll.u32 %s5499_s14, 4  ;;  %p5470_p2 = scmp.ne.s32.totalorder %s6586_s5, %s5469_s18  ;;  %s53_s15 = int_to_ptr.vmem [resolvable:$true] %s52_s15 }
  0x24   :  { %p5473_p3 = scmp.lt.u32.totalorder %s5469_s18, %s6586_s5 }
  0x26   :  { %p5475_p4 = pnand %p5473_p3, %p5470_p2 }
  0x28   :  { %5478 = shalt.err (!%p5475_p4)
}
  0x29   :  { %s5479_s25 = scalar_lea.vmem %s53_s15, 16384  ;;  %p5484_p6 = scmp.lt.s32.totalorder %s53_s15, %s53_s15 }
  0x2a   :  { %p5480_p5 = scmp.ne.s32.totalorder %s53_s15, %s5479_s25  ;;  %p5485_p7 = scmp.lt.s32.totalorder %s5479_s25, %s5479_s25 }
  0x2c   :  { %p5486_p8 = por %p5485_p7, %p5484_p6 }
  0x2e   :  { %p5487_p9 = pnand %p5486_p8, %p5480_p5 }
  0x30   :  { %5490 = shalt.err (!%p5487_p9)
}
  0x31   :  { %58 = dma.hbm_to_vmem [thread:$0]  %s6586_s5, 16384, %s53_s15, [#allocation8], %s5497_s21, %s5497_s21, %s5498_s22  }
  0x32   :  { %5491 = dma.done.wait [#allocation6], 8192  }
  0x33   :  { %5492 = vsyncadd [#allocation6], 4294959104 }
  0x34   :  { %5493 = dma.done.wait [#allocation8], 24576  }
  0x35   :  { %5494 = vsyncadd [#allocation8], 4294942720  ;;  %v5500_v0 = vmov 0.0   ;;  %v79_v1 = vld [vmem:[#allocation5 + $0x8] sm:$0xff]  ;;  %v81_v3 = vld [vmem:[#allocation5 + $0x18] sm:$0xff] }
  0x36   :  { %228 = vmatprep.mubr.f32.mxu0 %v5500_v0  ;;  %341 = vmatprep.mubr.f32.mxu1 %v5500_v0  ;;  %v83_v2 = vld [vmem:[#allocation5 + $0x28] sm:$0xff]  ;;  %v85_v5 = vld [vmem:[#allocation5 + $0x38] sm:$0xff]  ;;  %v78_v6 = vld [vmem:[#allocation5] sm:$0xff] }
  0x37   :  { %v3883_v4 = vpack.c.bf16 %v83_v2, %v79_v1  ;;  %v82_v7 = vld [vmem:[#allocation5 + $0x20] sm:$0xff]  ;;  %v3915_v8 = vpack.c.bf16 %v85_v5, %v81_v3  ;;  %v80_v10 = vld [vmem:[#allocation5 + $0x10] sm:$0xff]  ;;  %v87_v12 = vld [vmem:[#allocation5 + $0x48] sm:$0xff] }
  0x38   :  { %v3885_v9 = vpack.c.bf16 %v82_v7, %v78_v6  ;;  %v84_v11 = vld [vmem:[#allocation5 + $0x30] sm:$0xff]  ;;  %v91_v14 = vld [vmem:[#allocation5 + $0x68] sm:$0xff]  ;;  %v89_v15 = vld [vmem:[#allocation5 + $0x58] sm:$0xff] }
  0x39   :  { %3884 = vmatprep.subr.bf16.mxu0 %v3883_v4  ;;  %v3917_v13 = vpack.c.bf16 %v84_v11, %v80_v10  ;;  %v93_v16 = vld [vmem:[#allocation5 + $0x78] sm:$0xff]  ;;  %3916 = vmatprep.subr.bf16.mxu1 %v3915_v8  ;;  %v3887_v17 = vpack.c.bf16 %v91_v14, %v87_v12  ;;  %v86_v19 = vld [vmem:[#allocation5 + $0x40] sm:$0xff]  ;;  %v88_v21 = vld [vmem:[#allocation5 + $0x50] sm:$0xff] }
  0x3a   :  { %3886 = vmatpush1.bf16.msra.mxu0 %v3885_v9  ;;  %v3919_v18 = vpack.c.bf16 %v93_v16, %v89_v15  ;;  %v90_v20 = vld [vmem:[#allocation5 + $0x60] sm:$0xff]  ;;  %v92_v23 = vld [vmem:[#allocation5 + $0x70] sm:$0xff]  ;;  %v95_v24 = vld [vmem:[#allocation5 + $0x88] sm:$0xff] }
  0x3b   :  { %3918 = vmatpush1.bf16.msra.mxu1 %v3917_v13  ;;  %v3889_v22 = vpack.c.bf16 %v90_v20, %v86_v19  ;;  %v99_v25 = vld [vmem:[#allocation5 + $0xa8] sm:$0xff]  ;;  %3888 = vmatprep.subr.bf16.mxu0 %v3887_v17  ;;  %v3921_v26 = vpack.c.bf16 %v92_v23, %v88_v21  ;;  %v97_v28 = vld [vmem:[#allocation5 + $0x98] sm:$0xff]  ;;  %v94_v30 = vld [vmem:[#allocation5 + $0x80] sm:$0xff] }
  0x3c   :  { %3920 = vmatprep.subr.bf16.mxu1 %v3919_v18  ;;  %v3891_v27 = vpack.c.bf16 %v99_v25, %v95_v24  ;;  %v101_v29 = vld [vmem:[#allocation5 + $0xb8] sm:$0xff]  ;;  %v98_v32 = vld [vmem:[#allocation5 + $0xa0] sm:$0xff]  ;;  %v96_v33 = vld [vmem:[#allocation5 + $0x90] sm:$0xff] }
  0x3d   :  { %v3923_v31 = vpack.c.bf16 %v101_v29, %v97_v28  ;;  %v100_v34 = vld [vmem:[#allocation5 + $0xb0] sm:$0xff]  ;;  %v3893_v35 = vpack.c.bf16 %v98_v32, %v94_v30  ;;  %v103_v36 = vld [vmem:[#allocation5 + $0xc8] sm:$0xff]  ;;  %v105_v38 = vld [vmem:[#allocation5 + $0xd8] sm:$0xff] }
  0x3e   :  { %3890 = vmatpush1.bf16.msra.mxu0 %v3889_v22  ;;  %v107_v37 = vld [vmem:[#allocation5 + $0xe8] sm:$0xff]  ;;  %v3925_v39 = vpack.c.bf16 %v100_v34, %v96_v33  ;;  %v109_v41 = vld [vmem:[#allocation5 + $0xf8] sm:$0xff]  ;;  %v102_v42 = vld [vmem:[#allocation5 + $0xc0] sm:$0xff] }
  0x3f   :  { %3922 = vmatpush1.bf16.msra.mxu1 %v3921_v26  ;;  %3892 = vmatprep.subr.bf16.mxu0 %v3891_v27  ;;  %v3895_v40 = vpack.c.bf16 %v107_v37, %v103_v36  ;;  %v106_v43 = vld [vmem:[#allocation5 + $0xe0] sm:$0xff]  ;;  %v3927_v44 = vpack.c.bf16 %v109_v41, %v105_v38  ;;  %v104_v45 = vld [vmem:[#allocation5 + $0xd0] sm:$0xff]  ;;  %v111_v47 = vld [vmem:[#allocation5 + $0x108] sm:$0xff] }
  0x40   :  { %3924 = vmatprep.subr.bf16.mxu1 %v3923_v31  ;;  %v108_v46 = vld [vmem:[#allocation5 + $0xf0] sm:$0xff]  ;;  %v115_v48 = vld [vmem:[#allocation5 + $0x128] sm:$0xff]  ;;  %v113_v49 = vld [vmem:[#allocation5 + $0x118] sm:$0xff]  ;;  %v3897_v51 = vpack.c.bf16 %v106_v43, %v102_v42 }
  0x41   :  { %v117_v50 = vld [vmem:[#allocation5 + $0x138] sm:$0xff]  ;;  %v3929_v52 = vpack.c.bf16 %v108_v46, %v104_v45  ;;  %v3899_v53 = vpack.c.bf16 %v115_v48, %v111_v47  ;;  %v110_v54 = vld [vmem:[#allocation5 + $0x100] sm:$0xff]  ;;  %v112_v56 = vld [vmem:[#allocation5 + $0x110] sm:$0xff] }
  0x42   :  { %3894 = vmatpush1.bf16.msra.mxu0 %v3893_v35  ;;  %v114_v55 = vld [vmem:[#allocation5 + $0x120] sm:$0xff]  ;;  %v3931_v57 = vpack.c.bf16 %v117_v50, %v113_v49  ;;  %v116_v58 = vld [vmem:[#allocation5 + $0x130] sm:$0xff]  ;;  %v119_v59 = vld [vmem:[#allocation5 + $0x148] sm:$0xff] }
  0x43   :  { %3926 = vmatpush1.bf16.msra.mxu1 %v3925_v39  ;;  %3896 = vmatprep.subr.bf16.mxu0 %v3895_v40  ;;  %v123_v60 = vld [vmem:[#allocation5 + $0x168] sm:$0xff]  ;;  %v121_v61 = vld [vmem:[#allocation5 + $0x158] sm:$0xff]  ;;  %v3901_v63 = vpack.c.bf16 %v114_v55, %v110_v54  ;;  %v3933_v1 = vpack.c.bf16 %v116_v58, %v112_v56  ;;  %v118_v3 = vld [vmem:[#allocation5 + $0x140] sm:$0xff] }
  0x44   :  { %3928 = vmatprep.subr.bf16.mxu1 %v3927_v44  ;;  %v125_v62 = vld [vmem:[#allocation5 + $0x178] sm:$0xff]  ;;  %v3903_v2 = vpack.c.bf16 %v123_v60, %v119_v59  ;;  %v122_v4 = vld [vmem:[#allocation5 + $0x160] sm:$0xff]  ;;  %v120_v5 = vld [vmem:[#allocation5 + $0x150] sm:$0xff] }
  0x45   :  { %v3935_v6 = vpack.c.bf16 %v125_v62, %v121_v61  ;;  %v124_v7 = vld [vmem:[#allocation5 + $0x170] sm:$0xff]  ;;  %v127_v8 = vld [vmem:[#allocation5 + $0x188] sm:$0xff]  ;;  %v129_v10 = vld [vmem:[#allocation5 + $0x198] sm:$0xff]  ;;  %v3905_v12 = vpack.c.bf16 %v122_v4, %v118_v3 }
  0x46   :  { %3898 = vmatpush1.bf16.msra.mxu0 %v3897_v51  ;;  %v131_v9 = vld [vmem:[#allocation5 + $0x1a8] sm:$0xff]  ;;  %v133_v11 = vld [vmem:[#allocation5 + $0x1b8] sm:$0xff]  ;;  %v3937_v13 = vpack.c.bf16 %v124_v7, %v120_v5  ;;  %v126_v15 = vld [vmem:[#allocation5 + $0x180] sm:$0xff] }
  0x47   :  { %3930 = vmatpush1.bf16.msra.mxu1 %v3929_v52  ;;  %3900 = vmatprep.subr.bf16.mxu0 %v3899_v53  ;;  %v3907_v14 = vpack.c.bf16 %v131_v9, %v127_v8  ;;  %v130_v16 = vld [vmem:[#allocation5 + $0x1a0] sm:$0xff]  ;;  %v128_v17 = vld [vmem:[#allocation5 + $0x190] sm:$0xff]  ;;  %v3939_v18 = vpack.c.bf16 %v133_v11, %v129_v10  ;;  %v135_v20 = vld [vmem:[#allocation5 + $0x1c8] sm:$0xff] }
  0x48   :  { %3932 = vmatprep.subr.bf16.mxu1 %v3931_v57  ;;  %v132_v19 = vld [vmem:[#allocation5 + $0x1b0] sm:$0xff]  ;;  %v139_v21 = vld [vmem:[#allocation5 + $0x1e8] sm:$0xff]  ;;  %v137_v22 = vld [vmem:[#allocation5 + $0x1d8] sm:$0xff]  ;;  %v3909_v24 = vpack.c.bf16 %v130_v16, %v126_v15 }
  0x49   :  { %v141_v23 = vld [vmem:[#allocation5 + $0x1f8] sm:$0xff]  ;;  %v3941_v25 = vpack.c.bf16 %v132_v19, %v128_v17  ;;  %v3911_v26 = vpack.c.bf16 %v139_v21, %v135_v20  ;;  %v134_v27 = vld [vmem:[#allocation5 + $0x1c0] sm:$0xff]  ;;  %v136_v29 = vld [vmem:[#allocation5 + $0x1d0] sm:$0xff] }
  0x4a   :  { %3902 = vmatpush1.bf16.msra.mxu0 %v3901_v63  ;;  %v138_v28 = vld [vmem:[#allocation5 + $0x1e0] sm:$0xff]  ;;  %v3943_v30 = vpack.c.bf16 %v141_v23, %v137_v22  ;;  %v140_v31 = vld [vmem:[#allocation5 + $0x1f0] sm:$0xff]  ;;  %v423_v32 = vld [vmem:[#allocation9 + $0x8] sm:$0xff] }
  0x4b   :  { %3934 = vmatpush1.bf16.msra.mxu1 %v3933_v1  ;;  %3904 = vmatprep.subr.bf16.mxu0 %v3903_v2  ;;  %v427_v33 = vld [vmem:[#allocation9 + $0x28] sm:$0xff]  ;;  %v425_v34 = vld [vmem:[#allocation9 + $0x18] sm:$0xff]  ;;  %v3913_v36 = vpack.c.bf16 %v138_v28, %v134_v27  ;;  %v3945_v37 = vpack.c.bf16 %v140_v31, %v136_v29  ;;  %v422_v39 = vld [vmem:[#allocation9] sm:$0xff] }
  0x4c   :  { %3936 = vmatprep.subr.bf16.mxu1 %v3935_v6  ;;  %v429_v35 = vld [vmem:[#allocation9 + $0x38] sm:$0xff]  ;;  %v5605_v38 = vpack.c.bf16 %v427_v33, %v423_v32  ;;  %v426_v40 = vld [vmem:[#allocation9 + $0x20] sm:$0xff]  ;;  %v424_v42 = vld [vmem:[#allocation9 + $0x10] sm:$0xff] }
  0x4d   :  { %v5607_v41 = vpack.c.bf16 %v429_v35, %v425_v34  ;;  %v428_v43 = vld [vmem:[#allocation9 + $0x30] sm:$0xff]  ;;  %v431_v44 = vld [vmem:[#allocation9 + $0x48] sm:$0xff]  ;;  %v70_v46 = vld [vmem:[%s6581_s0] sm:$0xff]  ;;  %v5612_v47 = vpack.c.bf16 %v426_v40, %v422_v39 }
  0x4e   :  { %3906 = vmatpush1.bf16.msra.mxu0 %v3905_v12  ;;  %v435_v45 = vld [vmem:[#allocation9 + $0x68] sm:$0xff]  ;;  %v433_v48 = vld [vmem:[#allocation9 + $0x58] sm:$0xff]  ;;  %v5615_v50 = vpack.c.bf16 %v428_v43, %v424_v42  ;;  %v430_v51 = vld [vmem:[#allocation9 + $0x40] sm:$0xff] }
  0x4f   :  { %3938 = vmatpush1.bf16.msra.mxu1 %v3937_v13  ;;  %3908 = vmatprep.subr.bf16.mxu0 %v3907_v14  ;;  %v437_v49 = vld [vmem:[#allocation9 + $0x78] sm:$0xff]  ;;  %v434_v52 = vld [vmem:[#allocation9 + $0x60] sm:$0xff]  ;;  %v5618_v53 = vpack.c.bf16 %v435_v45, %v431_v44  ;;  %v432_v54 = vld [vmem:[#allocation9 + $0x50] sm:$0xff] }
  0x50   :  { %3940 = vmatprep.subr.bf16.mxu1 %v3939_v18  ;;  %v436_v55 = vld [vmem:[#allocation9 + $0x70] sm:$0xff]  ;;  %v5620_v56 = vpack.c.bf16 %v437_v49, %v433_v48  ;;  %v439_v57 = vld [vmem:[#allocation9 + $0x88] sm:$0xff]  ;;  %v5626_v60 = vpack.c.bf16 %v434_v52, %v430_v51  ;;  %v441_v61 = vld [vmem:[#allocation9 + $0x98] sm:$0xff] }
  0x51   :  { %v443_v58 = vld [vmem:[#allocation9 + $0xa8] sm:$0xff]  ;;  %v445_v62 = vld [vmem:[#allocation9 + $0xb8] sm:$0xff]  ;;  %v5630_v63 = vpack.c.bf16 %v436_v55, %v432_v54  ;;  %v438_v1 = vld [vmem:[#allocation9 + $0x80] sm:$0xff] }
  0x52   :  { %3910 = vmatpush1.bf16.msra.mxu0 %v3909_v24  ;;  %v71_v59 = vld [vmem:[%s6581_s0 + $0x8] sm:$0xff]  ;;  %v442_v2 = vld [vmem:[#allocation9 + $0xa0] sm:$0xff]  ;;  %v5634_v3 = vpack.c.bf16 %v443_v58, %v439_v57  ;;  %v440_v4 = vld [vmem:[#allocation9 + $0x90] sm:$0xff]  ;;  %v5637_v6 = vpack.c.bf16 %v445_v62, %v441_v61 }
  0x53   :  { %3942 = vmatpush1.bf16.msra.mxu1 %v3941_v25  ;;  %3912 = vmatprep.subr.bf16.mxu0 %v3911_v26  ;;  %v444_v5 = vld [vmem:[#allocation9 + $0xb0] sm:$0xff]  ;;  %v447_v7 = vld [vmem:[#allocation9 + $0xc8] sm:$0xff]  ;;  %v5643_v10 = vpack.c.bf16 %v442_v2, %v438_v1  ;;  %v449_v11 = vld [vmem:[#allocation9 + $0xd8] sm:$0xff] }
  0x54   :  { %3944 = vmatprep.subr.bf16.mxu1 %v3943_v30  ;;  %v451_v8 = vld [vmem:[#allocation9 + $0xe8] sm:$0xff]  ;;  %v72_v9 = vld [vmem:[%s6581_s0 + $0x10] sm:$0xff]  ;;  %v453_v12 = vld [vmem:[#allocation9 + $0xf8] sm:$0xff]  ;;  %v5647_v13 = vpack.c.bf16 %v444_v5, %v440_v4 }
  0x55   :  { %v446_v14 = vld [vmem:[#allocation9 + $0xc0] sm:$0xff]  ;;  %v5651_v16 = vpack.c.bf16 %v451_v8, %v447_v7  ;;  %v448_v17 = vld [vmem:[#allocation9 + $0xd0] sm:$0xff]  ;;  %v5654_v19 = vpack.c.bf16 %v453_v12, %v449_v11  ;;  %v455_v20 = vld [vmem:[#allocation9 + $0x108] sm:$0xff] }
  0x56   :  { %3914 = vmatpush1.bf16.msra.mxu0 %v3913_v36  ;;  %v450_v15 = vld [vmem:[#allocation9 + $0xe0] sm:$0xff]  ;;  %v452_v18 = vld [vmem:[#allocation9 + $0xf0] sm:$0xff]  ;;  %v459_v21 = vld [vmem:[#allocation9 + $0x128] sm:$0xff] }
  0x57   :  { %3946 = vmatpush1.bf16.msra.mxu1 %v3945_v37  ;;  %3948 = vmatprep.subr.bf16.mxu0 %v5605_v38  ;;  %v73_v22 = vld [vmem:[%s6581_s0 + $0x18] sm:$0xff]  ;;  %v5660_v23 = vpack.c.bf16 %v450_v15, %v446_v14  ;;  %v5664_v26 = vpack.c.bf16 %v452_v18, %v448_v17  ;;  %v454_v27 = vld [vmem:[#allocation9 + $0x100] sm:$0xff]  ;;  %v5668_v29 = vpack.c.bf16 %v459_v21, %v455_v20  ;;  %v456_v30 = vld [vmem:[#allocation9 + $0x110] sm:$0xff] }
  0x58   :  { %3980 = vmatprep.subr.bf16.mxu1 %v5607_v41  ;;  %v457_v24 = vld [vmem:[#allocation9 + $0x118] sm:$0xff]  ;;  %v458_v28 = vld [vmem:[#allocation9 + $0x120] sm:$0xff]  ;;  %v460_v31 = vld [vmem:[#allocation9 + $0x130] sm:$0xff] }
  0x59   :  { %229 = vmatmul.mubr.f32.vlgmr.msra.gmra.mrb[0].mxu0 %v70_v46  ;;  %v461_v25 = vld [vmem:[#allocation9 + $0x138] sm:$0xff]  ;;  %v463_v33 = vld [vmem:[#allocation9 + $0x148] sm:$0xff]  ;;  %v74_v35 = vld [vmem:[%s6581_s0 + $0x20] sm:$0xff]  ;;  %v5677_v36 = vpack.c.bf16 %v458_v28, %v454_v27  ;;  %v5681_v40 = vpack.c.bf16 %v460_v31, %v456_v30  ;;  %v144_v30 = vlaneseq }
  0x5a   :  { %342 = vmatmul.mubr.f32.vlgmr.msra.gmra.mrb[0].mxu1 %v70_v46  ;;  %3950 = vmatpush1.bf16.msra.mxu0 %v5612_v47  ;;  %v5671_v32 = vpack.c.bf16 %v461_v25, %v457_v24  ;;  %v467_v34 = vld [vmem:[#allocation9 + $0x168] sm:$0xff]  ;;  %v465_v37 = vld [vmem:[#allocation9 + $0x158] sm:$0xff]  ;;  %v462_v42 = vld [vmem:[#allocation9 + $0x140] sm:$0xff] }
  0x5b   :  { %3982 = vmatpush1.bf16.msra.mxu1 %v5615_v50  ;;  %234 = vmatprep.mubr.f32.mxu0 %v5500_v0  ;;  %v469_v39 = vld [vmem:[#allocation9 + $0x178] sm:$0xff]  ;;  %v466_v43 = vld [vmem:[#allocation9 + $0x160] sm:$0xff]  ;;  %v5685_v44 = vpack.c.bf16 %v467_v34, %v463_v33  ;;  %v464_v45 = vld [vmem:[#allocation9 + $0x150] sm:$0xff]  ;;  %v5780_v31 = vshrl.u32 %v144_v30, 7 }
  0x5c   :  { %347 = vmatprep.mubr.f32.mxu1 %v5500_v0  ;;  %3952 = vmatprep.subr.bf16.mxu0 %v5618_v53  ;;  %v468_v46 = vld [vmem:[#allocation9 + $0x170] sm:$0xff]  ;;  %v5688_v48 = vpack.c.bf16 %v469_v39, %v465_v37  ;;  %v471_v49 = vld [vmem:[#allocation9 + $0x188] sm:$0xff]  ;;  %v5694_v54 = vpack.c.bf16 %v466_v43, %v462_v42  ;;  %v473_v55 = vld [vmem:[#allocation9 + $0x198] sm:$0xff] }
  0x5d   :  { %235 = vmatmul.mubr.f32.gmra.mrb[2].mxu0 %v71_v59  ;;  %3984 = vmatprep.subr.bf16.mxu1 %v5620_v56  ;;  %v475_v51 = vld [vmem:[#allocation9 + $0x1a8] sm:$0xff]  ;;  %v477_v57 = vld [vmem:[#allocation9 + $0x1b8] sm:$0xff]  ;;  %v5698_v58 = vpack.c.bf16 %v468_v46, %v464_v45  ;;  %v474_v61 = vld [vmem:[#allocation9 + $0x1a0] sm:$0xff]  ;;  %v146_v33 = vsub.s32 0, %v5780_v31  ;;  %v158_v43 = vsub.s32 3, %v5780_v31 }
  0x5e   :  { %348 = vmatmul.mubr.f32.gmra.mrb[2].mxu1 %v71_v59  ;;  %3954 = vmatpush1.bf16.msra.mxu0 %v5626_v60  ;;  %v75_v52 = vld [vmem:[%s6581_s0 + $0x28] sm:$0xff]  ;;  %v470_v59 = vld [vmem:[#allocation9 + $0x180] sm:$0xff]  ;;  %v5702_v62 = vpack.c.bf16 %v475_v51, %v471_v49  ;;  %v472_v1 = vld [vmem:[#allocation9 + $0x190] sm:$0xff]  ;;  %v5705_v4 = vpack.c.bf16 %v477_v57, %v473_v55 }
  0x5f   :  { %3986 = vmatpush1.bf16.msra.mxu1 %v5630_v63  ;;  %240 = vmatprep.mubr.f32.mxu0 %v5500_v0  ;;  %v476_v2 = vld [vmem:[#allocation9 + $0x1b0] sm:$0xff]  ;;  %v479_v5 = vld [vmem:[#allocation9 + $0x1c8] sm:$0xff]  ;;  %v481_v11 = vld [vmem:[#allocation9 + $0x1d8] sm:$0xff] }
  0x60   :  { %353 = vmatprep.mubr.f32.mxu1 %v5500_v0  ;;  %3956 = vmatprep.subr.bf16.mxu0 %v5634_v3  ;;  %v483_v7 = vld [vmem:[#allocation9 + $0x1e8] sm:$0xff]  ;;  %v76_v8 = vld [vmem:[%s6581_s0 + $0x30] sm:$0xff]  ;;  %v485_v12 = vld [vmem:[#allocation9 + $0x1f8] sm:$0xff]  ;;  %v5715_v14 = vpack.c.bf16 %v476_v2, %v472_v1 }
  0x61   :  { %241 = vmatmul.mubr.f32.gmra.mrb[4].mxu0 %v72_v9  ;;  %3988 = vmatprep.subr.bf16.mxu1 %v5637_v6  ;;  %v478_v15 = vld [vmem:[#allocation9 + $0x1c0] sm:$0xff]  ;;  %v5719_v18 = vpack.c.bf16 %v483_v7, %v479_v5  ;;  %v480_v20 = vld [vmem:[#allocation9 + $0x1d0] sm:$0xff]  ;;  %v77_v24 = vld [vmem:[%s6581_s0 + $0x38] sm:$0xff] }
  0x62   :  { %354 = vmatmul.mubr.f32.gmra.mrb[4].mxu1 %v72_v9  ;;  %3958 = vmatpush1.bf16.msra.mxu0 %v5643_v10  ;;  %v5711_v9 = vpack.c.bf16 %v474_v61, %v470_v59  ;;  %v482_v17 = vld [vmem:[#allocation9 + $0x1e0] sm:$0xff]  ;;  %v484_v21 = vld [vmem:[#allocation9 + $0x1f0] sm:$0xff]  ;;  %v154_v61 = vsub.s32 2, %v5780_v31 }
  0x63   :  { %3990 = vmatpush1.bf16.msra.mxu1 %v5647_v13  ;;  %246 = vmatprep.mubr.f32.mxu0 %v5500_v0  ;;  %v5728_v25 = vpack.c.bf16 %v482_v17, %v478_v15  ;;  %v5732_v27 = vpack.c.bf16 %v484_v21, %v480_v20  ;;  %v486_v28 = vld [vmem:[%s6582_s1] sm:$0xff] }
  0x64   :  { %359 = vmatprep.mubr.f32.mxu1 %v5500_v0  ;;  %3960 = vmatprep.subr.bf16.mxu0 %v5651_v16  ;;  %v142_v34 = vld [vmem:[%s6587_s6] sm:$0xf] }
  0x65   :  { %247 = vmatmul.mubr.f32.gmra.mrb[6].mxu0 %v73_v22  ;;  %3992 = vmatprep.subr.bf16.mxu1 %v5654_v19  ;;  %v5789_v37 = vrot.slane %v142_v34, %v146_v33  ;;  %v5800_v59 = vrot.slane %v142_v34, %v158_v43  ;;  %v5806_v2 = vrot.slane %v142_v34, %v154_v61  ;;  %v488_v21 = vld [vmem:[%s6583_s2] sm:$0xff] }
  0x66   :  { %360 = vmatmul.mubr.f32.gmra.mrb[6].mxu1 %v73_v22  ;;  %3962 = vmatpush1.bf16.msra.mxu0 %v5660_v23  ;;  %v5722_v22 = vpack.c.bf16 %v485_v12, %v481_v11 }
  0x67   :  { %3994 = vmatpush1.bf16.msra.mxu1 %v5664_v26  ;;  %252 = vmatprep.mubr.f32.mxu0 %v5500_v0 }
  0x68   :  { %365 = vmatprep.mubr.f32.mxu1 %v5500_v0  ;;  %3964 = vmatprep.subr.bf16.mxu0 %v5668_v29 }
  0x69   :  { %253 = vmatmul.mubr.f32.gmra.mrb[8].mxu0 %v74_v35  ;;  %3996 = vmatprep.subr.bf16.mxu1 %v5671_v32 }
  0x6a   :  { %366 = vmatmul.mubr.f32.gmra.mrb[8].mxu1 %v74_v35  ;;  %3966 = vmatpush1.bf16.msra.mxu0 %v5677_v36  ;;  %v150_v35 = vsub.s32 1, %v5780_v31 }
  0x6b   :  { %3998 = vmatpush1.bf16.msra.mxu1 %v5681_v40  ;;  %258 = vmatprep.mubr.f32.mxu0 %v5500_v0 }
  0x6c   :  { %371 = vmatprep.mubr.f32.mxu1 %v5500_v0  ;;  %3968 = vmatprep.subr.bf16.mxu0 %v5685_v44  ;;  %v5793_v39 = vrot.slane %v142_v34, %v150_v35 }
  0x6d   :  { %259 = vmatmul.mubr.f32.gmra.mrb[10].mxu0 %v75_v52  ;;  %4000 = vmatprep.subr.bf16.mxu1 %v5688_v48 }
  0x6e   :  { %372 = vmatmul.mubr.f32.gmra.mrb[10].mxu1 %v75_v52  ;;  %3970 = vmatpush1.bf16.msra.mxu0 %v5694_v54 }
  0x6f   :  { %4002 = vmatpush1.bf16.msra.mxu1 %v5698_v58  ;;  %264 = vmatprep.mubr.f32.mxu0 %v5500_v0 }
  0x70   :  { %377 = vmatprep.mubr.f32.mxu1 %v5500_v0  ;;  %3972 = vmatprep.subr.bf16.mxu0 %v5702_v62 }
  0x71   :  { %265 = vmatmul.mubr.f32.gmra.mrb[12].mxu0 %v76_v8  ;;  %4004 = vmatprep.subr.bf16.mxu1 %v5705_v4 }
  0x72   :  { %378 = vmatmul.mubr.f32.gmra.mrb[12].mxu1 %v76_v8  ;;  %3974 = vmatpush1.bf16.msra.mxu0 %v5711_v9 }
  0x73   :  { %4006 = vmatpush1.bf16.msra.mxu1 %v5715_v14  ;;  %270 = vmatprep.mubr.f32.mxu0 %v5500_v0 }
  0x74   :  { %383 = vmatprep.mubr.f32.mxu1 %v5500_v0  ;;  %3976 = vmatprep.subr.bf16.mxu0 %v5719_v18 }
  0x75   :  { %271 = vmatmul.mubr.f32.gmra.mrb[14].mxu0 %v77_v24  ;;  %4008 = vmatprep.subr.bf16.mxu1 %v5722_v22 }
  0x76   :  { %384 = vmatmul.mubr.f32.gmra.mrb[14].mxu1 %v77_v24  ;;  %3978 = vmatpush1.bf16.msra.mxu0 %v5728_v25 }
  0x77   :  { %4010 = vmatpush1.bf16.msra.mxu1 %v5732_v27  ;;  %559 = vmatprep.mubr.f32.mxu0 %v5500_v0 }
  0x78   :  { %630 = vmatprep.mubr.f32.mxu1 %v5500_v0  ;;  %4012 = vmatprep.subr.bf16.mxu0 %v5605_v38 }
  0x79   :  { %560 = vmatmul.mubr.f32.vlgmr.msra.gmra.mrb[0].mxu0 %v486_v28  ;;  %4044 = vmatprep.subr.bf16.mxu1 %v5607_v41 }
  0x7a   :  { %631 = vmatmul.mubr.f32.vlgmr.msra.gmra.mrb[0].mxu1 %v486_v28  ;;  %4014 = vmatpush1.bf16.msra.mxu0 %v5612_v47 }
  0x7b   :  { %4046 = vmatpush1.bf16.msra.mxu1 %v5615_v50  ;;  %4016 = vmatprep.subr.bf16.mxu0 %v5618_v53 }
  0x7c   :  { %4048 = vmatprep.subr.bf16.mxu1 %v5620_v56  ;;  %739 = vmatprep.mubr.f32.mxu0 %v5500_v0 }
  0x7d   :  { %810 = vmatprep.mubr.f32.mxu1 %v5500_v0 }
  0x7e   :  { %4018 = vmatpush1.bf16.msra.mxu0 %v5626_v60 }
  0x7f   :  { %4050 = vmatpush1.bf16.msra.mxu1 %v5630_v63  ;;  %4020 = vmatprep.subr.bf16.mxu0 %v5634_v3 }
  0x80   :  { %4052 = vmatprep.subr.bf16.mxu1 %v5637_v6 }
  0x82   :  { %4022 = vmatpush1.bf16.msra.mxu0 %v5643_v10 }
  0x83   :  { %4054 = vmatpush1.bf16.msra.mxu1 %v5647_v13  ;;  %4024 = vmatprep.subr.bf16.mxu0 %v5651_v16 }
  0x84   :  { %4056 = vmatprep.subr.bf16.mxu1 %v5654_v19 }
  0x86   :  { %4026 = vmatpush1.bf16.msra.mxu0 %v5660_v23 }
  0x87   :  { %4058 = vmatpush1.bf16.msra.mxu1 %v5664_v26  ;;  %4028 = vmatprep.subr.bf16.mxu0 %v5668_v29 }
  0x88   :  { %4060 = vmatprep.subr.bf16.mxu1 %v5671_v32 }
  0x8a   :  { %4030 = vmatpush1.bf16.msra.mxu0 %v5677_v36 }
  0x8b   :  { %4062 = vmatpush1.bf16.msra.mxu1 %v5681_v40  ;;  %4032 = vmatprep.subr.bf16.mxu0 %v5685_v44 }
  0x8c   :  { %4064 = vmatprep.subr.bf16.mxu1 %v5688_v48 }
  0x8e   :  { %4034 = vmatpush1.bf16.msra.mxu0 %v5694_v54 }
  0x8f   :  { %4066 = vmatpush1.bf16.msra.mxu1 %v5698_v58  ;;  %4036 = vmatprep.subr.bf16.mxu0 %v5702_v62 }
  0x90   :  { %4068 = vmatprep.subr.bf16.mxu1 %v5705_v4 }
  0x92   :  { %4038 = vmatpush1.bf16.msra.mxu0 %v5711_v9 }
  0x93   :  { %4070 = vmatpush1.bf16.msra.mxu1 %v5715_v14  ;;  %4040 = vmatprep.subr.bf16.mxu0 %v5719_v18 }
  0x94   :  { %4072 = vmatprep.subr.bf16.mxu1 %v5722_v22 }
  0x96   :  { %4042 = vmatpush1.bf16.msra.mxu0 %v5728_v25 }
  0x97   :  { %4074 = vmatpush1.bf16.msra.mxu1 %v5732_v27  ;;  %4076 = vmatprep.subr.bf16.mxu0 %v5605_v38 }
  0x98   :  { %4108 = vmatprep.subr.bf16.mxu1 %v5607_v41 }
 0x14c   :  { %v561_v42 = vpop.f32.mrb[0].mxu0 }
 0x14d   :  { %v5035_v45 = vadd.f32 %v561_v42, %v5789_v37  ;;  %v632_v46 = vpop.f32.mrb[0].mxu1  ;;  %v563_v49 = vpop.f32.mrb[1].mxu0 }
 0x14e   :  { %v5036_v51 = vadd.f32 %v563_v49, %v5793_v39  ;;  %v634_v52 = vpop.f32.mrb[1].mxu1  ;;  %v5051_v7 = vadd.f32 %v632_v46, %v5806_v2 }
 0x14f   :  { %v3816_v55 = vmul.f32 -1.442695, %v5035_v45  ;;  %v5052_v1 = vadd.f32 %v634_v52, %v5800_v59 }
 0x150   :  { %v3817_v57 = vmul.f32 -1.442695, %v5036_v51 }
 0x151   :  { %5169 = vpow2.f32 %v3816_v55  ;;  %v3818_v5 = vmul.f32 -1.442695, %v5052_v1 }
 0x152   :  { %5171 = vpow2.f32 %v3817_v57 }
 0x153   :  { %5173 = vpow2.f32 %v3818_v5 }
 0x154   :  { %5175 = vtanh.f32 %v5051_v7 }
 0x15b   :  { %v5170_v8 = vpop.eup %5169 }
 0x15c   :  { %v5172_v11 = vpop.eup %5171  ;;  %v644_v12 = vadd.f32 1.0, %v5170_v8 }
 0x15d   :  { %v650_v15 = vadd.f32 1.0, %v5172_v11  ;;  %v5174_v17 = vpop.eup %5173 }
 0x15e   :  { %5177 = vrcp.f32 %v644_v12  ;;  %v5176_v20 = vpop.eup %5175  ;;  %v657_v34 = vadd.f32 1.0, %v5174_v17 }
 0x15f   :  { %5179 = vrcp.f32 %v650_v15 }
 0x160   :  { %5181 = vrcp.f32 %v657_v34 }
 0x168   :  { %v5178_v24 = vpop.eup %5177 }
 0x169   :  { %v5180_v28 = vpop.eup %5179  ;;  %v662_v30 = vmul.f32 %v5178_v24, %v5176_v20 }
 0x16a   :  { %v661_v42 = vmul.f32 %v5180_v28, %v488_v21  ;;  %v5182_v46 = vpop.eup %5181 }
 0x16c   :  { %v5812_v45 = vadd.f32 %v662_v30, %v661_v42 }
 0x16e   :  { %5183 = vtanh.f32 %v5812_v45 }
 0x178   :  { %v5184_v49 = vpop.eup %5183 }
 0x179   :  { %v5815_v51 = vmul.f32 %v5184_v49, %v5182_v46 }
 0x17b   :  { %740 = vmatmul.mubr.f32.vlgmr.msra.gmra.mrb[2].mxu0 %v5815_v51  ;;  %811 = vmatmul.mubr.f32.vlgmr.msra.gmra.mrb[2].mxu1 %v5815_v51 }
 0x17c   :  { %4078 = vmatpush1.bf16.msra.mxu0 %v5612_v47  ;;  %4110 = vmatpush1.bf16.msra.mxu1 %v5615_v50 }
 0x17d   :  { %4080 = vmatprep.subr.bf16.mxu0 %v5618_v53  ;;  %4112 = vmatprep.subr.bf16.mxu1 %v5620_v56 }
 0x17e   :  { %920 = vmatprep.mubr.f32.mxu0 %v5500_v0  ;;  %991 = vmatprep.mubr.f32.mxu1 %v5500_v0 }
 0x180   :  { %4082 = vmatpush1.bf16.msra.mxu0 %v5626_v60  ;;  %4114 = vmatpush1.bf16.msra.mxu1 %v5630_v63 }
 0x181   :  { %4084 = vmatprep.subr.bf16.mxu0 %v5634_v3  ;;  %4116 = vmatprep.subr.bf16.mxu1 %v5637_v6 }
 0x184   :  { %4086 = vmatpush1.bf16.msra.mxu0 %v5643_v10  ;;  %4118 = vmatpush1.bf16.msra.mxu1 %v5647_v13 }
 0x185   :  { %4088 = vmatprep.subr.bf16.mxu0 %v5651_v16  ;;  %4120 = vmatprep.subr.bf16.mxu1 %v5654_v19 }
 0x188   :  { %4090 = vmatpush1.bf16.msra.mxu0 %v5660_v23  ;;  %4122 = vmatpush1.bf16.msra.mxu1 %v5664_v26 }
 0x189   :  { %4092 = vmatprep.subr.bf16.mxu0 %v5668_v29  ;;  %4124 = vmatprep.subr.bf16.mxu1 %v5671_v32 }
 0x18c   :  { %4094 = vmatpush1.bf16.msra.mxu0 %v5677_v36  ;;  %4126 = vmatpush1.bf16.msra.mxu1 %v5681_v40 }
 0x18d   :  { %4096 = vmatprep.subr.bf16.mxu0 %v5685_v44  ;;  %4128 = vmatprep.subr.bf16.mxu1 %v5688_v48 }
 0x190   :  { %4098 = vmatpush1.bf16.msra.mxu0 %v5694_v54  ;;  %4130 = vmatpush1.bf16.msra.mxu1 %v5698_v58 }
 0x191   :  { %4100 = vmatprep.subr.bf16.mxu0 %v5702_v62  ;;  %4132 = vmatprep.subr.bf16.mxu1 %v5705_v4 }
 0x194   :  { %4102 = vmatpush1.bf16.msra.mxu0 %v5711_v9  ;;  %4134 = vmatpush1.bf16.msra.mxu1 %v5715_v14 }
 0x195   :  { %4104 = vmatprep.subr.bf16.mxu0 %v5719_v18  ;;  %4136 = vmatprep.subr.bf16.mxu1 %v5722_v22 }
 0x198   :  { %4106 = vmatpush1.bf16.msra.mxu0 %v5728_v25  ;;  %4138 = vmatpush1.bf16.msra.mxu1 %v5732_v27 }
 0x199   :  { %4140 = vmatprep.subr.bf16.mxu0 %v5605_v38  ;;  %4172 = vmatprep.subr.bf16.mxu1 %v5607_v41 }
 0x24e   :  { %v741_v52 = vpop.f32.mrb[2].mxu0  ;;  %v812_v55 = vpop.f32.mrb[2].mxu1 }
 0x24f   :  { %v5037_v57 = vadd.f32 %v741_v52, %v5789_v37  ;;  %v743_v1 = vpop.f32.mrb[3].mxu0  ;;  %v814_v5 = vpop.f32.mrb[3].mxu1  ;;  %v5053_v17 = vadd.f32 %v812_v55, %v5806_v2 }
 0x250   :  { %v5038_v7 = vadd.f32 %v743_v1, %v5793_v39  ;;  %v5054_v12 = vadd.f32 %v814_v5, %v5800_v59 }
 0x251   :  { %v3819_v8 = vmul.f32 -1.442695, %v5037_v57 }
 0x252   :  { %v3820_v11 = vmul.f32 -1.442695, %v5038_v7  ;;  %v3821_v15 = vmul.f32 -1.442695, %v5054_v12 }
 0x253   :  { %5185 = vpow2.f32 %v3819_v8 }
 0x254   :  { %5187 = vpow2.f32 %v3820_v11 }
 0x255   :  { %5189 = vpow2.f32 %v3821_v15 }
 0x256   :  { %5191 = vtanh.f32 %v5053_v17 }
 0x25d   :  { %v5186_v20 = vpop.eup %5185 }
 0x25e   :  { %v5188_v21 = vpop.eup %5187  ;;  %v824_v24 = vadd.f32 1.0, %v5186_v20 }
 0x25f   :  { %v830_v28 = vadd.f32 1.0, %v5188_v21  ;;  %v5190_v30 = vpop.eup %5189 }
 0x260   :  { %5193 = vrcp.f32 %v824_v24  ;;  %v5192_v34 = vpop.eup %5191  ;;  %v837_v52 = vadd.f32 1.0, %v5190_v30 }
 0x261   :  { %5195 = vrcp.f32 %v830_v28 }
 0x262   :  { %5197 = vrcp.f32 %v837_v52 }
 0x26a   :  { %v5194_v42 = vpop.eup %5193 }
 0x26b   :  { %v5196_v46 = vpop.eup %5195  ;;  %v842_v49 = vmul.f32 %v5194_v42, %v5192_v34 }
 0x26c   :  { %v841_v57 = vmul.f32 %v5196_v46, %v5812_v45  ;;  %v5198_v55 = vpop.eup %5197 }
 0x26e   :  { %v5858_v1 = vadd.f32 %v842_v49, %v841_v57 }
 0x270   :  { %5199 = vtanh.f32 %v5858_v1 }
 0x27a   :  { %v5200_v5 = vpop.eup %5199 }
 0x27b   :  { %v5861_v7 = vmul.f32 %v5200_v5, %v5198_v55 }
 0x27d   :  { %921 = vmatmul.mubr.f32.vlgmr.msra.gmra.mrb[4].mxu0 %v5861_v7  ;;  %992 = vmatmul.mubr.f32.vlgmr.msra.gmra.mrb[4].mxu1 %v5861_v7 }
 0x27e   :  { %4142 = vmatpush1.bf16.msra.mxu0 %v5612_v47  ;;  %4174 = vmatpush1.bf16.msra.mxu1 %v5615_v50 }
 0x27f   :  { %4144 = vmatprep.subr.bf16.mxu0 %v5618_v53  ;;  %4176 = vmatprep.subr.bf16.mxu1 %v5620_v56 }
 0x280   :  { %1101 = vmatprep.mubr.f32.mxu0 %v5500_v0  ;;  %1172 = vmatprep.mubr.f32.mxu1 %v5500_v0 }
 0x282   :  { %4146 = vmatpush1.bf16.msra.mxu0 %v5626_v60  ;;  %4178 = vmatpush1.bf16.msra.mxu1 %v5630_v63 }
 0x283   :  { %4148 = vmatprep.subr.bf16.mxu0 %v5634_v3  ;;  %4180 = vmatprep.subr.bf16.mxu1 %v5637_v6 }
 0x286   :  { %4150 = vmatpush1.bf16.msra.mxu0 %v5643_v10  ;;  %4182 = vmatpush1.bf16.msra.mxu1 %v5647_v13 }
 0x287   :  { %4152 = vmatprep.subr.bf16.mxu0 %v5651_v16  ;;  %4184 = vmatprep.subr.bf16.mxu1 %v5654_v19 }
 0x28a   :  { %4154 = vmatpush1.bf16.msra.mxu0 %v5660_v23  ;;  %4186 = vmatpush1.bf16.msra.mxu1 %v5664_v26 }
 0x28b   :  { %4156 = vmatprep.subr.bf16.mxu0 %v5668_v29  ;;  %4188 = vmatprep.subr.bf16.mxu1 %v5671_v32 }
 0x28e   :  { %4158 = vmatpush1.bf16.msra.mxu0 %v5677_v36  ;;  %4190 = vmatpush1.bf16.msra.mxu1 %v5681_v40 }
 0x28f   :  { %4160 = vmatprep.subr.bf16.mxu0 %v5685_v44  ;;  %4192 = vmatprep.subr.bf16.mxu1 %v5688_v48 }
 0x292   :  { %4162 = vmatpush1.bf16.msra.mxu0 %v5694_v54  ;;  %4194 = vmatpush1.bf16.msra.mxu1 %v5698_v58 }
 0x293   :  { %4164 = vmatprep.subr.bf16.mxu0 %v5702_v62  ;;  %4196 = vmatprep.subr.bf16.mxu1 %v5705_v4 }
 0x296   :  { %4166 = vmatpush1.bf16.msra.mxu0 %v5711_v9  ;;  %4198 = vmatpush1.bf16.msra.mxu1 %v5715_v14 }
 0x297   :  { %4168 = vmatprep.subr.bf16.mxu0 %v5719_v18  ;;  %4200 = vmatprep.subr.bf16.mxu1 %v5722_v22 }
 0x29a   :  { %4170 = vmatpush1.bf16.msra.mxu0 %v5728_v25  ;;  %4202 = vmatpush1.bf16.msra.mxu1 %v5732_v27 }
 0x29b   :  { %4204 = vmatprep.subr.bf16.mxu0 %v5605_v38  ;;  %4236 = vmatprep.subr.bf16.mxu1 %v5607_v41 }
 0x350   :  { %v922_v45 = vpop.f32.mrb[4].mxu0  ;;  %v993_v8 = vpop.f32.mrb[4].mxu1 }
 0x351   :  { %v5039_v11 = vadd.f32 %v922_v45, %v5789_v37  ;;  %v924_v12 = vpop.f32.mrb[5].mxu0  ;;  %v995_v15 = vpop.f32.mrb[5].mxu1  ;;  %v5055_v30 = vadd.f32 %v993_v8, %v5806_v2 }
 0x352   :  { %v5040_v17 = vadd.f32 %v924_v12, %v5793_v39  ;;  %v5056_v24 = vadd.f32 %v995_v15, %v5800_v59 }
 0x353   :  { %v3823_v20 = vmul.f32 -1.442695, %v5039_v11 }
 0x354   :  { %v3824_v21 = vmul.f32 -1.442695, %v5040_v17  ;;  %v3825_v28 = vmul.f32 -1.442695, %v5056_v24 }
 0x355   :  { %5201 = vpow2.f32 %v3823_v20 }
 0x356   :  { %5203 = vpow2.f32 %v3824_v21 }
 0x357   :  { %5205 = vpow2.f32 %v3825_v28 }
 0x358   :  { %5207 = vtanh.f32 %v5055_v30 }
 0x35f   :  { %v5202_v34 = vpop.eup %5201 }
 0x360   :  { %v5204_v42 = vpop.eup %5203  ;;  %v1005_v46 = vadd.f32 1.0, %v5202_v34 }
 0x361   :  { %v1011_v49 = vadd.f32 1.0, %v5204_v42  ;;  %v5206_v52 = vpop.eup %5205 }
 0x362   :  { %5209 = vrcp.f32 %v1005_v46  ;;  %v5208_v57 = vpop.eup %5207  ;;  %v1018_v11 = vadd.f32 1.0, %v5206_v52 }
 0x363   :  { %5211 = vrcp.f32 %v1011_v49 }
 0x364   :  { %5213 = vrcp.f32 %v1018_v11 }
 0x36c   :  { %v5210_v55 = vpop.eup %5209 }
 0x36d   :  { %v5212_v5 = vpop.eup %5211  ;;  %v1023_v45 = vmul.f32 %v5210_v55, %v5208_v57 }
 0x36e   :  { %v1022_v12 = vmul.f32 %v5212_v5, %v5858_v1  ;;  %v5214_v8 = vpop.eup %5213 }
 0x370   :  { %v5904_v15 = vadd.f32 %v1023_v45, %v1022_v12 }
 0x372   :  { %5215 = vtanh.f32 %v5904_v15 }
 0x37c   :  { %v5216_v17 = vpop.eup %5215 }
 0x37d   :  { %v5907_v20 = vmul.f32 %v5216_v17, %v5214_v8 }
 0x37f   :  { %1102 = vmatmul.mubr.f32.vlgmr.msra.gmra.mrb[6].mxu0 %v5907_v20  ;;  %1173 = vmatmul.mubr.f32.vlgmr.msra.gmra.mrb[6].mxu1 %v5907_v20 }
 0x380   :  { %4206 = vmatpush1.bf16.msra.mxu0 %v5612_v47  ;;  %4238 = vmatpush1.bf16.msra.mxu1 %v5615_v50 }
 0x381   :  { %4208 = vmatprep.subr.bf16.mxu0 %v5618_v53  ;;  %4240 = vmatprep.subr.bf16.mxu1 %v5620_v56 }
 0x382   :  { %1282 = vmatprep.mubr.f32.mxu0 %v5500_v0  ;;  %1353 = vmatprep.mubr.f32.mxu1 %v5500_v0 }
 0x384   :  { %4210 = vmatpush1.bf16.msra.mxu0 %v5626_v60  ;;  %4242 = vmatpush1.bf16.msra.mxu1 %v5630_v63 }
 0x385   :  { %4212 = vmatprep.subr.bf16.mxu0 %v5634_v3  ;;  %4244 = vmatprep.subr.bf16.mxu1 %v5637_v6 }
 0x388   :  { %4214 = vmatpush1.bf16.msra.mxu0 %v5643_v10  ;;  %4246 = vmatpush1.bf16.msra.mxu1 %v5647_v13 }
 0x389   :  { %4216 = vmatprep.subr.bf16.mxu0 %v5651_v16  ;;  %4248 = vmatprep.subr.bf16.mxu1 %v5654_v19 }
 0x38c   :  { %4218 = vmatpush1.bf16.msra.mxu0 %v5660_v23  ;;  %4250 = vmatpush1.bf16.msra.mxu1 %v5664_v26 }
 0x38d   :  { %4220 = vmatprep.subr.bf16.mxu0 %v5668_v29  ;;  %4252 = vmatprep.subr.bf16.mxu1 %v5671_v32 }
 0x390   :  { %4222 = vmatpush1.bf16.msra.mxu0 %v5677_v36  ;;  %4254 = vmatpush1.bf16.msra.mxu1 %v5681_v40 }
 0x391   :  { %4224 = vmatprep.subr.bf16.mxu0 %v5685_v44  ;;  %4256 = vmatprep.subr.bf16.mxu1 %v5688_v48 }
 0x394   :  { %4226 = vmatpush1.bf16.msra.mxu0 %v5694_v54  ;;  %4258 = vmatpush1.bf16.msra.mxu1 %v5698_v58 }
 0x395   :  { %4228 = vmatprep.subr.bf16.mxu0 %v5702_v62  ;;  %4260 = vmatprep.subr.bf16.mxu1 %v5705_v4 }
 0x398   :  { %4230 = vmatpush1.bf16.msra.mxu0 %v5711_v9  ;;  %4262 = vmatpush1.bf16.msra.mxu1 %v5715_v14 }
 0x399   :  { %4232 = vmatprep.subr.bf16.mxu0 %v5719_v18  ;;  %4264 = vmatprep.subr.bf16.mxu1 %v5722_v22 }
 0x39c   :  { %4234 = vmatpush1.bf16.msra.mxu0 %v5728_v25  ;;  %4266 = vmatpush1.bf16.msra.mxu1 %v5732_v27 }
 0x39d   :  { %4268 = vmatprep.subr.bf16.mxu0 %v5605_v38  ;;  %4300 = vmatprep.subr.bf16.mxu1 %v5607_v41 }
 0x452   :  { %v1103_v1 = vpop.f32.mrb[6].mxu0  ;;  %v1174_v21 = vpop.f32.mrb[6].mxu1 }
 0x453   :  { %v5041_v24 = vadd.f32 %v1103_v1, %v5789_v37  ;;  %v1105_v28 = vpop.f32.mrb[7].mxu0  ;;  %v1176_v30 = vpop.f32.mrb[7].mxu1  ;;  %v5057_v57 = vadd.f32 %v1174_v21, %v5806_v2 }
 0x454   :  { %v5042_v34 = vadd.f32 %v1105_v28, %v5793_v39  ;;  %v5058_v49 = vadd.f32 %v1176_v30, %v5800_v59 }
 0x455   :  { %v3827_v42 = vmul.f32 -1.442695, %v5041_v24 }
 0x456   :  { %v3828_v46 = vmul.f32 -1.442695, %v5042_v34  ;;  %v3829_v52 = vmul.f32 -1.442695, %v5058_v49 }
 0x457   :  { %5217 = vpow2.f32 %v3827_v42 }
 0x458   :  { %5219 = vpow2.f32 %v3828_v46 }
 0x459   :  { %5221 = vpow2.f32 %v3829_v52 }
 0x45a   :  { %5223 = vtanh.f32 %v5057_v57 }
 0x461   :  { %v5218_v55 = vpop.eup %5217 }
 0x462   :  { %v5220_v5 = vpop.eup %5219  ;;  %v1186_v45 = vadd.f32 1.0, %v5218_v55 }
 0x463   :  { %v1192_v11 = vadd.f32 1.0, %v5220_v5  ;;  %v5222_v12 = vpop.eup %5221 }
 0x464   :  { %5225 = vrcp.f32 %v1186_v45  ;;  %v5224_v8 = vpop.eup %5223  ;;  %v1199_v28 = vadd.f32 1.0, %v5222_v12 }
 0x465   :  { %5227 = vrcp.f32 %v1192_v11 }
 0x466   :  { %5229 = vrcp.f32 %v1199_v28 }
 0x46e   :  { %v5226_v17 = vpop.eup %5225 }
 0x46f   :  { %v5228_v1 = vpop.eup %5227  ;;  %v1204_v24 = vmul.f32 %v5226_v17, %v5224_v8 }
 0x470   :  { %v1203_v34 = vmul.f32 %v5228_v1, %v5904_v15  ;;  %v5230_v21 = vpop.eup %5229 }
 0x472   :  { %v5950_v30 = vadd.f32 %v1204_v24, %v1203_v34 }
 0x474   :  { %5231 = vtanh.f32 %v5950_v30 }
 0x47e   :  { %v5232_v42 = vpop.eup %5231 }
 0x47f   :  { %v5953_v46 = vmul.f32 %v5232_v42, %v5230_v21 }
 0x481   :  { %1283 = vmatmul.mubr.f32.vlgmr.msra.gmra.mrb[8].mxu0 %v5953_v46  ;;  %1354 = vmatmul.mubr.f32.vlgmr.msra.gmra.mrb[8].mxu1 %v5953_v46 }
 0x482   :  { %4270 = vmatpush1.bf16.msra.mxu0 %v5612_v47  ;;  %4302 = vmatpush1.bf16.msra.mxu1 %v5615_v50 }
 0x483   :  { %4272 = vmatprep.subr.bf16.mxu0 %v5618_v53  ;;  %4304 = vmatprep.subr.bf16.mxu1 %v5620_v56 }
 0x484   :  { %1463 = vmatprep.mubr.f32.mxu0 %v5500_v0  ;;  %1534 = vmatprep.mubr.f32.mxu1 %v5500_v0 }
 0x486   :  { %4274 = vmatpush1.bf16.msra.mxu0 %v5626_v60  ;;  %4306 = vmatpush1.bf16.msra.mxu1 %v5630_v63 }
 0x487   :  { %4276 = vmatprep.subr.bf16.mxu0 %v5634_v3  ;;  %4308 = vmatprep.subr.bf16.mxu1 %v5637_v6 }
 0x48a   :  { %4278 = vmatpush1.bf16.msra.mxu0 %v5643_v10  ;;  %4310 = vmatpush1.bf16.msra.mxu1 %v5647_v13 }
 0x48b   :  { %4280 = vmatprep.subr.bf16.mxu0 %v5651_v16  ;;  %4312 = vmatprep.subr.bf16.mxu1 %v5654_v19 }
 0x48e   :  { %4282 = vmatpush1.bf16.msra.mxu0 %v5660_v23  ;;  %4314 = vmatpush1.bf16.msra.mxu1 %v5664_v26 }
 0x48f   :  { %4284 = vmatprep.subr.bf16.mxu0 %v5668_v29  ;;  %4316 = vmatprep.subr.bf16.mxu1 %v5671_v32 }
 0x492   :  { %4286 = vmatpush1.bf16.msra.mxu0 %v5677_v36  ;;  %4318 = vmatpush1.bf16.msra.mxu1 %v5681_v40 }
 0x493   :  { %4288 = vmatprep.subr.bf16.mxu0 %v5685_v44  ;;  %4320 = vmatprep.subr.bf16.mxu1 %v5688_v48 }
 0x496   :  { %4290 = vmatpush1.bf16.msra.mxu0 %v5694_v54  ;;  %4322 = vmatpush1.bf16.msra.mxu1 %v5698_v58 }
 0x497   :  { %4292 = vmatprep.subr.bf16.mxu0 %v5702_v62  ;;  %4324 = vmatprep.subr.bf16.mxu1 %v5705_v4 }
 0x49a   :  { %4294 = vmatpush1.bf16.msra.mxu0 %v5711_v9  ;;  %4326 = vmatpush1.bf16.msra.mxu1 %v5715_v14 }
 0x49b   :  { %4296 = vmatprep.subr.bf16.mxu0 %v5719_v18  ;;  %4328 = vmatprep.subr.bf16.mxu1 %v5722_v22 }
 0x49e   :  { %4298 = vmatpush1.bf16.msra.mxu0 %v5728_v25  ;;  %4330 = vmatpush1.bf16.msra.mxu1 %v5732_v27 }
 0x49f   :  { %4332 = vmatprep.subr.bf16.mxu0 %v5605_v38  ;;  %4364 = vmatprep.subr.bf16.mxu1 %v5607_v41 }
 0x554   :  { %v1284_v15 = vpop.f32.mrb[8].mxu0  ;;  %v1355_v49 = vpop.f32.mrb[8].mxu1 }
 0x555   :  { %v5043_v52 = vadd.f32 %v1284_v15, %v5789_v37  ;;  %v1286_v57 = vpop.f32.mrb[9].mxu0  ;;  %v1357_v55 = vpop.f32.mrb[9].mxu1  ;;  %v5059_v17 = vadd.f32 %v1355_v49, %v5806_v2 }
 0x556   :  { %v5044_v5 = vadd.f32 %v1286_v57, %v5793_v39  ;;  %v5060_v12 = vadd.f32 %v1357_v55, %v5800_v59 }
 0x557   :  { %v3831_v45 = vmul.f32 -1.442695, %v5043_v52 }
 0x558   :  { %v3832_v11 = vmul.f32 -1.442695, %v5044_v5  ;;  %v3833_v8 = vmul.f32 -1.442695, %v5060_v12 }
 0x559   :  { %5233 = vpow2.f32 %v3831_v45 }
 0x55a   :  { %5235 = vpow2.f32 %v3832_v11 }
 0x55b   :  { %5237 = vpow2.f32 %v3833_v8 }
 0x55c   :  { %5239 = vtanh.f32 %v5059_v17 }
 0x563   :  { %v5234_v1 = vpop.eup %5233 }
 0x564   :  { %v5236_v24 = vpop.eup %5235  ;;  %v1367_v28 = vadd.f32 1.0, %v5234_v1 }
 0x565   :  { %v1373_v34 = vadd.f32 1.0, %v5236_v24  ;;  %v5238_v21 = vpop.eup %5237 }
 0x566   :  { %5241 = vrcp.f32 %v1367_v28  ;;  %v5240_v42 = vpop.eup %5239  ;;  %v1380_v5 = vadd.f32 1.0, %v5238_v21 }
 0x567   :  { %5243 = vrcp.f32 %v1373_v34 }
 0x568   :  { %5245 = vrcp.f32 %v1380_v5 }
 0x570   :  { %v5242_v15 = vpop.eup %5241 }
 0x571   :  { %v5244_v52 = vpop.eup %5243  ;;  %v1385_v57 = vmul.f32 %v5242_v15, %v5240_v42 }
 0x572   :  { %v1384_v45 = vmul.f32 %v5244_v52, %v5950_v30  ;;  %v5246_v49 = vpop.eup %5245 }
 0x574   :  { %v5996_v55 = vadd.f32 %v1385_v57, %v1384_v45 }
 0x576   :  { %5247 = vtanh.f32 %v5996_v55 }
 0x580   :  { %v5248_v11 = vpop.eup %5247 }
 0x581   :  { %v5999_v12 = vmul.f32 %v5248_v11, %v5246_v49 }
 0x583   :  { %1464 = vmatmul.mubr.f32.vlgmr.msra.gmra.mrb[10].mxu0 %v5999_v12  ;;  %1535 = vmatmul.mubr.f32.vlgmr.msra.gmra.mrb[10].mxu1 %v5999_v12 }
 0x584   :  { %4334 = vmatpush1.bf16.msra.mxu0 %v5612_v47  ;;  %4366 = vmatpush1.bf16.msra.mxu1 %v5615_v50 }
 0x585   :  { %4336 = vmatprep.subr.bf16.mxu0 %v5618_v53  ;;  %4368 = vmatprep.subr.bf16.mxu1 %v5620_v56 }
 0x586   :  { %1644 = vmatprep.mubr.f32.mxu0 %v5500_v0  ;;  %1715 = vmatprep.mubr.f32.mxu1 %v5500_v0 }
 0x588   :  { %4338 = vmatpush1.bf16.msra.mxu0 %v5626_v60  ;;  %4370 = vmatpush1.bf16.msra.mxu1 %v5630_v63 }
 0x589   :  { %4340 = vmatprep.subr.bf16.mxu0 %v5634_v3  ;;  %4372 = vmatprep.subr.bf16.mxu1 %v5637_v6 }
 0x58c   :  { %4342 = vmatpush1.bf16.msra.mxu0 %v5643_v10  ;;  %4374 = vmatpush1.bf16.msra.mxu1 %v5647_v13 }
 0x58d   :  { %4344 = vmatprep.subr.bf16.mxu0 %v5651_v16  ;;  %4376 = vmatprep.subr.bf16.mxu1 %v5654_v19 }
 0x590   :  { %4346 = vmatpush1.bf16.msra.mxu0 %v5660_v23  ;;  %4378 = vmatpush1.bf16.msra.mxu1 %v5664_v26 }
 0x591   :  { %4348 = vmatprep.subr.bf16.mxu0 %v5668_v29  ;;  %4380 = vmatprep.subr.bf16.mxu1 %v5671_v32 }
 0x594   :  { %4350 = vmatpush1.bf16.msra.mxu0 %v5677_v36  ;;  %4382 = vmatpush1.bf16.msra.mxu1 %v5681_v40 }
 0x595   :  { %4352 = vmatprep.subr.bf16.mxu0 %v5685_v44  ;;  %4384 = vmatprep.subr.bf16.mxu1 %v5688_v48 }
 0x598   :  { %4354 = vmatpush1.bf16.msra.mxu0 %v5694_v54  ;;  %4386 = vmatpush1.bf16.msra.mxu1 %v5698_v58 }
 0x599   :  { %4356 = vmatprep.subr.bf16.mxu0 %v5702_v62  ;;  %4388 = vmatprep.subr.bf16.mxu1 %v5705_v4 }
 0x59c   :  { %4358 = vmatpush1.bf16.msra.mxu0 %v5711_v9  ;;  %4390 = vmatpush1.bf16.msra.mxu1 %v5715_v14 }
 0x59d   :  { %4360 = vmatprep.subr.bf16.mxu0 %v5719_v18  ;;  %4392 = vmatprep.subr.bf16.mxu1 %v5722_v22 }
 0x5a0   :  { %4362 = vmatpush1.bf16.msra.mxu0 %v5728_v25  ;;  %4394 = vmatpush1.bf16.msra.mxu1 %v5732_v27 }
 0x5a1   :  { %4396 = vmatprep.subr.bf16.mxu0 %v5605_v38  ;;  %4428 = vmatprep.subr.bf16.mxu1 %v5607_v41 }
 0x656   :  { %v1465_v30 = vpop.f32.mrb[10].mxu0  ;;  %v1536_v8 = vpop.f32.mrb[10].mxu1 }
 0x657   :  { %v5045_v17 = vadd.f32 %v1465_v30, %v5789_v37  ;;  %v1467_v1 = vpop.f32.mrb[11].mxu0  ;;  %v1538_v24 = vpop.f32.mrb[11].mxu1  ;;  %v5061_v52 = vadd.f32 %v1536_v8, %v5806_v2 }
 0x658   :  { %v5046_v28 = vadd.f32 %v1467_v1, %v5793_v39  ;;  %v5062_v42 = vadd.f32 %v1538_v24, %v5800_v59 }
 0x659   :  { %v3835_v34 = vmul.f32 -1.442695, %v5045_v17 }
 0x65a   :  { %v3836_v21 = vmul.f32 -1.442695, %v5046_v28  ;;  %v3837_v15 = vmul.f32 -1.442695, %v5062_v42  ;;  %v1950_v42 = vld [vmem:[#allocation7 + $0x10] sm:$0xff] }
 0x65b   :  { %5249 = vpow2.f32 %v3835_v34 }
 0x65c   :  { %5251 = vpow2.f32 %v3836_v21 }
 0x65d   :  { %5253 = vpow2.f32 %v3837_v15  ;;  %v1954_v15 = vld [vmem:[#allocation7 + $0x30] sm:$0xff] }
 0x65e   :  { %5255 = vtanh.f32 %v5061_v52  ;;  %v1957_v52 = vld [vmem:[#allocation7 + $0x48] sm:$0xff] }
 0x665   :  { %v5250_v38 = vpop.eup %5249 }
 0x666   :  { %v5252_v57 = vpop.eup %5251  ;;  %v1548_v41 = vadd.f32 1.0, %v5250_v38  ;;  %v1961_v38 = vld [vmem:[#allocation7 + $0x68] sm:$0xff] }
 0x667   :  { %v1554_v5 = vadd.f32 1.0, %v5252_v57  ;;  %v5254_v45 = vpop.eup %5253  ;;  %v1959_v57 = vld [vmem:[#allocation7 + $0x58] sm:$0xff] }
 0x668   :  { %5257 = vrcp.f32 %v1548_v41  ;;  %v5256_v49 = vpop.eup %5255  ;;  %v1561_v1 = vadd.f32 1.0, %v5254_v45  ;;  %v1963_v41 = vld [vmem:[#allocation7 + $0x78] sm:$0xff] }
 0x669   :  { %5259 = vrcp.f32 %v1554_v5 }
 0x66a   :  { %5261 = vrcp.f32 %v1561_v1 }
 0x672   :  { %v5258_v11 = vpop.eup %5257 }
 0x673   :  { %v5260_v30 = vpop.eup %5259  ;;  %v1566_v17 = vmul.f32 %v5258_v11, %v5256_v49  ;;  %v4493_v11 = vpack.c.bf16 %v1954_v15, %v1950_v42  ;;  %v1980_v42 = vld [vmem:[#allocation7 + $0x100] sm:$0xff] }
 0x674   :  { %v1565_v28 = vmul.f32 %v5260_v30, %v5996_v55  ;;  %v5262_v8 = vpop.eup %5261  ;;  %v1952_v55 = vld [vmem:[#allocation7 + $0x20] sm:$0xff] }
 0x675   :  { %v1956_v30 = vld [vmem:[#allocation7 + $0x40] sm:$0xff] }
 0x676   :  { %v6042_v24 = vadd.f32 %v1566_v17, %v1565_v28  ;;  %v1960_v17 = vld [vmem:[#allocation7 + $0x60] sm:$0xff]  ;;  %v4463_v28 = vpack.c.bf16 %v1961_v38, %v1957_v52 }
 0x677   :  { %v1984_v15 = vld [vmem:[#allocation7 + $0x120] sm:$0xff] }
 0x678   :  { %5263 = vtanh.f32 %v6042_v24 }
 0x682   :  { %v5264_v34 = vpop.eup %5263 }
 0x683   :  { %v6045_v21 = vmul.f32 %v5264_v34, %v5262_v8  ;;  %v1958_v8 = vld [vmem:[#allocation7 + $0x50] sm:$0xff] }
 0x684   :  { %v1962_v34 = vld [vmem:[#allocation7 + $0x70] sm:$0xff] }
 0x685   :  { %1645 = vmatmul.mubr.f32.vlgmr.msra.gmra.mrb[12].mxu0 %v6045_v21  ;;  %1716 = vmatmul.mubr.f32.vlgmr.msra.gmra.mrb[12].mxu1 %v6045_v21 }
 0x686   :  { %4398 = vmatpush1.bf16.msra.mxu0 %v5612_v47  ;;  %4430 = vmatpush1.bf16.msra.mxu1 %v5615_v50  ;;  %v1949_v47 = vld [vmem:[#allocation7 + $0x8] sm:$0xff] }
 0x687   :  { %4400 = vmatprep.subr.bf16.mxu0 %v5618_v53  ;;  %4432 = vmatprep.subr.bf16.mxu1 %v5620_v56  ;;  %v1953_v50 = vld [vmem:[#allocation7 + $0x28] sm:$0xff]  ;;  %v1951_v53 = vld [vmem:[#allocation7 + $0x18] sm:$0xff] }
 0x688   :  { %1825 = vmatprep.mubr.f32.mxu0 %v5500_v0  ;;  %1896 = vmatprep.mubr.f32.mxu1 %v5500_v0  ;;  %v4459_v56 = vpack.c.bf16 %v1953_v50, %v1949_v47  ;;  %v1965_v47 = vld [vmem:[#allocation7 + $0x88] sm:$0xff] }
 0x689   :  { %v1969_v50 = vld [vmem:[#allocation7 + $0xa8] sm:$0xff] }
 0x68a   :  { %4402 = vmatpush1.bf16.msra.mxu0 %v5626_v60  ;;  %4434 = vmatpush1.bf16.msra.mxu1 %v5630_v63  ;;  %v1955_v60 = vld [vmem:[#allocation7 + $0x38] sm:$0xff] }
 0x68b   :  { %4404 = vmatprep.subr.bf16.mxu0 %v5634_v3  ;;  %4436 = vmatprep.subr.bf16.mxu1 %v5637_v6  ;;  %v4491_v63 = vpack.c.bf16 %v1955_v60, %v1951_v53  ;;  %v1967_v53 = vld [vmem:[#allocation7 + $0x98] sm:$0xff]  ;;  %v4465_v60 = vpack.c.bf16 %v1960_v17, %v1956_v30  ;;  %v4477_v30 = vpack.c.bf16 %v1984_v15, %v1980_v42  ;;  %v2296_v15 = vld [vmem:[#allocation9 + $0x210] sm:$0xff] }
 0x68e   :  { %4406 = vmatpush1.bf16.msra.mxu0 %v5643_v10  ;;  %4438 = vmatpush1.bf16.msra.mxu1 %v5647_v13 }
 0x68f   :  { %4408 = vmatprep.subr.bf16.mxu0 %v5651_v16  ;;  %4440 = vmatprep.subr.bf16.mxu1 %v5654_v19 }
 0x692   :  { %4410 = vmatpush1.bf16.msra.mxu0 %v5660_v23  ;;  %4442 = vmatpush1.bf16.msra.mxu1 %v5664_v26 }
 0x693   :  { %4412 = vmatprep.subr.bf16.mxu0 %v5668_v29  ;;  %4444 = vmatprep.subr.bf16.mxu1 %v5671_v32 }
 0x696   :  { %4414 = vmatpush1.bf16.msra.mxu0 %v5677_v36  ;;  %4446 = vmatpush1.bf16.msra.mxu1 %v5681_v40 }
 0x697   :  { %4416 = vmatprep.subr.bf16.mxu0 %v5685_v44  ;;  %4448 = vmatprep.subr.bf16.mxu1 %v5688_v48 }
 0x69a   :  { %4418 = vmatpush1.bf16.msra.mxu0 %v5694_v54  ;;  %4450 = vmatpush1.bf16.msra.mxu1 %v5698_v58 }
 0x69b   :  { %4420 = vmatprep.subr.bf16.mxu0 %v5702_v62  ;;  %4452 = vmatprep.subr.bf16.mxu1 %v5705_v4 }
 0x69e   :  { %4422 = vmatpush1.bf16.msra.mxu0 %v5711_v9  ;;  %4454 = vmatpush1.bf16.msra.mxu1 %v5715_v14 }
 0x69f   :  { %4424 = vmatprep.subr.bf16.mxu0 %v5719_v18  ;;  %4456 = vmatprep.subr.bf16.mxu1 %v5722_v22 }
 0x6a2   :  { %4426 = vmatpush1.bf16.msra.mxu0 %v5728_v25  ;;  %4458 = vmatpush1.bf16.msra.mxu1 %v5732_v27  ;;  %v1948_v27 = vld [vmem:[#allocation7] sm:$0xff] }
 0x6a3   :  { %4460 = vmatprep.subr.bf16.mxu0 %v4459_v56  ;;  %4492 = vmatprep.subr.bf16.mxu1 %v4491_v63  ;;  %v4461_v49 = vpack.c.bf16 %v1952_v55, %v1948_v27  ;;  %v1971_v56 = vld [vmem:[#allocation7 + $0xb8] sm:$0xff]  ;;  %v4497_v63 = vpack.c.bf16 %v1962_v34, %v1958_v8 }
 0x758   :  { %v1646_v3 = vpop.f32.mrb[12].mxu0  ;;  %v1717_v6 = vpop.f32.mrb[12].mxu1 }
 0x759   :  { %v5047_v10 = vadd.f32 %v1646_v3, %v5789_v37  ;;  %v1648_v13 = vpop.f32.mrb[13].mxu0  ;;  %v1719_v16 = vpop.f32.mrb[13].mxu1  ;;  %v5063_v36 = vadd.f32 %v1717_v6, %v5806_v2  ;;  %v1964_v3 = vld [vmem:[#allocation7 + $0x80] sm:$0xff] }
 0x75a   :  { %v5048_v19 = vadd.f32 %v1648_v13, %v5793_v39  ;;  %v5064_v29 = vadd.f32 %v1719_v16, %v5800_v59  ;;  %v1968_v6 = vld [vmem:[#allocation7 + $0xa0] sm:$0xff]  ;;  %v4499_v13 = vpack.c.bf16 %v1971_v56, %v1967_v53  ;;  %v1966_v16 = vld [vmem:[#allocation7 + $0x90] sm:$0xff]  ;;  %v1997_v53 = vld [vmem:[#allocation7 + $0x188] sm:$0xff] }
 0x75b   :  { %v3839_v23 = vmul.f32 -1.442695, %v5047_v10  ;;  %v4467_v10 = vpack.c.bf16 %v1969_v50, %v1965_v47  ;;  %v1990_v47 = vld [vmem:[#allocation7 + $0x150] sm:$0xff]  ;;  %v2001_v56 = vld [vmem:[#allocation7 + $0x1a8] sm:$0xff] }
 0x75c   :  { %v3840_v26 = vmul.f32 -1.442695, %v5048_v19  ;;  %v3841_v32 = vmul.f32 -1.442695, %v5064_v29  ;;  %v1970_v19 = vld [vmem:[#allocation7 + $0xb0] sm:$0xff]  ;;  %v1975_v29 = vld [vmem:[#allocation7 + $0xd8] sm:$0xff] }
 0x75d   :  { %5265 = vpow2.f32 %v3839_v23  ;;  %v1973_v23 = vld [vmem:[#allocation7 + $0xc8] sm:$0xff]  ;;  %v1994_v50 = vld [vmem:[#allocation7 + $0x170] sm:$0xff] }
 0x75e   :  { %5267 = vpow2.f32 %v3840_v26  ;;  %v1977_v26 = vld [vmem:[#allocation7 + $0xe8] sm:$0xff] }
 0x75f   :  { %5269 = vpow2.f32 %v3841_v32  ;;  %v1979_v32 = vld [vmem:[#allocation7 + $0xf8] sm:$0xff] }
 0x760   :  { %5271 = vtanh.f32 %v5063_v36  ;;  %v4469_v36 = vpack.c.bf16 %v1968_v6, %v1964_v3  ;;  %v4513_v6 = vpack.c.bf16 %v1994_v50, %v1990_v47  ;;  %v2315_v47 = vld [vmem:[#allocation9 + $0x2a8] sm:$0xff]  ;;  %v2313_v50 = vld [vmem:[#allocation9 + $0x298] sm:$0xff] }
 0x767   :  { %v5266_v40 = vpop.eup %5265 }
 0x768   :  { %v5268_v44 = vpop.eup %5267  ;;  %v1729_v48 = vadd.f32 1.0, %v5266_v40  ;;  %v4501_v40 = vpack.c.bf16 %v1970_v19, %v1966_v16  ;;  %v4483_v16 = vpack.c.bf16 %v2001_v56, %v1997_v53  ;;  %v2317_v56 = vld [vmem:[#allocation9 + $0x2b8] sm:$0xff] }
 0x769   :  { %v1735_v54 = vadd.f32 1.0, %v5268_v44  ;;  %v5270_v58 = vpop.eup %5269  ;;  %v1972_v44 = vld [vmem:[#allocation7 + $0xc0] sm:$0xff] }
 0x76a   :  { %5273 = vrcp.f32 %v1729_v48  ;;  %v5272_v62 = vpop.eup %5271  ;;  %v1742_v18 = vadd.f32 1.0, %v5270_v58  ;;  %v1976_v48 = vld [vmem:[#allocation7 + $0xe0] sm:$0xff]  ;;  %v4503_v58 = vpack.c.bf16 %v1979_v32, %v1975_v29  ;;  %v2005_v29 = vld [vmem:[#allocation7 + $0x1c8] sm:$0xff] }
 0x76b   :  { %5275 = vrcp.f32 %v1735_v54  ;;  %v4471_v54 = vpack.c.bf16 %v1977_v26, %v1973_v23  ;;  %v4473_v27 = vpack.c.bf16 %v1976_v48, %v1972_v44  ;;  %v1998_v23 = vld [vmem:[#allocation7 + $0x190] sm:$0xff]  ;;  %v2009_v32 = vld [vmem:[#allocation7 + $0x1e8] sm:$0xff] }
 0x76c   :  { %5277 = vrcp.f32 %v1742_v18  ;;  %v1983_v18 = vld [vmem:[#allocation7 + $0x118] sm:$0xff]  ;;  %v2002_v26 = vld [vmem:[#allocation7 + $0x1b0] sm:$0xff] }
 0x76d   :  { %v4517_v48 = vpack.c.bf16 %v2002_v26, %v1998_v23  ;;  %v2323_v23 = vld [vmem:[#allocation9 + $0x2e8] sm:$0xff]  ;;  %v2321_v26 = vld [vmem:[#allocation9 + $0x2d8] sm:$0xff] }
 0x774   :  { %v5274_v4 = vpop.eup %5273 }
 0x775   :  { %v5276_v9 = vpop.eup %5275  ;;  %v1747_v14 = vmul.f32 %v5274_v4, %v5272_v62  ;;  %v1974_v62 = vld [vmem:[#allocation7 + $0xd0] sm:$0xff] }
 0x776   :  { %v1746_v22 = vmul.f32 %v5276_v9, %v6042_v24  ;;  %v5278_v5 = vpop.eup %5277  ;;  %v4495_v24 = vpack.c.bf16 %v1963_v41, %v1959_v57  ;;  %v1978_v4 = vld [vmem:[#allocation7 + $0xf0] sm:$0xff]  ;;  %v1981_v9 = vld [vmem:[#allocation7 + $0x108] sm:$0xff] }
 0x777   :  { %v4505_v55 = vpack.c.bf16 %v1978_v4, %v1974_v62  ;;  %v1982_v57 = vld [vmem:[#allocation7 + $0x110] sm:$0xff]  ;;  %v2008_v4 = vld [vmem:[#allocation7 + $0x1e0] sm:$0xff] }
 0x778   :  { %v6086_v25 = vadd.f32 %v1747_v14, %v1746_v22  ;;  %v1985_v14 = vld [vmem:[#allocation7 + $0x128] sm:$0xff]  ;;  %v1987_v22 = vld [vmem:[#allocation7 + $0x138] sm:$0xff]  ;;  %v1986_v41 = vld [vmem:[#allocation7 + $0x130] sm:$0xff] }
 0x779   :  { %v4475_v52 = vpack.c.bf16 %v1985_v14, %v1981_v9  ;;  %v4507_v38 = vpack.c.bf16 %v1987_v22, %v1983_v18  ;;  %v4509_v17 = vpack.c.bf16 %v1986_v41, %v1982_v57  ;;  %v2006_v9 = vld [vmem:[#allocation7 + $0x1d0] sm:$0xff]  ;;  %v2307_v57 = vld [vmem:[#allocation9 + $0x268] sm:$0xff]  ;;  %v2305_v41 = vld [vmem:[#allocation9 + $0x258] sm:$0xff] }
 0x77a   :  { %5279 = vtanh.f32 %v6086_v25  ;;  %v2010_v14 = vld [vmem:[#allocation7 + $0x1f0] sm:$0xff] }
 0x77b   :  { %v4521_v22 = vpack.c.bf16 %v2010_v14, %v2006_v9  ;;  %v2331_v9 = vld [vmem:[#allocation9 + $0x328] sm:$0xff]  ;;  %v2329_v14 = vld [vmem:[#allocation9 + $0x318] sm:$0xff] }
 0x784   :  { %v5280_v45 = vpop.eup %5279 }
 0x785   :  { %v6089_v1 = vmul.f32 %v5280_v45, %v5278_v5  ;;  %v1989_v5 = vld [vmem:[#allocation7 + $0x148] sm:$0xff] }
 0x786   :  { %v1993_v45 = vld [vmem:[#allocation7 + $0x168] sm:$0xff] }
 0x787   :  { %1826 = vmatmul.mubr.f32.vlgmr.msra.gmra.mrb[14].mxu0 %v6089_v1  ;;  %1897 = vmatmul.mubr.f32.vlgmr.msra.gmra.mrb[14].mxu1 %v6089_v1  ;;  %v4479_v8 = vpack.c.bf16 %v1993_v45, %v1989_v5  ;;  %v2309_v45 = vld [vmem:[#allocation9 + $0x278] sm:$0xff] }
 0x788   :  { %4462 = vmatpush1.bf16.msra.mxu0 %v4461_v49  ;;  %4494 = vmatpush1.bf16.msra.mxu1 %v4493_v11  ;;  %v1991_v49 = vld [vmem:[#allocation7 + $0x158] sm:$0xff] }
 0x789   :  { %4464 = vmatprep.subr.bf16.mxu0 %v4463_v28  ;;  %4496 = vmatprep.subr.bf16.mxu1 %v4495_v24  ;;  %v1995_v11 = vld [vmem:[#allocation7 + $0x178] sm:$0xff]  ;;  %v1988_v28 = vld [vmem:[#allocation7 + $0x140] sm:$0xff] }
 0x78a   :  { %2099 = vmatprep.mubr.f32.mxu0 %v5500_v0  ;;  %2212 = vmatprep.mubr.f32.mxu1 %v5500_v0  ;;  %v1992_v24 = vld [vmem:[#allocation7 + $0x160] sm:$0xff]  ;;  %v4511_v34 = vpack.c.bf16 %v1995_v11, %v1991_v49 }
 0x78b   :  { %v4481_v3 = vpack.c.bf16 %v1992_v24, %v1988_v28  ;;  %v2302_v49 = vld [vmem:[#allocation9 + $0x240] sm:$0xff]  ;;  %v2304_v28 = vld [vmem:[#allocation9 + $0x250] sm:$0xff] }
 0x78c   :  { %4466 = vmatpush1.bf16.msra.mxu0 %v4465_v60  ;;  %4498 = vmatpush1.bf16.msra.mxu1 %v4497_v63  ;;  %v1999_v60 = vld [vmem:[#allocation7 + $0x198] sm:$0xff]  ;;  %v2306_v11 = vld [vmem:[#allocation9 + $0x260] sm:$0xff]  ;;  %v2308_v24 = vld [vmem:[#allocation9 + $0x270] sm:$0xff] }
 0x78d   :  { %4468 = vmatprep.subr.bf16.mxu0 %v4467_v10  ;;  %4500 = vmatprep.subr.bf16.mxu1 %v4499_v13  ;;  %v2003_v63 = vld [vmem:[#allocation7 + $0x1b8] sm:$0xff]  ;;  %v1996_v10 = vld [vmem:[#allocation7 + $0x180] sm:$0xff] }
 0x78e   :  { %v2000_v13 = vld [vmem:[#allocation7 + $0x1a0] sm:$0xff]  ;;  %v4515_v19 = vpack.c.bf16 %v2003_v63, %v1999_v60 }
 0x78f   :  { %v4485_v44 = vpack.c.bf16 %v2000_v13, %v1996_v10  ;;  %v2310_v60 = vld [vmem:[#allocation9 + $0x280] sm:$0xff]  ;;  %v2312_v10 = vld [vmem:[#allocation9 + $0x290] sm:$0xff] }
 0x790   :  { %4470 = vmatpush1.bf16.msra.mxu0 %v4469_v36  ;;  %4502 = vmatpush1.bf16.msra.mxu1 %v4501_v40  ;;  %v2007_v36 = vld [vmem:[#allocation7 + $0x1d8] sm:$0xff]  ;;  %v2314_v63 = vld [vmem:[#allocation9 + $0x2a0] sm:$0xff]  ;;  %v2316_v13 = vld [vmem:[#allocation9 + $0x2b0] sm:$0xff] }
 0x791   :  { %4472 = vmatprep.subr.bf16.mxu0 %v4471_v54  ;;  %4504 = vmatprep.subr.bf16.mxu1 %v4503_v58  ;;  %v2011_v40 = vld [vmem:[#allocation7 + $0x1f8] sm:$0xff]  ;;  %v2004_v54 = vld [vmem:[#allocation7 + $0x1c0] sm:$0xff]  ;;  %v4487_v58 = vpack.c.bf16 %v2009_v32, %v2005_v29 }
 0x792   :  { %v4519_v62 = vpack.c.bf16 %v2011_v40, %v2007_v36  ;;  %v4489_v18 = vpack.c.bf16 %v2008_v4, %v2004_v54  ;;  %v2325_v32 = vld [vmem:[#allocation9 + $0x2f8] sm:$0xff]  ;;  %v2318_v36 = vld [vmem:[#allocation9 + $0x2c0] sm:$0xff]  ;;  %v2320_v54 = vld [vmem:[#allocation9 + $0x2d0] sm:$0xff] }
 0x793   :  { %v2322_v40 = vld [vmem:[#allocation9 + $0x2e0] sm:$0xff]  ;;  %v2327_v4 = vld [vmem:[#allocation9 + $0x308] sm:$0xff] }
 0x794   :  { %4474 = vmatpush1.bf16.msra.mxu0 %v4473_v27  ;;  %4506 = vmatpush1.bf16.msra.mxu1 %v4505_v55  ;;  %v2294_v27 = vld [vmem:[#allocation9 + $0x200] sm:$0xff] }
 0x795   :  { %4476 = vmatprep.subr.bf16.mxu0 %v4475_v52  ;;  %4508 = vmatprep.subr.bf16.mxu1 %v4507_v38  ;;  %v2300_v52 = vld [vmem:[#allocation9 + $0x230] sm:$0xff]  ;;  %v2303_v38 = vld [vmem:[#allocation9 + $0x248] sm:$0xff] }
 0x796   :  { %v6135_v5 = vpack.c.bf16 %v2307_v57, %v2303_v38  ;;  %v2339_v38 = vld [vmem:[#allocation9 + $0x368] sm:$0xff]  ;;  %v2337_v57 = vld [vmem:[#allocation9 + $0x358] sm:$0xff] }
 0x798   :  { %4478 = vmatpush1.bf16.msra.mxu0 %v4477_v30  ;;  %4510 = vmatpush1.bf16.msra.mxu1 %v4509_v17  ;;  %v6137_v30 = vpack.c.bf16 %v2309_v45, %v2305_v41  ;;  %v6139_v17 = vpack.c.bf16 %v2306_v11, %v2302_v49  ;;  %v2341_v45 = vld [vmem:[#allocation9 + $0x378] sm:$0xff]  ;;  %v2334_v49 = vld [vmem:[#allocation9 + $0x340] sm:$0xff] }
 0x799   :  { %4480 = vmatprep.subr.bf16.mxu0 %v4479_v8  ;;  %4512 = vmatprep.subr.bf16.mxu1 %v4511_v34  ;;  %v6142_v8 = vpack.c.bf16 %v2308_v24, %v2304_v28  ;;  %v2311_v34 = vld [vmem:[#allocation9 + $0x288] sm:$0xff]  ;;  %v2338_v11 = vld [vmem:[#allocation9 + $0x360] sm:$0xff]  ;;  %v6185_v28 = vpack.c.bf16 %v2341_v45, %v2337_v57 }
 0x79a   :  { %v6147_v53 = vpack.c.bf16 %v2315_v47, %v2311_v34  ;;  %v6187_v24 = vpack.c.bf16 %v2338_v11, %v2334_v49  ;;  %v2336_v34 = vld [vmem:[#allocation9 + $0x350] sm:$0xff] }
 0x79b   :  { %v2340_v47 = vld [vmem:[#allocation9 + $0x370] sm:$0xff] }
 0x79c   :  { %4482 = vmatpush1.bf16.msra.mxu0 %v4481_v3  ;;  %4514 = vmatpush1.bf16.msra.mxu1 %v4513_v6  ;;  %v6149_v3 = vpack.c.bf16 %v2317_v56, %v2313_v50  ;;  %v6151_v6 = vpack.c.bf16 %v2314_v63, %v2310_v60  ;;  %v6190_v50 = vpack.c.bf16 %v2340_v47, %v2336_v34  ;;  %v2343_v56 = vld [vmem:[#allocation9 + $0x388] sm:$0xff]  ;;  %v2345_v63 = vld [vmem:[#allocation9 + $0x398] sm:$0xff] }
 0x79d   :  { %4484 = vmatprep.subr.bf16.mxu0 %v4483_v16  ;;  %4516 = vmatprep.subr.bf16.mxu1 %v4515_v19  ;;  %v6154_v16 = vpack.c.bf16 %v2316_v13, %v2312_v10  ;;  %v2319_v19 = vld [vmem:[#allocation9 + $0x2c8] sm:$0xff]  ;;  %v2349_v13 = vld [vmem:[#allocation9 + $0x3b8] sm:$0xff] }
 0x79e   :  { %v6159_v29 = vpack.c.bf16 %v2323_v23, %v2319_v19  ;;  %v2347_v60 = vld [vmem:[#allocation9 + $0x3a8] sm:$0xff]  ;;  %v2342_v19 = vld [vmem:[#allocation9 + $0x380] sm:$0xff] }
 0x79f   :  { %v6195_v10 = vpack.c.bf16 %v2347_v60, %v2343_v56  ;;  %v2346_v23 = vld [vmem:[#allocation9 + $0x3a0] sm:$0xff] }
 0x7a0   :  { %4486 = vmatpush1.bf16.msra.mxu0 %v4485_v44  ;;  %4518 = vmatpush1.bf16.msra.mxu1 %v4517_v48  ;;  %v6161_v44 = vpack.c.bf16 %v2325_v32, %v2321_v26  ;;  %v6163_v48 = vpack.c.bf16 %v2322_v40, %v2318_v36  ;;  %v6197_v26 = vpack.c.bf16 %v2349_v13, %v2345_v63  ;;  %v2344_v36 = vld [vmem:[#allocation9 + $0x390] sm:$0xff] }
 0x7a1   :  { %4488 = vmatprep.subr.bf16.mxu0 %v4487_v58  ;;  %4520 = vmatprep.subr.bf16.mxu1 %v4519_v62  ;;  %v2324_v58 = vld [vmem:[#allocation9 + $0x2f0] sm:$0xff]  ;;  %v6199_v32 = vpack.c.bf16 %v2346_v23, %v2342_v19 }
 0x7a2   :  { %v6166_v62 = vpack.c.bf16 %v2324_v58, %v2320_v54  ;;  %v2348_v40 = vld [vmem:[#allocation9 + $0x3b0] sm:$0xff]  ;;  %v2351_v58 = vld [vmem:[#allocation9 + $0x3c8] sm:$0xff] }
 0x7a3   :  { %v6202_v54 = vpack.c.bf16 %v2348_v40, %v2344_v36 }
 0x7a4   :  { %4490 = vmatpush1.bf16.msra.mxu0 %v4489_v18  ;;  %4522 = vmatpush1.bf16.msra.mxu1 %v4521_v22  ;;  %v6171_v18 = vpack.c.bf16 %v2331_v9, %v2327_v4  ;;  %v2333_v22 = vld [vmem:[#allocation9 + $0x338] sm:$0xff]  ;;  %v2355_v4 = vld [vmem:[#allocation9 + $0x3e8] sm:$0xff] }
 0x7a5   :  { %v2353_v9 = vld [vmem:[#allocation9 + $0x3d8] sm:$0xff] }
 0x7a7   :  { %2100 = vmatmul.mubr.f32.vlgmr.msra.gmra.mrb[16].mxu0 %v5815_v51  ;;  %2213 = vmatmul.mubr.f32.vlgmr.msra.gmra.mrb[16].mxu1 %v5815_v51  ;;  %v2295_v51 = vld [vmem:[#allocation9 + $0x208] sm:$0xff] }
 0x7a8   :  { %2105 = vmatprep.mubr.f32.mxu0 %v5500_v0  ;;  %2218 = vmatprep.mubr.f32.mxu1 %v5500_v0 }
 0x7ab   :  { %2106 = vmatmul.mubr.f32.gmra.mrb[18].mxu0 %v5861_v7  ;;  %2219 = vmatmul.mubr.f32.gmra.mrb[18].mxu1 %v5861_v7  ;;  %v2299_v7 = vld [vmem:[#allocation9 + $0x228] sm:$0xff] }
 0x7ac   :  { %2111 = vmatprep.mubr.f32.mxu0 %v5500_v0  ;;  %2224 = vmatprep.mubr.f32.mxu1 %v5500_v0 }
 0x7af   :  { %2112 = vmatmul.mubr.f32.gmra.mrb[20].mxu0 %v5907_v20  ;;  %2225 = vmatmul.mubr.f32.gmra.mrb[20].mxu1 %v5907_v20  ;;  %v2297_v20 = vld [vmem:[#allocation9 + $0x218] sm:$0xff] }
 0x7b0   :  { %2117 = vmatprep.mubr.f32.mxu0 %v5500_v0  ;;  %2230 = vmatprep.mubr.f32.mxu1 %v5500_v0 }
 0x7b3   :  { %2118 = vmatmul.mubr.f32.gmra.mrb[22].mxu0 %v5953_v46  ;;  %2231 = vmatmul.mubr.f32.gmra.mrb[22].mxu1 %v5953_v46  ;;  %v6123_v46 = vpack.c.bf16 %v2299_v7, %v2295_v51  ;;  %v2326_v51 = vld [vmem:[#allocation9 + $0x300] sm:$0xff] }
 0x7b4   :  { %2123 = vmatprep.mubr.f32.mxu0 %v5500_v0  ;;  %2236 = vmatprep.mubr.f32.mxu1 %v5500_v0  ;;  %v2330_v7 = vld [vmem:[#allocation9 + $0x320] sm:$0xff] }
 0x7b5   :  { %4524 = vmatprep.subr.bf16.mxu0 %v6123_v46 }
 0x7b7   :  { %2124 = vmatmul.mubr.f32.gmra.mrb[24].mxu0 %v5999_v12  ;;  %2237 = vmatmul.mubr.f32.gmra.mrb[24].mxu1 %v5999_v12  ;;  %v2301_v12 = vld [vmem:[#allocation9 + $0x238] sm:$0xff] }
 0x7b8   :  { %2129 = vmatprep.mubr.f32.mxu0 %v5500_v0  ;;  %2242 = vmatprep.mubr.f32.mxu1 %v5500_v0  ;;  %v6125_v55 = vpack.c.bf16 %v2301_v12, %v2297_v20  ;;  %v6173_v20 = vpack.c.bf16 %v2333_v22, %v2329_v14  ;;  %v6175_v12 = vpack.c.bf16 %v2330_v7, %v2326_v51  ;;  %v2357_v22 = vld [vmem:[#allocation9 + $0x3f8] sm:$0xff]  ;;  %v2350_v51 = vld [vmem:[#allocation9 + $0x3c0] sm:$0xff] }
 0x7b9   :  { %v6207_v14 = vpack.c.bf16 %v2355_v4, %v2351_v58  ;;  %v2354_v7 = vld [vmem:[#allocation9 + $0x3e0] sm:$0xff] }
 0x7ba   :  { %4556 = vmatprep.subr.bf16.mxu1 %v6125_v55 }
 0x7bb   :  { %2130 = vmatmul.mubr.f32.gmra.mrb[26].mxu0 %v6045_v21  ;;  %2243 = vmatmul.mubr.f32.gmra.mrb[26].mxu1 %v6045_v21  ;;  %v2298_v21 = vld [vmem:[#allocation9 + $0x220] sm:$0xff] }
 0x7bc   :  { %2135 = vmatprep.mubr.f32.mxu0 %v5500_v0  ;;  %2248 = vmatprep.mubr.f32.mxu1 %v5500_v0  ;;  %v6127_v42 = vpack.c.bf16 %v2298_v21, %v2294_v27  ;;  %v2328_v27 = vld [vmem:[#allocation9 + $0x310] sm:$0xff] }
 0x7bd   :  { %v2332_v21 = vld [vmem:[#allocation9 + $0x330] sm:$0xff] }
 0x7be   :  { %4526 = vmatpush1.bf16.msra.mxu0 %v6127_v42 }
 0x7bf   :  { %2136 = vmatmul.mubr.f32.gmra.mrb[28].mxu0 %v6089_v1  ;;  %2249 = vmatmul.mubr.f32.gmra.mrb[28].mxu1 %v6089_v1  ;;  %v6130_v1 = vpack.c.bf16 %v2300_v52, %v2296_v15  ;;  %v6178_v15 = vpack.c.bf16 %v2332_v21, %v2328_v27  ;;  %v2335_v52 = vld [vmem:[#allocation9 + $0x348] sm:$0xff]  ;;  %v6209_v27 = vpack.c.bf16 %v2357_v22, %v2353_v9 }
 0x7c0   :  { %2141 = vmatprep.mubr.f32.mxu0 %v5500_v0  ;;  %2254 = vmatprep.mubr.f32.mxu1 %v5500_v0  ;;  %v6183_v41 = vpack.c.bf16 %v2339_v38, %v2335_v52  ;;  %v6211_v21 = vpack.c.bf16 %v2354_v7, %v2350_v51  ;;  %v2352_v52 = vld [vmem:[#allocation9 + $0x3d0] sm:$0xff] }
 0x7c1   :  { %4558 = vmatpush1.bf16.msra.mxu1 %v6130_v1  ;;  %4528 = vmatprep.subr.bf16.mxu0 %v6135_v5  ;;  %v2356_v38 = vld [vmem:[#allocation9 + $0x3f0] sm:$0xff] }
 0x7c2   :  { %4560 = vmatprep.subr.bf16.mxu1 %v6137_v30  ;;  %4530 = vmatpush1.bf16.msra.mxu0 %v6139_v17  ;;  %v6214_v57 = vpack.c.bf16 %v2356_v38, %v2352_v52 }
 0x7c3   :  { %4532 = vmatprep.subr.bf16.mxu0 %v6147_v53 }
 0x7c5   :  { %4562 = vmatpush1.bf16.msra.mxu1 %v6142_v8 }
 0x7c6   :  { %4564 = vmatprep.subr.bf16.mxu1 %v6149_v3  ;;  %4534 = vmatpush1.bf16.msra.mxu0 %v6151_v6 }
 0x7c7   :  { %4536 = vmatprep.subr.bf16.mxu0 %v6159_v29 }
 0x7c9   :  { %4566 = vmatpush1.bf16.msra.mxu1 %v6154_v16 }
 0x7ca   :  { %4568 = vmatprep.subr.bf16.mxu1 %v6161_v44  ;;  %4538 = vmatpush1.bf16.msra.mxu0 %v6163_v48 }
 0x7cb   :  { %4540 = vmatprep.subr.bf16.mxu0 %v6171_v18 }
 0x7cd   :  { %4570 = vmatpush1.bf16.msra.mxu1 %v6166_v62 }
 0x7ce   :  { %4572 = vmatprep.subr.bf16.mxu1 %v6173_v20  ;;  %4542 = vmatpush1.bf16.msra.mxu0 %v6175_v12 }
 0x7cf   :  { %4544 = vmatprep.subr.bf16.mxu0 %v6183_v41 }
 0x7d1   :  { %4574 = vmatpush1.bf16.msra.mxu1 %v6178_v15 }
 0x7d2   :  { %4576 = vmatprep.subr.bf16.mxu1 %v6185_v28  ;;  %4546 = vmatpush1.bf16.msra.mxu0 %v6187_v24 }
 0x7d3   :  { %4548 = vmatprep.subr.bf16.mxu0 %v6195_v10 }
 0x7d5   :  { %4578 = vmatpush1.bf16.msra.mxu1 %v6190_v50 }
 0x7d6   :  { %4580 = vmatprep.subr.bf16.mxu1 %v6197_v26  ;;  %4550 = vmatpush1.bf16.msra.mxu0 %v6199_v32 }
 0x7d7   :  { %4552 = vmatprep.subr.bf16.mxu0 %v6207_v14 }
 0x7d9   :  { %4582 = vmatpush1.bf16.msra.mxu1 %v6202_v54 }
 0x7da   :  { %4584 = vmatprep.subr.bf16.mxu1 %v6209_v27  ;;  %4554 = vmatpush1.bf16.msra.mxu0 %v6211_v21 }
 0x7db   :  { %4588 = vmatprep.subr.bf16.mxu0 %v6123_v46 }
 0x7dd   :  { %4586 = vmatpush1.bf16.msra.mxu1 %v6214_v57 }
 0x7de   :  { %4620 = vmatprep.subr.bf16.mxu1 %v6125_v55 }
 0x85a   :  { %v1827_v45 = vpop.f32.mrb[14].mxu0  ;;  %v1898_v49 = vpop.f32.mrb[14].mxu1 }
 0x85b   :  { %v5049_v11 = vadd.f32 %v1827_v45, %v5789_v37  ;;  %v1829_v34 = vpop.f32.mrb[15].mxu0  ;;  %v1900_v47 = vpop.f32.mrb[15].mxu1  ;;  %v5065_v23 = vadd.f32 %v1898_v49, %v5806_v2  ;;  %v3847_v49 = vld [vmem:[%s6587_s6 + $0x4] sm:$0xf] }
 0x85c   :  { %v5050_v56 = vadd.f32 %v1829_v34, %v5793_v39  ;;  %v5066_v13 = vadd.f32 %v1900_v47, %v5800_v59  ;;  %v6280_v34 = vrot.slane %v3847_v49, %v150_v35  ;;  %v6291_v35 = vrot.slane %v3847_v49, %v154_v61 }
 0x85d   :  { %v3843_v60 = vmul.f32 -1.442695, %v5049_v11  ;;  %v6276_v11 = vrot.slane %v3847_v49, %v146_v33 }
 0x85e   :  { %v3844_v63 = vmul.f32 -1.442695, %v5050_v56  ;;  %v3845_v19 = vmul.f32 -1.442695, %v5066_v13 }
 0x85f   :  { %5281 = vpow2.f32 %v3843_v60 }
 0x860   :  { %5283 = vpow2.f32 %v3844_v63 }
 0x861   :  { %5285 = vpow2.f32 %v3845_v19 }
 0x862   :  { %5287 = vtanh.f32 %v5065_v23 }
 0x869   :  { %v5282_v36 = vpop.eup %5281 }
 0x86a   :  { %v5284_v40 = vpop.eup %5283  ;;  %v1910_v58 = vadd.f32 1.0, %v5282_v36 }
 0x86b   :  { %v1916_v4 = vadd.f32 1.0, %v5284_v40  ;;  %v5286_v37 = vpop.eup %5285  ;;  %v6286_v40 = vrot.slane %v3847_v49, %v158_v43 }
 0x86c   :  { %5289 = vrcp.f32 %v1910_v58  ;;  %v5288_v9 = vpop.eup %5287  ;;  %v1923_v7 = vadd.f32 1.0, %v5286_v37 }
 0x86d   :  { %5291 = vrcp.f32 %v1916_v4 }
 0x86e   :  { %5293 = vrcp.f32 %v1923_v7  ;;  %v3849_v7 = vld [vmem:[%s6583_s2 + $0x8] sm:$0xff] }
 0x876   :  { %v5290_v39 = vpop.eup %5289 }
 0x877   :  { %v5292_v22 = vpop.eup %5291  ;;  %v1928_v51 = vmul.f32 %v5290_v39, %v5288_v9 }
 0x878   :  { %v1927_v52 = vmul.f32 %v5292_v22, %v6086_v25  ;;  %v5294_v2 = vpop.eup %5293  ;;  %v3848_v25 = vld [vmem:[%s6582_s1 + $0x8] sm:$0xff] }
 0x87a   :  { %v1929_v59 = vadd.f32 %v1928_v51, %v1927_v52 }
 0x87c   :  { %5295 = vtanh.f32 %v1929_v59  ;;  %1939 = vst [vmem:[%s6590_s9] sm:$0xff] %v1929_v59 }
 0x886   :  { %v5296_v38 = vpop.eup %5295 }
 0x887   :  { %v1931_v45 = vmul.f32 %v5296_v38, %v5294_v2 }
 0x889   :  { %1937 = vst [vmem:[%s6589_s8] sm:$0xff] %v1931_v45  ;;  %2142 = vmatmul.mubr.f32.gmra.mrb[30].mxu0 %v1931_v45  ;;  %2255 = vmatmul.mubr.f32.gmra.mrb[30].mxu1 %v1931_v45 }
 0x88a   :  { %2433 = vmatprep.mubr.f32.mxu0 %v5500_v0  ;;  %2504 = vmatprep.mubr.f32.mxu1 %v5500_v0 }
 0x88d   :  { %2434 = vmatmul.mubr.f32.vlgmr.msra.gmra.mrb[16].mxu0 %v3848_v25  ;;  %2505 = vmatmul.mubr.f32.vlgmr.msra.gmra.mrb[16].mxu1 %v3848_v25 }
 0x88e   :  { %4590 = vmatpush1.bf16.msra.mxu0 %v6127_v42  ;;  %4622 = vmatpush1.bf16.msra.mxu1 %v6130_v1 }
 0x88f   :  { %4592 = vmatprep.subr.bf16.mxu0 %v6135_v5  ;;  %4624 = vmatprep.subr.bf16.mxu1 %v6137_v30 }
 0x890   :  { %2612 = vmatprep.mubr.f32.mxu0 %v5500_v0  ;;  %2683 = vmatprep.mubr.f32.mxu1 %v5500_v0 }
 0x892   :  { %4594 = vmatpush1.bf16.msra.mxu0 %v6139_v17  ;;  %4626 = vmatpush1.bf16.msra.mxu1 %v6142_v8 }
 0x893   :  { %4596 = vmatprep.subr.bf16.mxu0 %v6147_v53  ;;  %4628 = vmatprep.subr.bf16.mxu1 %v6149_v3 }
 0x896   :  { %4598 = vmatpush1.bf16.msra.mxu0 %v6151_v6  ;;  %4630 = vmatpush1.bf16.msra.mxu1 %v6154_v16 }
 0x897   :  { %4600 = vmatprep.subr.bf16.mxu0 %v6159_v29  ;;  %4632 = vmatprep.subr.bf16.mxu1 %v6161_v44 }
 0x89a   :  { %4602 = vmatpush1.bf16.msra.mxu0 %v6163_v48  ;;  %4634 = vmatpush1.bf16.msra.mxu1 %v6166_v62 }
 0x89b   :  { %4604 = vmatprep.subr.bf16.mxu0 %v6171_v18  ;;  %4636 = vmatprep.subr.bf16.mxu1 %v6173_v20 }
 0x89e   :  { %4606 = vmatpush1.bf16.msra.mxu0 %v6175_v12  ;;  %4638 = vmatpush1.bf16.msra.mxu1 %v6178_v15 }
 0x89f   :  { %4608 = vmatprep.subr.bf16.mxu0 %v6183_v41  ;;  %4640 = vmatprep.subr.bf16.mxu1 %v6185_v28 }
 0x8a2   :  { %4610 = vmatpush1.bf16.msra.mxu0 %v6187_v24  ;;  %4642 = vmatpush1.bf16.msra.mxu1 %v6190_v50 }
 0x8a3   :  { %4612 = vmatprep.subr.bf16.mxu0 %v6195_v10  ;;  %4644 = vmatprep.subr.bf16.mxu1 %v6197_v26 }
 0x8a6   :  { %4614 = vmatpush1.bf16.msra.mxu0 %v6199_v32  ;;  %4646 = vmatpush1.bf16.msra.mxu1 %v6202_v54 }
 0x8a7   :  { %4616 = vmatprep.subr.bf16.mxu0 %v6207_v14  ;;  %4648 = vmatprep.subr.bf16.mxu1 %v6209_v27 }
 0x8aa   :  { %4618 = vmatpush1.bf16.msra.mxu0 %v6211_v21  ;;  %4650 = vmatpush1.bf16.msra.mxu1 %v6214_v57 }
 0x8ab   :  { %4652 = vmatprep.subr.bf16.mxu0 %v6123_v46  ;;  %4684 = vmatprep.subr.bf16.mxu1 %v6125_v55 }
 0x960   :  { %v2435_v47 = vpop.f32.mrb[16].mxu0  ;;  %v2506_v56 = vpop.f32.mrb[16].mxu1 }
 0x961   :  { %v5067_v60 = vadd.f32 %v2435_v47, %v6276_v11  ;;  %v2437_v63 = vpop.f32.mrb[17].mxu0  ;;  %v2508_v13 = vpop.f32.mrb[17].mxu1  ;;  %v5083_v4 = vadd.f32 %v2506_v56, %v6291_v35 }
 0x962   :  { %v5068_v19 = vadd.f32 %v2437_v63, %v6280_v34  ;;  %v5084_v33 = vadd.f32 %v2508_v13, %v6286_v40 }
 0x963   :  { %v3850_v23 = vmul.f32 -1.442695, %v5067_v60 }
 0x964   :  { %v3851_v36 = vmul.f32 -1.442695, %v5068_v19  ;;  %v3852_v58 = vmul.f32 -1.442695, %v5084_v33 }
 0x965   :  { %5297 = vpow2.f32 %v3850_v23 }
 0x966   :  { %5299 = vpow2.f32 %v3851_v36 }
 0x967   :  { %5301 = vpow2.f32 %v3852_v58 }
 0x968   :  { %5303 = vtanh.f32 %v5083_v4 }
 0x96f   :  { %v5298_v37 = vpop.eup %5297 }
 0x970   :  { %v5300_v9 = vpop.eup %5299  ;;  %v2518_v39 = vadd.f32 1.0, %v5298_v37 }
 0x971   :  { %v2524_v22 = vadd.f32 1.0, %v5300_v9  ;;  %v5302_v43 = vpop.eup %5301 }
 0x972   :  { %5305 = vrcp.f32 %v2518_v39  ;;  %v5304_v51 = vpop.eup %5303  ;;  %v2531_v59 = vadd.f32 1.0, %v5302_v43 }
 0x973   :  { %5307 = vrcp.f32 %v2524_v22 }
 0x974   :  { %5309 = vrcp.f32 %v2531_v59 }
 0x97c   :  { %v5306_v31 = vpop.eup %5305 }
 0x97d   :  { %v5308_v61 = vpop.eup %5307  ;;  %v2536_v52 = vmul.f32 %v5306_v31, %v5304_v51 }
 0x97e   :  { %v2535_v2 = vmul.f32 %v5308_v61, %v3849_v7  ;;  %v5310_v45 = vpop.eup %5309 }
 0x980   :  { %v6297_v38 = vadd.f32 %v2536_v52, %v2535_v2 }
 0x982   :  { %5311 = vtanh.f32 %v6297_v38 }
 0x98c   :  { %v5312_v25 = vpop.eup %5311 }
 0x98d   :  { %v2539_v49 = vmul.f32 %v5312_v25, %v5310_v45 }
 0x98f   :  { %2542 = vst [vmem:[%s6588_s7] sm:$0xff] %v2539_v49  ;;  %2613 = vmatmul.mubr.f32.vlgmr.msra.gmra.mrb[18].mxu0 %v2539_v49  ;;  %2684 = vmatmul.mubr.f32.vlgmr.msra.gmra.mrb[18].mxu1 %v2539_v49 }
 0x990   :  { %4654 = vmatpush1.bf16.msra.mxu0 %v6127_v42  ;;  %4686 = vmatpush1.bf16.msra.mxu1 %v6130_v1 }
 0x991   :  { %4656 = vmatprep.subr.bf16.mxu0 %v6135_v5  ;;  %4688 = vmatprep.subr.bf16.mxu1 %v6137_v30 }
 0x992   :  { %2791 = vmatprep.mubr.f32.mxu0 %v5500_v0  ;;  %2862 = vmatprep.mubr.f32.mxu1 %v5500_v0 }
 0x994   :  { %4658 = vmatpush1.bf16.msra.mxu0 %v6139_v17  ;;  %4690 = vmatpush1.bf16.msra.mxu1 %v6142_v8 }
 0x995   :  { %4660 = vmatprep.subr.bf16.mxu0 %v6147_v53  ;;  %4692 = vmatprep.subr.bf16.mxu1 %v6149_v3 }
 0x998   :  { %4662 = vmatpush1.bf16.msra.mxu0 %v6151_v6  ;;  %4694 = vmatpush1.bf16.msra.mxu1 %v6154_v16 }
 0x999   :  { %4664 = vmatprep.subr.bf16.mxu0 %v6159_v29  ;;  %4696 = vmatprep.subr.bf16.mxu1 %v6161_v44 }
 0x99c   :  { %4666 = vmatpush1.bf16.msra.mxu0 %v6163_v48  ;;  %4698 = vmatpush1.bf16.msra.mxu1 %v6166_v62 }
 0x99d   :  { %4668 = vmatprep.subr.bf16.mxu0 %v6171_v18  ;;  %4700 = vmatprep.subr.bf16.mxu1 %v6173_v20 }
 0x9a0   :  { %4670 = vmatpush1.bf16.msra.mxu0 %v6175_v12  ;;  %4702 = vmatpush1.bf16.msra.mxu1 %v6178_v15 }
 0x9a1   :  { %4672 = vmatprep.subr.bf16.mxu0 %v6183_v41  ;;  %4704 = vmatprep.subr.bf16.mxu1 %v6185_v28 }
 0x9a4   :  { %4674 = vmatpush1.bf16.msra.mxu0 %v6187_v24  ;;  %4706 = vmatpush1.bf16.msra.mxu1 %v6190_v50 }
 0x9a5   :  { %4676 = vmatprep.subr.bf16.mxu0 %v6195_v10  ;;  %4708 = vmatprep.subr.bf16.mxu1 %v6197_v26 }
 0x9a8   :  { %4678 = vmatpush1.bf16.msra.mxu0 %v6199_v32  ;;  %4710 = vmatpush1.bf16.msra.mxu1 %v6202_v54 }
 0x9a9   :  { %4680 = vmatprep.subr.bf16.mxu0 %v6207_v14  ;;  %4712 = vmatprep.subr.bf16.mxu1 %v6209_v27 }
 0x9ac   :  { %4682 = vmatpush1.bf16.msra.mxu0 %v6211_v21  ;;  %4714 = vmatpush1.bf16.msra.mxu1 %v6214_v57 }
 0x9ad   :  { %4716 = vmatprep.subr.bf16.mxu0 %v6123_v46  ;;  %4748 = vmatprep.subr.bf16.mxu1 %v6125_v55 }
 0xa62   :  { %v2614_v47 = vpop.f32.mrb[18].mxu0  ;;  %v2685_v56 = vpop.f32.mrb[18].mxu1 }
 0xa63   :  { %v5069_v60 = vadd.f32 %v2614_v47, %v6276_v11  ;;  %v2616_v63 = vpop.f32.mrb[19].mxu0  ;;  %v2687_v13 = vpop.f32.mrb[19].mxu1  ;;  %v5085_v4 = vadd.f32 %v2685_v56, %v6291_v35 }
 0xa64   :  { %v5070_v19 = vadd.f32 %v2616_v63, %v6280_v34  ;;  %v5086_v33 = vadd.f32 %v2687_v13, %v6286_v40 }
 0xa65   :  { %v3853_v23 = vmul.f32 -1.442695, %v5069_v60 }
 0xa66   :  { %v3854_v36 = vmul.f32 -1.442695, %v5070_v19  ;;  %v3855_v58 = vmul.f32 -1.442695, %v5086_v33 }
 0xa67   :  { %5313 = vpow2.f32 %v3853_v23 }
 0xa68   :  { %5315 = vpow2.f32 %v3854_v36 }
 0xa69   :  { %5317 = vpow2.f32 %v3855_v58 }
 0xa6a   :  { %5319 = vtanh.f32 %v5085_v4 }
 0xa71   :  { %v5314_v37 = vpop.eup %5313 }
 0xa72   :  { %v5316_v9 = vpop.eup %5315  ;;  %v2697_v39 = vadd.f32 1.0, %v5314_v37 }
 0xa73   :  { %v2703_v22 = vadd.f32 1.0, %v5316_v9  ;;  %v5318_v43 = vpop.eup %5317 }
 0xa74   :  { %5321 = vrcp.f32 %v2697_v39  ;;  %v5320_v51 = vpop.eup %5319  ;;  %v2710_v52 = vadd.f32 1.0, %v5318_v43 }
 0xa75   :  { %5323 = vrcp.f32 %v2703_v22 }
 0xa76   :  { %5325 = vrcp.f32 %v2710_v52 }
 0xa7e   :  { %v5322_v7 = vpop.eup %5321 }
 0xa7f   :  { %v5324_v31 = vpop.eup %5323  ;;  %v2715_v61 = vmul.f32 %v5322_v7, %v5320_v51 }
 0xa80   :  { %v2714_v59 = vmul.f32 %v5324_v31, %v6297_v38  ;;  %v5326_v45 = vpop.eup %5325 }
 0xa82   :  { %v6342_v2 = vadd.f32 %v2715_v61, %v2714_v59 }
 0xa84   :  { %5327 = vtanh.f32 %v6342_v2 }
 0xa8e   :  { %v5328_v25 = vpop.eup %5327 }
 0xa8f   :  { %v2718_v49 = vmul.f32 %v5328_v25, %v5326_v45 }
 0xa91   :  { %3856 = vst [vmem:[%s6588_s7 + $0x8] sm:$0xff] %v2718_v49  ;;  %2792 = vmatmul.mubr.f32.vlgmr.msra.gmra.mrb[20].mxu0 %v2718_v49  ;;  %2863 = vmatmul.mubr.f32.vlgmr.msra.gmra.mrb[20].mxu1 %v2718_v49 }
 0xa92   :  { %4718 = vmatpush1.bf16.msra.mxu0 %v6127_v42  ;;  %4750 = vmatpush1.bf16.msra.mxu1 %v6130_v1 }
 0xa93   :  { %4720 = vmatprep.subr.bf16.mxu0 %v6135_v5  ;;  %4752 = vmatprep.subr.bf16.mxu1 %v6137_v30 }
 0xa94   :  { %2970 = vmatprep.mubr.f32.mxu0 %v5500_v0  ;;  %3041 = vmatprep.mubr.f32.mxu1 %v5500_v0 }
 0xa96   :  { %4722 = vmatpush1.bf16.msra.mxu0 %v6139_v17  ;;  %4754 = vmatpush1.bf16.msra.mxu1 %v6142_v8 }
 0xa97   :  { %4724 = vmatprep.subr.bf16.mxu0 %v6147_v53  ;;  %4756 = vmatprep.subr.bf16.mxu1 %v6149_v3 }
 0xa9a   :  { %4726 = vmatpush1.bf16.msra.mxu0 %v6151_v6  ;;  %4758 = vmatpush1.bf16.msra.mxu1 %v6154_v16 }
 0xa9b   :  { %4728 = vmatprep.subr.bf16.mxu0 %v6159_v29  ;;  %4760 = vmatprep.subr.bf16.mxu1 %v6161_v44 }
 0xa9e   :  { %4730 = vmatpush1.bf16.msra.mxu0 %v6163_v48  ;;  %4762 = vmatpush1.bf16.msra.mxu1 %v6166_v62 }
 0xa9f   :  { %4732 = vmatprep.subr.bf16.mxu0 %v6171_v18  ;;  %4764 = vmatprep.subr.bf16.mxu1 %v6173_v20 }
 0xaa2   :  { %4734 = vmatpush1.bf16.msra.mxu0 %v6175_v12  ;;  %4766 = vmatpush1.bf16.msra.mxu1 %v6178_v15 }
 0xaa3   :  { %4736 = vmatprep.subr.bf16.mxu0 %v6183_v41  ;;  %4768 = vmatprep.subr.bf16.mxu1 %v6185_v28 }
 0xaa6   :  { %4738 = vmatpush1.bf16.msra.mxu0 %v6187_v24  ;;  %4770 = vmatpush1.bf16.msra.mxu1 %v6190_v50 }
 0xaa7   :  { %4740 = vmatprep.subr.bf16.mxu0 %v6195_v10  ;;  %4772 = vmatprep.subr.bf16.mxu1 %v6197_v26 }
 0xaaa   :  { %4742 = vmatpush1.bf16.msra.mxu0 %v6199_v32  ;;  %4774 = vmatpush1.bf16.msra.mxu1 %v6202_v54 }
 0xaab   :  { %4744 = vmatprep.subr.bf16.mxu0 %v6207_v14  ;;  %4776 = vmatprep.subr.bf16.mxu1 %v6209_v27 }
 0xaae   :  { %4746 = vmatpush1.bf16.msra.mxu0 %v6211_v21  ;;  %4778 = vmatpush1.bf16.msra.mxu1 %v6214_v57 }
 0xaaf   :  { %4780 = vmatprep.subr.bf16.mxu0 %v6123_v46  ;;  %4812 = vmatprep.subr.bf16.mxu1 %v6125_v55 }
 0xb64   :  { %v2793_v38 = vpop.f32.mrb[20].mxu0  ;;  %v2864_v47 = vpop.f32.mrb[20].mxu1 }
 0xb65   :  { %v5071_v56 = vadd.f32 %v2793_v38, %v6276_v11  ;;  %v2795_v60 = vpop.f32.mrb[21].mxu0  ;;  %v2866_v63 = vpop.f32.mrb[21].mxu1  ;;  %v5087_v58 = vadd.f32 %v2864_v47, %v6291_v35 }
 0xb66   :  { %v5072_v13 = vadd.f32 %v2795_v60, %v6280_v34  ;;  %v5088_v36 = vadd.f32 %v2866_v63, %v6286_v40 }
 0xb67   :  { %v3857_v19 = vmul.f32 -1.442695, %v5071_v56 }
 0xb68   :  { %v3858_v23 = vmul.f32 -1.442695, %v5072_v13  ;;  %v3859_v33 = vmul.f32 -1.442695, %v5088_v36 }
 0xb69   :  { %5329 = vpow2.f32 %v3857_v19 }
 0xb6a   :  { %5331 = vpow2.f32 %v3858_v23 }
 0xb6b   :  { %5333 = vpow2.f32 %v3859_v33 }
 0xb6c   :  { %5335 = vtanh.f32 %v5087_v58 }
 0xb73   :  { %v5330_v4 = vpop.eup %5329 }
 0xb74   :  { %v5332_v37 = vpop.eup %5331  ;;  %v2876_v9 = vadd.f32 1.0, %v5330_v4 }
 0xb75   :  { %v2882_v39 = vadd.f32 1.0, %v5332_v37  ;;  %v5334_v22 = vpop.eup %5333 }
 0xb76   :  { %5337 = vrcp.f32 %v2876_v9  ;;  %v5336_v43 = vpop.eup %5335  ;;  %v2889_v61 = vadd.f32 1.0, %v5334_v22 }
 0xb77   :  { %5339 = vrcp.f32 %v2882_v39 }
 0xb78   :  { %5341 = vrcp.f32 %v2889_v61 }
 0xb80   :  { %v5338_v51 = vpop.eup %5337 }
 0xb81   :  { %v5340_v7 = vpop.eup %5339  ;;  %v2894_v31 = vmul.f32 %v5338_v51, %v5336_v43 }
 0xb82   :  { %v2893_v52 = vmul.f32 %v5340_v7, %v6342_v2  ;;  %v5342_v45 = vpop.eup %5341 }
 0xb84   :  { %v6387_v59 = vadd.f32 %v2894_v31, %v2893_v52 }
 0xb86   :  { %5343 = vtanh.f32 %v6387_v59 }
 0xb90   :  { %v5344_v25 = vpop.eup %5343 }
 0xb91   :  { %v2897_v49 = vmul.f32 %v5344_v25, %v5342_v45 }
 0xb93   :  { %3860 = vst [vmem:[%s6588_s7 + $0x10] sm:$0xff] %v2897_v49  ;;  %2971 = vmatmul.mubr.f32.vlgmr.msra.gmra.mrb[22].mxu0 %v2897_v49  ;;  %3042 = vmatmul.mubr.f32.vlgmr.msra.gmra.mrb[22].mxu1 %v2897_v49 }
 0xb94   :  { %4782 = vmatpush1.bf16.msra.mxu0 %v6127_v42  ;;  %4814 = vmatpush1.bf16.msra.mxu1 %v6130_v1 }
 0xb95   :  { %4784 = vmatprep.subr.bf16.mxu0 %v6135_v5  ;;  %4816 = vmatprep.subr.bf16.mxu1 %v6137_v30 }
 0xb96   :  { %3149 = vmatprep.mubr.f32.mxu0 %v5500_v0  ;;  %3220 = vmatprep.mubr.f32.mxu1 %v5500_v0 }
 0xb98   :  { %4786 = vmatpush1.bf16.msra.mxu0 %v6139_v17  ;;  %4818 = vmatpush1.bf16.msra.mxu1 %v6142_v8 }
 0xb99   :  { %4788 = vmatprep.subr.bf16.mxu0 %v6147_v53  ;;  %4820 = vmatprep.subr.bf16.mxu1 %v6149_v3 }
 0xb9c   :  { %4790 = vmatpush1.bf16.msra.mxu0 %v6151_v6  ;;  %4822 = vmatpush1.bf16.msra.mxu1 %v6154_v16 }
 0xb9d   :  { %4792 = vmatprep.subr.bf16.mxu0 %v6159_v29  ;;  %4824 = vmatprep.subr.bf16.mxu1 %v6161_v44 }
 0xba0   :  { %4794 = vmatpush1.bf16.msra.mxu0 %v6163_v48  ;;  %4826 = vmatpush1.bf16.msra.mxu1 %v6166_v62 }
 0xba1   :  { %4796 = vmatprep.subr.bf16.mxu0 %v6171_v18  ;;  %4828 = vmatprep.subr.bf16.mxu1 %v6173_v20 }
 0xba4   :  { %4798 = vmatpush1.bf16.msra.mxu0 %v6175_v12  ;;  %4830 = vmatpush1.bf16.msra.mxu1 %v6178_v15 }
 0xba5   :  { %4800 = vmatprep.subr.bf16.mxu0 %v6183_v41  ;;  %4832 = vmatprep.subr.bf16.mxu1 %v6185_v28 }
 0xba8   :  { %4802 = vmatpush1.bf16.msra.mxu0 %v6187_v24  ;;  %4834 = vmatpush1.bf16.msra.mxu1 %v6190_v50 }
 0xba9   :  { %4804 = vmatprep.subr.bf16.mxu0 %v6195_v10  ;;  %4836 = vmatprep.subr.bf16.mxu1 %v6197_v26 }
 0xbac   :  { %4806 = vmatpush1.bf16.msra.mxu0 %v6199_v32  ;;  %4838 = vmatpush1.bf16.msra.mxu1 %v6202_v54 }
 0xbad   :  { %4808 = vmatprep.subr.bf16.mxu0 %v6207_v14  ;;  %4840 = vmatprep.subr.bf16.mxu1 %v6209_v27 }
 0xbb0   :  { %4810 = vmatpush1.bf16.msra.mxu0 %v6211_v21  ;;  %4842 = vmatpush1.bf16.msra.mxu1 %v6214_v57 }
 0xbb1   :  { %4844 = vmatprep.subr.bf16.mxu0 %v6123_v46  ;;  %4876 = vmatprep.subr.bf16.mxu1 %v6125_v55 }
 0xc66   :  { %v2972_v2 = vpop.f32.mrb[22].mxu0  ;;  %v3043_v38 = vpop.f32.mrb[22].mxu1 }
 0xc67   :  { %v5073_v47 = vadd.f32 %v2972_v2, %v6276_v11  ;;  %v2974_v56 = vpop.f32.mrb[23].mxu0  ;;  %v3045_v60 = vpop.f32.mrb[23].mxu1  ;;  %v5089_v33 = vadd.f32 %v3043_v38, %v6291_v35 }
 0xc68   :  { %v5074_v63 = vadd.f32 %v2974_v56, %v6280_v34  ;;  %v5090_v23 = vadd.f32 %v3045_v60, %v6286_v40 }
 0xc69   :  { %v3861_v13 = vmul.f32 -1.442695, %v5073_v47 }
 0xc6a   :  { %v3862_v19 = vmul.f32 -1.442695, %v5074_v63  ;;  %v3863_v36 = vmul.f32 -1.442695, %v5090_v23 }
 0xc6b   :  { %5345 = vpow2.f32 %v3861_v13 }
 0xc6c   :  { %5347 = vpow2.f32 %v3862_v19 }
 0xc6d   :  { %5349 = vpow2.f32 %v3863_v36 }
 0xc6e   :  { %5351 = vtanh.f32 %v5089_v33 }
 0xc75   :  { %v5346_v58 = vpop.eup %5345 }
 0xc76   :  { %v5348_v4 = vpop.eup %5347  ;;  %v3055_v37 = vadd.f32 1.0, %v5346_v58 }
 0xc77   :  { %v3061_v9 = vadd.f32 1.0, %v5348_v4  ;;  %v5350_v39 = vpop.eup %5349 }
 0xc78   :  { %5353 = vrcp.f32 %v3055_v37  ;;  %v5352_v22 = vpop.eup %5351  ;;  %v3068_v31 = vadd.f32 1.0, %v5350_v39 }
 0xc79   :  { %5355 = vrcp.f32 %v3061_v9 }
 0xc7a   :  { %5357 = vrcp.f32 %v3068_v31 }
 0xc82   :  { %v5354_v43 = vpop.eup %5353 }
 0xc83   :  { %v5356_v51 = vpop.eup %5355  ;;  %v3073_v7 = vmul.f32 %v5354_v43, %v5352_v22 }
 0xc84   :  { %v3072_v61 = vmul.f32 %v5356_v51, %v6387_v59  ;;  %v5358_v45 = vpop.eup %5357 }
 0xc86   :  { %v6432_v52 = vadd.f32 %v3073_v7, %v3072_v61 }
 0xc88   :  { %5359 = vtanh.f32 %v6432_v52 }
 0xc92   :  { %v5360_v25 = vpop.eup %5359 }
 0xc93   :  { %v3076_v49 = vmul.f32 %v5360_v25, %v5358_v45 }
 0xc95   :  { %3864 = vst [vmem:[%s6588_s7 + $0x18] sm:$0xff] %v3076_v49  ;;  %3150 = vmatmul.mubr.f32.vlgmr.msra.gmra.mrb[24].mxu0 %v3076_v49  ;;  %3221 = vmatmul.mubr.f32.vlgmr.msra.gmra.mrb[24].mxu1 %v3076_v49 }
 0xc96   :  { %4846 = vmatpush1.bf16.msra.mxu0 %v6127_v42  ;;  %4878 = vmatpush1.bf16.msra.mxu1 %v6130_v1 }
 0xc97   :  { %4848 = vmatprep.subr.bf16.mxu0 %v6135_v5  ;;  %4880 = vmatprep.subr.bf16.mxu1 %v6137_v30 }
 0xc98   :  { %3328 = vmatprep.mubr.f32.mxu0 %v5500_v0  ;;  %3399 = vmatprep.mubr.f32.mxu1 %v5500_v0 }
 0xc9a   :  { %4850 = vmatpush1.bf16.msra.mxu0 %v6139_v17  ;;  %4882 = vmatpush1.bf16.msra.mxu1 %v6142_v8 }
 0xc9b   :  { %4852 = vmatprep.subr.bf16.mxu0 %v6147_v53  ;;  %4884 = vmatprep.subr.bf16.mxu1 %v6149_v3 }
 0xc9e   :  { %4854 = vmatpush1.bf16.msra.mxu0 %v6151_v6  ;;  %4886 = vmatpush1.bf16.msra.mxu1 %v6154_v16 }
 0xc9f   :  { %4856 = vmatprep.subr.bf16.mxu0 %v6159_v29  ;;  %4888 = vmatprep.subr.bf16.mxu1 %v6161_v44 }
 0xca2   :  { %4858 = vmatpush1.bf16.msra.mxu0 %v6163_v48  ;;  %4890 = vmatpush1.bf16.msra.mxu1 %v6166_v62 }
 0xca3   :  { %4860 = vmatprep.subr.bf16.mxu0 %v6171_v18  ;;  %4892 = vmatprep.subr.bf16.mxu1 %v6173_v20 }
 0xca6   :  { %4862 = vmatpush1.bf16.msra.mxu0 %v6175_v12  ;;  %4894 = vmatpush1.bf16.msra.mxu1 %v6178_v15 }
 0xca7   :  { %4864 = vmatprep.subr.bf16.mxu0 %v6183_v41  ;;  %4896 = vmatprep.subr.bf16.mxu1 %v6185_v28 }
 0xcaa   :  { %4866 = vmatpush1.bf16.msra.mxu0 %v6187_v24  ;;  %4898 = vmatpush1.bf16.msra.mxu1 %v6190_v50 }
 0xcab   :  { %4868 = vmatprep.subr.bf16.mxu0 %v6195_v10  ;;  %4900 = vmatprep.subr.bf16.mxu1 %v6197_v26 }
 0xcae   :  { %4870 = vmatpush1.bf16.msra.mxu0 %v6199_v32  ;;  %4902 = vmatpush1.bf16.msra.mxu1 %v6202_v54 }
 0xcaf   :  { %4872 = vmatprep.subr.bf16.mxu0 %v6207_v14  ;;  %4904 = vmatprep.subr.bf16.mxu1 %v6209_v27 }
 0xcb2   :  { %4874 = vmatpush1.bf16.msra.mxu0 %v6211_v21  ;;  %4906 = vmatpush1.bf16.msra.mxu1 %v6214_v57 }
 0xcb3   :  { %4908 = vmatprep.subr.bf16.mxu0 %v6123_v46  ;;  %4940 = vmatprep.subr.bf16.mxu1 %v6125_v55 }
 0xd68   :  { %v3151_v59 = vpop.f32.mrb[24].mxu0  ;;  %v3222_v2 = vpop.f32.mrb[24].mxu1 }
 0xd69   :  { %v5075_v38 = vadd.f32 %v3151_v59, %v6276_v11  ;;  %v3153_v47 = vpop.f32.mrb[25].mxu0  ;;  %v3224_v56 = vpop.f32.mrb[25].mxu1  ;;  %v5091_v36 = vadd.f32 %v3222_v2, %v6291_v35 }
 0xd6a   :  { %v5076_v60 = vadd.f32 %v3153_v47, %v6280_v34  ;;  %v5092_v19 = vadd.f32 %v3224_v56, %v6286_v40 }
 0xd6b   :  { %v3865_v63 = vmul.f32 -1.442695, %v5075_v38 }
 0xd6c   :  { %v3866_v13 = vmul.f32 -1.442695, %v5076_v60  ;;  %v3867_v23 = vmul.f32 -1.442695, %v5092_v19 }
 0xd6d   :  { %5361 = vpow2.f32 %v3865_v63 }
 0xd6e   :  { %5363 = vpow2.f32 %v3866_v13 }
 0xd6f   :  { %5365 = vpow2.f32 %v3867_v23 }
 0xd70   :  { %5367 = vtanh.f32 %v5091_v36 }
 0xd77   :  { %v5362_v33 = vpop.eup %5361 }
 0xd78   :  { %v5364_v58 = vpop.eup %5363  ;;  %v3234_v4 = vadd.f32 1.0, %v5362_v33 }
 0xd79   :  { %v3240_v37 = vadd.f32 1.0, %v5364_v58  ;;  %v5366_v9 = vpop.eup %5365 }
 0xd7a   :  { %5369 = vrcp.f32 %v3234_v4  ;;  %v5368_v39 = vpop.eup %5367  ;;  %v3247_v7 = vadd.f32 1.0, %v5366_v9 }
 0xd7b   :  { %5371 = vrcp.f32 %v3240_v37 }
 0xd7c   :  { %5373 = vrcp.f32 %v3247_v7 }
 0xd84   :  { %v5370_v22 = vpop.eup %5369 }
 0xd85   :  { %v5372_v43 = vpop.eup %5371  ;;  %v3252_v51 = vmul.f32 %v5370_v22, %v5368_v39 }
 0xd86   :  { %v3251_v31 = vmul.f32 %v5372_v43, %v6432_v52  ;;  %v5374_v45 = vpop.eup %5373 }
 0xd88   :  { %v6477_v61 = vadd.f32 %v3252_v51, %v3251_v31 }
 0xd8a   :  { %5375 = vtanh.f32 %v6477_v61 }
 0xd94   :  { %v5376_v25 = vpop.eup %5375 }
 0xd95   :  { %v3255_v49 = vmul.f32 %v5376_v25, %v5374_v45 }
 0xd97   :  { %3868 = vst [vmem:[%s6588_s7 + $0x20] sm:$0xff] %v3255_v49  ;;  %3329 = vmatmul.mubr.f32.vlgmr.msra.gmra.mrb[26].mxu0 %v3255_v49  ;;  %3400 = vmatmul.mubr.f32.vlgmr.msra.gmra.mrb[26].mxu1 %v3255_v49 }
 0xd98   :  { %4910 = vmatpush1.bf16.msra.mxu0 %v6127_v42  ;;  %4942 = vmatpush1.bf16.msra.mxu1 %v6130_v1 }
 0xd99   :  { %4912 = vmatprep.subr.bf16.mxu0 %v6135_v5  ;;  %4944 = vmatprep.subr.bf16.mxu1 %v6137_v30 }
 0xd9a   :  { %3507 = vmatprep.mubr.f32.mxu0 %v5500_v0  ;;  %3578 = vmatprep.mubr.f32.mxu1 %v5500_v0 }
 0xd9c   :  { %4914 = vmatpush1.bf16.msra.mxu0 %v6139_v17  ;;  %4946 = vmatpush1.bf16.msra.mxu1 %v6142_v8 }
 0xd9d   :  { %4916 = vmatprep.subr.bf16.mxu0 %v6147_v53  ;;  %4948 = vmatprep.subr.bf16.mxu1 %v6149_v3 }
 0xda0   :  { %4918 = vmatpush1.bf16.msra.mxu0 %v6151_v6  ;;  %4950 = vmatpush1.bf16.msra.mxu1 %v6154_v16 }
 0xda1   :  { %4920 = vmatprep.subr.bf16.mxu0 %v6159_v29  ;;  %4952 = vmatprep.subr.bf16.mxu1 %v6161_v44 }
 0xda4   :  { %4922 = vmatpush1.bf16.msra.mxu0 %v6163_v48  ;;  %4954 = vmatpush1.bf16.msra.mxu1 %v6166_v62 }
 0xda5   :  { %4924 = vmatprep.subr.bf16.mxu0 %v6171_v18  ;;  %4956 = vmatprep.subr.bf16.mxu1 %v6173_v20 }
 0xda8   :  { %4926 = vmatpush1.bf16.msra.mxu0 %v6175_v12  ;;  %4958 = vmatpush1.bf16.msra.mxu1 %v6178_v15 }
 0xda9   :  { %4928 = vmatprep.subr.bf16.mxu0 %v6183_v41  ;;  %4960 = vmatprep.subr.bf16.mxu1 %v6185_v28 }
 0xdac   :  { %4930 = vmatpush1.bf16.msra.mxu0 %v6187_v24  ;;  %4962 = vmatpush1.bf16.msra.mxu1 %v6190_v50 }
 0xdad   :  { %4932 = vmatprep.subr.bf16.mxu0 %v6195_v10  ;;  %4964 = vmatprep.subr.bf16.mxu1 %v6197_v26 }
 0xdb0   :  { %4934 = vmatpush1.bf16.msra.mxu0 %v6199_v32  ;;  %4966 = vmatpush1.bf16.msra.mxu1 %v6202_v54 }
 0xdb1   :  { %4936 = vmatprep.subr.bf16.mxu0 %v6207_v14  ;;  %4968 = vmatprep.subr.bf16.mxu1 %v6209_v27 }
 0xdb4   :  { %4938 = vmatpush1.bf16.msra.mxu0 %v6211_v21  ;;  %4970 = vmatpush1.bf16.msra.mxu1 %v6214_v57 }
 0xdb5   :  { %4972 = vmatprep.subr.bf16.mxu0 %v6123_v46  ;;  %5004 = vmatprep.subr.bf16.mxu1 %v6125_v55 }
 0xe6a   :  { %v3330_v52 = vpop.f32.mrb[26].mxu0  ;;  %v3401_v59 = vpop.f32.mrb[26].mxu1 }
 0xe6b   :  { %v5077_v2 = vadd.f32 %v3330_v52, %v6276_v11  ;;  %v3332_v38 = vpop.f32.mrb[27].mxu0  ;;  %v3403_v47 = vpop.f32.mrb[27].mxu1  ;;  %v5093_v23 = vadd.f32 %v3401_v59, %v6291_v35 }
 0xe6c   :  { %v5078_v56 = vadd.f32 %v3332_v38, %v6280_v34  ;;  %v5094_v13 = vadd.f32 %v3403_v47, %v6286_v40 }
 0xe6d   :  { %v3869_v60 = vmul.f32 -1.442695, %v5077_v2 }
 0xe6e   :  { %v3870_v63 = vmul.f32 -1.442695, %v5078_v56  ;;  %v3871_v19 = vmul.f32 -1.442695, %v5094_v13 }
 0xe6f   :  { %5377 = vpow2.f32 %v3869_v60 }
 0xe70   :  { %5379 = vpow2.f32 %v3870_v63 }
 0xe71   :  { %5381 = vpow2.f32 %v3871_v19 }
 0xe72   :  { %5383 = vtanh.f32 %v5093_v23 }
 0xe79   :  { %v5378_v46 = vpop.eup %5377 }
 0xe7a   :  { %v5380_v36 = vpop.eup %5379  ;;  %v3413_v55 = vadd.f32 1.0, %v5378_v46 }
 0xe7b   :  { %v3419_v33 = vadd.f32 1.0, %v5380_v36  ;;  %v5382_v58 = vpop.eup %5381 }
 0xe7c   :  { %5385 = vrcp.f32 %v3413_v55  ;;  %v5384_v4 = vpop.eup %5383  ;;  %v3426_v22 = vadd.f32 1.0, %v5382_v58 }
 0xe7d   :  { %5387 = vrcp.f32 %v3419_v33 }
 0xe7e   :  { %5389 = vrcp.f32 %v3426_v22 }
 0xe86   :  { %v5386_v37 = vpop.eup %5385 }
 0xe87   :  { %v5388_v9 = vpop.eup %5387  ;;  %v3431_v39 = vmul.f32 %v5386_v37, %v5384_v4 }
 0xe88   :  { %v3430_v43 = vmul.f32 %v5388_v9, %v6477_v61  ;;  %v5390_v7 = vpop.eup %5389 }
 0xe8a   :  { %v6522_v51 = vadd.f32 %v3431_v39, %v3430_v43 }
 0xe8c   :  { %5391 = vtanh.f32 %v6522_v51 }
 0xe96   :  { %v5392_v31 = vpop.eup %5391 }
 0xe97   :  { %v3434_v45 = vmul.f32 %v5392_v31, %v5390_v7 }
 0xe99   :  { %3872 = vst [vmem:[%s6588_s7 + $0x28] sm:$0xff] %v3434_v45  ;;  %3508 = vmatmul.mubr.f32.vlgmr.msra.gmra.mrb[28].mxu0 %v3434_v45  ;;  %3579 = vmatmul.mubr.f32.vlgmr.msra.gmra.mrb[28].mxu1 %v3434_v45 }
 0xe9a   :  { %4974 = vmatpush1.bf16.msra.mxu0 %v6127_v42  ;;  %5006 = vmatpush1.bf16.msra.mxu1 %v6130_v1 }
 0xe9b   :  { %4976 = vmatprep.subr.bf16.mxu0 %v6135_v5  ;;  %5008 = vmatprep.subr.bf16.mxu1 %v6137_v30 }
 0xe9c   :  { %3686 = vmatprep.mubr.f32.mxu0 %v5500_v0  ;;  %3757 = vmatprep.mubr.f32.mxu1 %v5500_v0 }
 0xe9e   :  { %4978 = vmatpush1.bf16.msra.mxu0 %v6139_v17  ;;  %5010 = vmatpush1.bf16.msra.mxu1 %v6142_v8 }
 0xe9f   :  { %4980 = vmatprep.subr.bf16.mxu0 %v6147_v53  ;;  %5012 = vmatprep.subr.bf16.mxu1 %v6149_v3 }
 0xea2   :  { %4982 = vmatpush1.bf16.msra.mxu0 %v6151_v6  ;;  %5014 = vmatpush1.bf16.msra.mxu1 %v6154_v16 }
 0xea3   :  { %4984 = vmatprep.subr.bf16.mxu0 %v6159_v29  ;;  %5016 = vmatprep.subr.bf16.mxu1 %v6161_v44 }
 0xea6   :  { %4986 = vmatpush1.bf16.msra.mxu0 %v6163_v48  ;;  %5018 = vmatpush1.bf16.msra.mxu1 %v6166_v62 }
 0xea7   :  { %4988 = vmatprep.subr.bf16.mxu0 %v6171_v18  ;;  %5020 = vmatprep.subr.bf16.mxu1 %v6173_v20 }
 0xeaa   :  { %4990 = vmatpush1.bf16.msra.mxu0 %v6175_v12  ;;  %5022 = vmatpush1.bf16.msra.mxu1 %v6178_v15 }
 0xeab   :  { %4992 = vmatprep.subr.bf16.mxu0 %v6183_v41  ;;  %5024 = vmatprep.subr.bf16.mxu1 %v6185_v28 }
 0xeae   :  { %4994 = vmatpush1.bf16.msra.mxu0 %v6187_v24  ;;  %5026 = vmatpush1.bf16.msra.mxu1 %v6190_v50 }
 0xeaf   :  { %4996 = vmatprep.subr.bf16.mxu0 %v6195_v10  ;;  %5028 = vmatprep.subr.bf16.mxu1 %v6197_v26 }
 0xeb2   :  { %4998 = vmatpush1.bf16.msra.mxu0 %v6199_v32  ;;  %5030 = vmatpush1.bf16.msra.mxu1 %v6202_v54 }
 0xeb3   :  { %5000 = vmatprep.subr.bf16.mxu0 %v6207_v14  ;;  %5032 = vmatprep.subr.bf16.mxu1 %v6209_v27 }
 0xeb6   :  { %5002 = vmatpush1.bf16.msra.mxu0 %v6211_v21  ;;  %5034 = vmatpush1.bf16.msra.mxu1 %v6214_v57 }
 0xf6c   :  { %v3509_v0 = vpop.f32.mrb[28].mxu0  ;;  %v3580_v42 = vpop.f32.mrb[28].mxu1 }
 0xf6d   :  { %v5079_v1 = vadd.f32 %v3509_v0, %v6276_v11  ;;  %v3511_v5 = vpop.f32.mrb[29].mxu0  ;;  %v3582_v30 = vpop.f32.mrb[29].mxu1  ;;  %v5095_v16 = vadd.f32 %v3580_v42, %v6291_v35 }
 0xf6e   :  { %v5080_v17 = vadd.f32 %v3511_v5, %v6280_v34  ;;  %v5096_v3 = vadd.f32 %v3582_v30, %v6286_v40 }
 0xf6f   :  { %v3873_v8 = vmul.f32 -1.442695, %v5079_v1 }
 0xf70   :  { %v3874_v53 = vmul.f32 -1.442695, %v5080_v17  ;;  %v3875_v6 = vmul.f32 -1.442695, %v5096_v3 }
 0xf71   :  { %5393 = vpow2.f32 %v3873_v8 }
 0xf72   :  { %5395 = vpow2.f32 %v3874_v53 }
 0xf73   :  { %5397 = vpow2.f32 %v3875_v6 }
 0xf74   :  { %5399 = vtanh.f32 %v5095_v16 }
 0xf7b   :  { %v5394_v29 = vpop.eup %5393 }
 0xf7c   :  { %v5396_v44 = vpop.eup %5395  ;;  %v3592_v48 = vadd.f32 1.0, %v5394_v29 }
 0xf7d   :  { %v3598_v62 = vadd.f32 1.0, %v5396_v44  ;;  %v5398_v18 = vpop.eup %5397 }
 0xf7e   :  { %5401 = vrcp.f32 %v3592_v48  ;;  %v5400_v20 = vpop.eup %5399  ;;  %v3605_v28 = vadd.f32 1.0, %v5398_v18 }
 0xf7f   :  { %5403 = vrcp.f32 %v3598_v62 }
 0xf80   :  { %5405 = vrcp.f32 %v3605_v28 }
 0xf88   :  { %v5402_v12 = vpop.eup %5401 }
 0xf89   :  { %v5404_v15 = vpop.eup %5403  ;;  %v3610_v41 = vmul.f32 %v5402_v12, %v5400_v20 }
 0xf8a   :  { %v3609_v24 = vmul.f32 %v5404_v15, %v6522_v51  ;;  %v5406_v10 = vpop.eup %5405 }
 0xf8c   :  { %v3611_v50 = vadd.f32 %v3610_v41, %v3609_v24 }
 0xf8e   :  { %5407 = vtanh.f32 %v3611_v50 }
 0xf98   :  { %v5408_v26 = vpop.eup %5407 }
 0xf99   :  { %v3613_v32 = vmul.f32 %v5408_v26, %v5406_v10 }
 0xf9b   :  { %3876 = vst [vmem:[%s6588_s7 + $0x30] sm:$0xff] %v3613_v32  ;;  %3687 = vmatmul.mubr.f32.vlgmr.msra.gmra.mrb[30].mxu0 %v3613_v32  ;;  %3758 = vmatmul.mubr.f32.vlgmr.msra.gmra.mrb[30].mxu1 %v3613_v32 }
0x106e   :  { %v3688_v54 = vpop.f32.mrb[30].mxu0  ;;  %v3759_v14 = vpop.f32.mrb[30].mxu1 }
0x106f   :  { %v5081_v27 = vadd.f32 %v3688_v54, %v6276_v11  ;;  %v3690_v21 = vpop.f32.mrb[31].mxu0  ;;  %v3761_v57 = vpop.f32.mrb[31].mxu1  ;;  %v5097_v2 = vadd.f32 %v3759_v14, %v6291_v35 }
0x1070   :  { %v5082_v61 = vadd.f32 %v3690_v21, %v6280_v34  ;;  %v5098_v52 = vadd.f32 %v3761_v57, %v6286_v40 }
0x1071   :  { %v3877_v25 = vmul.f32 -1.442695, %v5081_v27 }
0x1072   :  { %v3878_v49 = vmul.f32 -1.442695, %v5082_v61  ;;  %v3879_v59 = vmul.f32 -1.442695, %v5098_v52 }
0x1073   :  { %5409 = vpow2.f32 %v3877_v25 }
0x1074   :  { %5411 = vpow2.f32 %v3878_v49 }
0x1075   :  { %5413 = vpow2.f32 %v3879_v59 }
0x1076   :  { %5415 = vtanh.f32 %v5097_v2 }
0x107d   :  { %v5410_v38 = vpop.eup %5409 }
0x107e   :  { %v5412_v47 = vpop.eup %5411  ;;  %v3771_v56 = vadd.f32 1.0, %v5410_v38 }
0x107f   :  { %v3777_v60 = vadd.f32 1.0, %v5412_v47  ;;  %v5414_v11 = vpop.eup %5413 }
0x1080   :  { %5417 = vrcp.f32 %v3771_v56  ;;  %v5416_v63 = vpop.eup %5415  ;;  %v3784_v23 = vadd.f32 1.0, %v5414_v11 }
0x1081   :  { %5419 = vrcp.f32 %v3777_v60 }
0x1082   :  { %5421 = vrcp.f32 %v3784_v23 }
0x108a   :  { %v5418_v34 = vpop.eup %5417 }
0x108b   :  { %v5420_v13 = vpop.eup %5419  ;;  %v3789_v19 = vmul.f32 %v5418_v34, %v5416_v63 }
0x108c   :  { %v3788_v46 = vmul.f32 %v5420_v13, %v3611_v50  ;;  %v5422_v40 = vpop.eup %5421 }
0x108e   :  { %v3790_v36 = vadd.f32 %v3789_v19, %v3788_v46 }
0x1090   :  { %5423 = vtanh.f32 %v3790_v36  ;;  %3882 = vst [vmem:[%s6590_s9 + $0x8] sm:$0xff] %v3790_v36 }
0x109a   :  { %v5424_v35 = vpop.eup %5423 }
0x109b   :  { %v3792_v55 = vmul.f32 %v5424_v35, %v5422_v40 }
0x109d   :  { %3880 = vst [vmem:[%s6588_s7 + $0x38] sm:$0xff] %v3792_v55  ;;  %3881 = vst [vmem:[%s6589_s8 + $0x8] sm:$0xff] %v3792_v55 }
0x109e   :  { %3814 = vsyncpa [#allocation6], 1 }
0x109f   :  { %3815 = vsyncpa [#allocation8], 1 }

</bundles_post_ra>
